<compile_context>
chip_gen: v7x
topology: tpu7x:2x2x1
jax: 0.10.0
libtpu: 0.0.40
codegen_flags: <defaults>
</compile_context>

<pallas_src>
import functools
import math

import jax
import jax.numpy as jnp
from jax.experimental import pallas as pl
from jax.experimental.pallas import tpu as pltpu


# ----------------------------- shared helpers -----------------------------

@functools.lru_cache(maxsize=None)
def _vmem_limit_bytes():
    # v5e/v6e have 128 MiB VMEM per core, v7x only 64 MiB: budget ~3/4 of physical, capped
    # at 96 MiB (per-review: 64-96 MiB on v5e/v6e, <= ~48 MiB on v7x).
    try:
        cap = int(pltpu.get_tpu_info().vmem_capacity_bytes)
    except Exception:
        cap = 64 * 1024 * 1024
    return min(96 * 1024 * 1024, (cap * 3) // 4)


def _cparams(dimension_semantics):
    return pltpu.CompilerParams(
        dimension_semantics=dimension_semantics,
        vmem_limit_bytes=_vmem_limit_bytes(),
    )


def _row_tile(m, target=512):
    """Pick a row tile: full extent when small, else a multiple of 8 dividing m."""
    if m <= target:
        return m
    t = target
    while t >= 8:
        if m % t == 0:
            return t
        t -= 8
    return m


def _round_up(x, m):
    return ((x + m - 1) // m) * m


def _ln(x, g, b, eps):
    """LayerNorm matching the Annotated-Transformer reference:
    unbiased std (ddof=1), eps added to std (not variance)."""
    d = x.shape[-1]
    mean = jnp.mean(x, axis=-1, keepdims=True)
    xc = x - mean
    var = jnp.sum(xc * xc, axis=-1, keepdims=True) * (1.0 / (d - 1))
    return g * xc / (jnp.sqrt(var) + eps) + b


def _mha(q_all, k_all, v_all, bias, B, Lq, Lk, H, scale):
    """Multi-head attention core on batch-folded rows.
    q_all: (B*Lq, D), k_all/v_all: (B*Lk, D) f32; bias: (B, 1|Lq, Lk) additive f32.
    Returns (B*Lq, D) f32.  Each head's score / PV matmuls are batched over B in one 3-D
    einsum (MXU, bf16 operands, f32 accumulation); softmax stays f32 (EUP reciprocal)."""
    D = q_all.shape[-1]
    dh = D // H
    q3 = (q_all * scale).reshape(B, Lq, D)
    k3 = k_all.reshape(B, Lk, D)
    v3 = v_all.reshape(B, Lk, D)
    # hoist the mask-bias broadcast out of the per-head loop (broadcast_in_dim is not CSE'd)
    bias_b = jnp.broadcast_to(bias, (B, Lq, Lk))
    # TODO(synk): fully batching heads into one (B*H)-batched einsum needs an in-kernel
    # D -> (H, dh) lane-splitting relayout (dh < 128) that Mosaic does not lower cleanly;
    # per-head lane slices + a B-batched einsum per head are used instead.
    outs = []
    for h in range(H):
        sl = slice(h * dh, (h + 1) * dh)
        q = q3[:, :, sl].astype(jnp.bfloat16)
        k = k3[:, :, sl].astype(jnp.bfloat16)
        v = v3[:, :, sl].astype(jnp.bfloat16)
        s = jnp.einsum("bqd,bkd->bqk", q, k,
                       preferred_element_type=jnp.float32) + bias_b      # (B, Lq, Lk)
        m = jnp.max(s, axis=-1, keepdims=True)
        p = jnp.exp(s - m)
        p = p * pl.reciprocal(jnp.sum(p, axis=-1, keepdims=True), approx=True)
        outs.append(jnp.einsum("bqk,bkd->bqd", p.astype(jnp.bfloat16), v,
                               preferred_element_type=jnp.float32))      # (B, Lq, dh)
    return jnp.concatenate(outs, axis=-1).reshape(B * Lq, D)


# ------------------------- fused encoder-STACK kernel -------------------------
# grid = (N_layers,), activation resident in o_ref (constant output index across layers).

def _enc_stack_kernel(x_in_ref, mask_ref,
                      ln1g, ln1b, wqkv, bqkv, wo, bo,
                      ln2g, ln2b, w1, b1, w2, b2,
                      lnfg, lnfb, o_ref, *, H, eps, n_layers):
    layer = pl.program_id(0)

    @pl.when(layer == 0)
    def _():
        o_ref[...] = x_in_ref[...]

    x3 = o_ref[...]                                   # (B, L, D) f32, resident in VMEM
    B, L, D = x3.shape
    x = x3.reshape(B * L, D)                          # batch folded into matmul rows
    scale = 1.0 / math.sqrt(D // H)

    bias = jnp.where(mask_ref[...] == 0, -1e9, 0.0).astype(jnp.float32)   # (B, 1|L, L)

    # --- pre-LN + fused QKV projection + self-attention + output proj + residual ---
    xn = _ln(x, ln1g[0], ln1b[0], eps)
    qkv = jnp.dot(xn.astype(jnp.bfloat16), wqkv[0],
                  preferred_element_type=jnp.float32) + bqkv[0]           # (B*L, 3D)
    attn = _mha(qkv[:, :D], qkv[:, D:2 * D], qkv[:, 2 * D:],
                bias, B, L, L, H, scale)
    x = x + jnp.dot(attn.astype(jnp.bfloat16), wo[0],
                    preferred_element_type=jnp.float32) + bo[0]

    # --- pre-LN + FFN + residual ---
    xn = _ln(x, ln2g[0], ln2b[0], eps)
    h1 = jnp.maximum(jnp.dot(xn.astype(jnp.bfloat16), w1[0],
                             preferred_element_type=jnp.float32) + b1[0], 0.0)
    y = x + jnp.dot(h1.astype(jnp.bfloat16), w2[0],
                    preferred_element_type=jnp.float32) + b2[0]

    @pl.when(layer < n_layers - 1)
    def _():
        o_ref[...] = y.reshape(B, L, D)

    # encoder-final LayerNorm fused into the last layer's epilogue (no standalone LN kernel)
    @pl.when(layer == n_layers - 1)
    def _():
        o_ref[...] = _ln(y, lnfg[...], lnfb[...], eps).reshape(B, L, D)


def encoder_stack(x, src_mask, ep, H, eps=1e-6):
    B, L, D = x.shape
    mq = src_mask.shape[1]
    N = ep["wqkv"].shape[0]

    def const(shape):
        # Constant-index blocks are fetched once and stay resident across the layer grid.
        # TODO(synk): on v7x (64 MiB VMEM) add pipeline_mode=pl.Buffered(1) here to
        # single-buffer these blocks once that is load-bearing at real sizes.
        return pl.BlockSpec(shape, lambda l, _n=len(shape): (0,) * _n)

    def per_layer(arr):
        return pl.BlockSpec((1,) + arr.shape[1:], lambda l: (l, 0, 0))

    layer_args = (ep["ln1_g"], ep["ln1_b"], ep["wqkv"], ep["bqkv"], ep["wo"], ep["bo"],
                  ep["ln2_g"], ep["ln2_b"], ep["w1"], ep["b1"], ep["w2"], ep["b2"])

    return pl.pallas_call(
        functools.partial(_enc_stack_kernel, H=H, eps=eps, n_layers=N),
        out_shape=jax.ShapeDtypeStruct((B, L, D), jnp.float32),
        grid=(N,),
        in_specs=[const((B, L, D)), const((B, mq, L))]
                 + [per_layer(a) for a in layer_args]
                 + [const((1, D)), const((1, D))],
        out_specs=pl.BlockSpec((B, L, D), lambda l: (0, 0, 0)),
        compiler_params=_cparams(("arbitrary",)),
    )(x, src_mask, *layer_args, ep["lnf_g"], ep["lnf_b"])


# ------------------------- fused decoder-STACK kernel -------------------------

def _dec_stack_kernel(x_in_ref, mem_ref, smask_ref, tmask_ref,
                      ln1g, ln1b, wqkv, bqkv, wos, bos,
                      ln2g, ln2b, wqc, bqc, wkvc, bkvc, woc, boc,
                      ln3g, ln3b, w1, b1, w2, b2,
                      o_ref, *, H, eps):
    layer = pl.program_id(0)

    @pl.when(layer == 0)
    def _():
        o_ref[...] = x_in_ref[...]

    x3 = o_ref[...]                                   # (B, Lt, D) f32, resident
    B, Lt, D = x3.shape
    mem3 = mem_ref[...]                               # (B, Ls, D), fetched once (constant idx)
    Ls = mem3.shape[1]
    x = x3.reshape(B * Lt, D)
    mem = mem3.reshape(B * Ls, D)
    scale = 1.0 / math.sqrt(D // H)

    bias_t = jnp.where(tmask_ref[...] == 0, -1e9, 0.0).astype(jnp.float32)  # (B, Lt, Lt)
    bias_s = jnp.where(smask_ref[...] == 0, -1e9, 0.0).astype(jnp.float32)  # (B, 1|Lt, Ls)

    # --- masked self-attention (fused QKV) + residual ---
    xn = _ln(x, ln1g[0], ln1b[0], eps)
    qkv = jnp.dot(xn.astype(jnp.bfloat16), wqkv[0],
                  preferred_element_type=jnp.float32) + bqkv[0]             # (B*Lt, 3D)
    a = _mha(qkv[:, :D], qkv[:, D:2 * D], qkv[:, 2 * D:],
             bias_t, B, Lt, Lt, H, scale)
    x = x + jnp.dot(a.astype(jnp.bfloat16), wos[0],
                    preferred_element_type=jnp.float32) + bos[0]

    # --- cross-attention on encoder memory (fused KV) + residual ---
    xn = _ln(x, ln2g[0], ln2b[0], eps)
    q_all = jnp.dot(xn.astype(jnp.bfloat16), wqc[0],
                    preferred_element_type=jnp.float32) + bqc[0]            # (B*Lt, D)
    kv = jnp.dot(mem.astype(jnp.bfloat16), wkvc[0],
                 preferred_element_type=jnp.float32) + bkvc[0]              # (B*Ls, 2D)
    a = _mha(q_all, kv[:, :D], kv[:, D:], bias_s, B, Lt, Ls, H, scale)
    x = x + jnp.dot(a.astype(jnp.bfloat16), woc[0],
                    preferred_element_type=jnp.float32) + boc[0]

    # --- FFN + residual (final decoder LayerNorm is fused into the generator kernel) ---
    xn = _ln(x, ln3g[0], ln3b[0], eps)
    h1 = jnp.maximum(jnp.dot(xn.astype(jnp.bfloat16), w1[0],
                             preferred_element_type=jnp.float32) + b1[0], 0.0)
    y = x + jnp.dot(h1.astype(jnp.bfloat16), w2[0],
                    preferred_element_type=jnp.float32) + b2[0]

    o_ref[...] = y.reshape(B, Lt, D)


def decoder_stack(x, memory, src_mask, tgt_mask, dp, H, eps=1e-6):
    B, Lt, D = x.shape
    Ls = memory.shape[1]
    smq = src_mask.shape[1]
    tmq = tgt_mask.shape[1]
    N = dp["wqkv"].shape[0]

    def const(shape):
        return pl.BlockSpec(shape, lambda l, _n=len(shape): (0,) * _n)

    def per_layer(arr):
        return pl.BlockSpec((1,) + arr.shape[1:], lambda l: (l, 0, 0))

    layer_args = (dp["ln1_g"], dp["ln1_b"], dp["wqkv"], dp["bqkv"], dp["wo_s"], dp["bo_s"],
                  dp["ln2_g"], dp["ln2_b"], dp["wq_c"], dp["bq_c"], dp["wkv_c"], dp["bkv_c"],
                  dp["wo_c"], dp["bo_c"],
                  dp["ln3_g"], dp["ln3_b"], dp["w1"], dp["b1"], dp["w2"], dp["b2"])

    return pl.pallas_call(
        functools.partial(_dec_stack_kernel, H=H, eps=eps),
        out_shape=jax.ShapeDtypeStruct((B, Lt, D), jnp.float32),
        grid=(N,),
        in_specs=[const((B, Lt, D)), const((B, Ls, D)),
                  const((B, smq, Ls)), const((B, tmq, Lt))]
                 + [per_layer(a) for a in layer_args],
        out_specs=pl.BlockSpec((B, Lt, D), lambda l: (0, 0, 0)),
        compiler_params=_cparams(("arbitrary",)),
    )(x, memory, src_mask, tgt_mask, *layer_args)


# --------- generator (fused decoder-final LN + vocab matmul + exact log_softmax) ---------

def _generator_kernel(x_ref, g_ref, b_ref, w_ref, bv_ref, o_ref, *, eps):
    xn = _ln(x_ref[...], g_ref[...], b_ref[...], eps)
    z = jnp.dot(xn.astype(jnp.bfloat16), w_ref[...],
                preferred_element_type=jnp.float32) + bv_ref[...]
    m = jnp.max(z, axis=-1, keepdims=True)
    lse = jnp.log(jnp.sum(jnp.exp(z - m), axis=-1, keepdims=True)) + m
    o_ref[...] = z - lse      # log_softmax over the (padded) vocab axis


def generator_logprobs(x, g, b, w, bv, n_vocab, eps=1e-6):
    # Vocab axis is pre-padded to a multiple of 128 (lane-dense stores); padded columns carry
    # a -1e9 bias so they vanish from the log-sum-exp, and are sliced off here.
    # TODO(synk): for realistic vocab sizes (V ~ 32k) add a second "arbitrary" grid axis over
    # 2-4k-lane vocab tiles with an online logsumexp so the weight block fits v7x's 64 MiB VMEM.
    B, L, D = x.shape
    Vp = w.shape[1]
    M = B * L
    tm = _row_tile(M)
    out = pl.pallas_call(
        functools.partial(_generator_kernel, eps=eps),
        out_shape=jax.ShapeDtypeStruct((M, Vp), jnp.float32),
        grid=(M // tm,),
        in_specs=[pl.BlockSpec((tm, D), lambda i: (i, 0)),
                  pl.BlockSpec((1, D), lambda i: (0, 0)),
                  pl.BlockSpec((1, D), lambda i: (0, 0)),
                  pl.BlockSpec((D, Vp), lambda i: (0, 0)),
                  pl.BlockSpec((1, Vp), lambda i: (0, 0))],
        out_specs=pl.BlockSpec((tm, Vp), lambda i: (i, 0)),
        compiler_params=_cparams(("parallel",)),
    )(x.reshape(M, D), g, b, w, bv.reshape(1, Vp))
    return out[:, :n_vocab].reshape(B, L, n_vocab)


# --------------------------- model (jitted JAX glue + fused kernels) ---------------------------

def positional_encoding(L, D):
    pos = jnp.arange(L, dtype=jnp.float32)[:, None]
    div = jnp.exp(jnp.arange(0, D, 2, dtype=jnp.float32) * (-math.log(10000.0) / D))
    pe = jnp.zeros((L, D), dtype=jnp.float32)
    pe = pe.at[:, 0::2].set(jnp.sin(pos * div))
    pe = pe.at[:, 1::2].set(jnp.cos(pos * div))
    return pe


def embed(tokens, table, D):
    # TODO(synk): the embedding gather stays in plain (jitted) JAX glue; a data-dependent
    # DMA-gather kernel is not the hot path at these sizes.
    L = tokens.shape[1]
    return table[tokens].astype(jnp.float32) * math.sqrt(D) + positional_encoding(L, D)[None]


def encode(params, src, src_mask, D, H):
    x = embed(src, params["src_emb"], D)
    return encoder_stack(x, src_mask, params["enc"], H)         # final enc LN fused in-kernel


def decode(params, memory, src_mask, tgt, tgt_mask, D, H):
    x = embed(tgt, params["tgt_emb"], D)
    return decoder_stack(x, memory, src_mask, tgt_mask, params["dec"], H)


def forward(params, src, tgt, src_mask, tgt_mask, D, H, n_vocab):
    memory = encode(params, src, src_mask, D, H)
    dec = decode(params, memory, src_mask, tgt, tgt_mask, D, H)
    return generator_logprobs(dec, params["dec"]["lnf_g"], params["dec"]["lnf_b"],
                              params["gen_w"], params["gen_b"], n_vocab)


# ------------------------------ parameter init ------------------------------

def init_params(key, src_vocab, tgt_vocab, D, H, F, N):
    keys = iter(jax.random.split(key, 64))

    def w(shape, scale=0.05, dtype=jnp.bfloat16):
        # MXU weights stored bf16 (halves HBM/VMEM bytes); f32 accumulation in-kernel.
        return (scale * jax.random.normal(next(keys), shape)).astype(dtype)

    def ones_v(shape):
        return jnp.ones(shape, jnp.float32)

    def zeros_v(shape):
        return jnp.zeros(shape, jnp.float32)

    # Per-layer params carry a leading N_layers axis (sliced by the layer grid axis); 1-D
    # vectors are stored as (N, 1, K) so the sliced axis never lands in the last two dims.
    enc = {
        "ln1_g": ones_v((N, 1, D)), "ln1_b": zeros_v((N, 1, D)),
        "wqkv": w((N, D, 3 * D)), "bqkv": zeros_v((N, 1, 3 * D)),
        "wo": w((N, D, D)), "bo": zeros_v((N, 1, D)),
        "ln2_g": ones_v((N, 1, D)), "ln2_b": zeros_v((N, 1, D)),
        "w1": w((N, D, F)), "b1": zeros_v((N, 1, F)),
        "w2": w((N, F, D)), "b2": zeros_v((N, 1, D)),
        "lnf_g": ones_v((1, D)), "lnf_b": zeros_v((1, D)),
    }
    dec = {
        "ln1_g": ones_v((N, 1, D)), "ln1_b": zeros_v((N, 1, D)),
        "wqkv": w((N, D, 3 * D)), "bqkv": zeros_v((N, 1, 3 * D)),
        "wo_s": w((N, D, D)), "bo_s": zeros_v((N, 1, D)),
        "ln2_g": ones_v((N, 1, D)), "ln2_b": zeros_v((N, 1, D)),
        "wq_c": w((N, D, D)), "bq_c": zeros_v((N, 1, D)),
        "wkv_c": w((N, D, 2 * D)), "bkv_c": zeros_v((N, 1, 2 * D)),
        "wo_c": w((N, D, D)), "bo_c": zeros_v((N, 1, D)),
        "ln3_g": ones_v((N, 1, D)), "ln3_b": zeros_v((N, 1, D)),
        "w1": w((N, D, F)), "b1": zeros_v((N, 1, F)),
        "w2": w((N, F, D)), "b2": zeros_v((N, 1, D)),
        "lnf_g": ones_v((1, D)), "lnf_b": zeros_v((1, D)),
    }

    # Generator weights padded so the vocab axis is a multiple of 128 (lane-dense stores).
    Vp = _round_up(tgt_vocab, 128)
    gen_w = jnp.zeros((D, Vp), jnp.bfloat16).at[:, :tgt_vocab].set(w((D, tgt_vocab)))
    gen_b = jnp.full((Vp,), -1e9, jnp.float32).at[:tgt_vocab].set(0.0)

    return {
        "src_emb": w((src_vocab, D), 1.0, jnp.float32),
        "tgt_emb": w((tgt_vocab, D), 1.0, jnp.float32),
        "enc": enc, "dec": dec,
        "gen_w": gen_w, "gen_b": gen_b,
    }


# ----------------------------------- main -----------------------------------

if __name__ == "__main__":
    B, Ls, Lt = 2, 8, 8
    D, H, F, Nl = 32, 4, 64, 2
    src_vocab, tgt_vocab = 48, 64

    root = jax.random.PRNGKey(0)
    k_src, k_tgt, k_par = jax.random.split(root, 3)

    src = jax.random.randint(k_src, (B, Ls), 0, src_vocab, dtype=jnp.int32)
    tgt = jax.random.randint(k_tgt, (B, Lt), 0, tgt_vocab, dtype=jnp.int32)
    src_mask = jnp.ones((B, 1, Ls), dtype=jnp.int32)
    tgt_mask = jnp.broadcast_to(jnp.tril(jnp.ones((Lt, Lt), dtype=jnp.int32))[None],
                                (B, Lt, Lt))

    params = init_params(k_par, src_vocab, tgt_vocab, D, H, F, Nl)

    fwd = jax.jit(functools.partial(forward, D=D, H=H, n_vocab=tgt_vocab))
    out = jax.block_until_ready(fwd(params, src, tgt, src_mask, tgt_mask))

    assert out.shape == (B, Lt, tgt_vocab), out.shape
    assert bool(jnp.all(jnp.isfinite(out)))
    # rows of log_softmax must normalize to ~1 in prob space
    assert bool(jnp.allclose(jnp.exp(out).sum(-1), 1.0, atol=1e-4))
    print("KERNEL_OK")
</pallas_src>

<mosaic_0001>
module attributes {stable_mosaic.version = 11 : i64} {
  func.func @_enc_stack_kernel(%arg0: i32, %arg1: memref<2x8x32xf32, #tpu.memory_space<vmem>>, %arg2: memref<2x1x8xi32, #tpu.memory_space<vmem>>, %arg3: memref<1x1x32xf32, #tpu.memory_space<vmem>>, %arg4: memref<1x1x32xf32, #tpu.memory_space<vmem>>, %arg5: memref<1x32x96xbf16, #tpu.memory_space<vmem>>, %arg6: memref<1x1x96xf32, #tpu.memory_space<vmem>>, %arg7: memref<1x32x32xbf16, #tpu.memory_space<vmem>>, %arg8: memref<1x1x32xf32, #tpu.memory_space<vmem>>, %arg9: memref<1x1x32xf32, #tpu.memory_space<vmem>>, %arg10: memref<1x1x32xf32, #tpu.memory_space<vmem>>, %arg11: memref<1x32x64xbf16, #tpu.memory_space<vmem>>, %arg12: memref<1x1x64xf32, #tpu.memory_space<vmem>>, %arg13: memref<1x64x32xbf16, #tpu.memory_space<vmem>>, %arg14: memref<1x1x32xf32, #tpu.memory_space<vmem>>, %arg15: memref<1x32xf32, #tpu.memory_space<vmem>>, %arg16: memref<1x32xf32, #tpu.memory_space<vmem>>, %arg17: memref<2x8x32xf32, #tpu.memory_space<vmem>>) attributes {dimension_semantics = [#tpu.dimension_semantics<arbitrary>], iteration_bounds = array<i64: 2>, scalar_prefetch = 0 : i64, scratch_operands = 0 : i64, tpu.core_type = #tpu.core_type<tc>, window_params = [{pipeline_mode = #tpu.pipeline_mode<synchronous>, transform_indices = @transform_0, window_bounds = array<i64: 2, 8, 32>}, {pipeline_mode = #tpu.pipeline_mode<synchronous>, transform_indices = @transform_1, window_bounds = array<i64: 2, 1, 8>}, {transform_indices = @transform_2, window_bounds = array<i64: 1, 1, 32>}, {transform_indices = @transform_3, window_bounds = array<i64: 1, 1, 32>}, {transform_indices = @transform_4, window_bounds = array<i64: 1, 32, 96>}, {transform_indices = @transform_5, window_bounds = array<i64: 1, 1, 96>}, {transform_indices = @transform_6, window_bounds = array<i64: 1, 32, 32>}, {transform_indices = @transform_7, window_bounds = array<i64: 1, 1, 32>}, {transform_indices = @transform_8, window_bounds = array<i64: 1, 1, 32>}, {transform_indices = @transform_9, window_bounds = array<i64: 1, 1, 32>}, {transform_indices = @transform_10, window_bounds = array<i64: 1, 32, 64>}, {transform_indices = @transform_11, window_bounds = array<i64: 1, 1, 64>}, {transform_indices = @transform_12, window_bounds = array<i64: 1, 64, 32>}, {transform_indices = @transform_13, window_bounds = array<i64: 1, 1, 32>}, {pipeline_mode = #tpu.pipeline_mode<synchronous>, transform_indices = @transform_14, window_bounds = array<i64: 1, 32>}, {pipeline_mode = #tpu.pipeline_mode<synchronous>, transform_indices = @transform_15, window_bounds = array<i64: 1, 32>}, {pipeline_mode = #tpu.pipeline_mode<synchronous>, transform_indices = @transform_16, window_bounds = array<i64: 2, 8, 32>}]} {
    %c0_i32 = arith.constant 0 : i32
    %0 = arith.cmpi eq, %arg0, %c0_i32 : i32
    %1 = arith.extui %0 : i1 to i32
    %c0_i32_0 = arith.constant 0 : i32
    %2 = arith.cmpi ne, %1, %c0_i32_0 : i32
    scf.if %2 {
      %c0_79 = arith.constant 0 : index
      %c0_80 = arith.constant 0 : index
      %c0_81 = arith.constant 0 : index
      %193 = vector.load %arg1[%c0_79, %c0_80, %c0_81] : memref<2x8x32xf32, #tpu.memory_space<vmem>>, vector<2x8x32xf32>
      %c0_82 = arith.constant 0 : index
      %c0_83 = arith.constant 0 : index
      %c0_84 = arith.constant 0 : index
      %194 = vector.load %arg17[%c0_82, %c0_83, %c0_84] : memref<2x8x32xf32, #tpu.memory_space<vmem>>, vector<2x8x32xf32>
      tpu.vector_store %arg17[%c0_82, %c0_83, %c0_84], %193 {strides = array<i32>} : memref<2x8x32xf32, #tpu.memory_space<vmem>>, vector<2x8x32xf32>,
    } else {
    }
    %c0 = arith.constant 0 : index
    %c0_1 = arith.constant 0 : index
    %c0_2 = arith.constant 0 : index
    %3 = vector.load %arg17[%c0, %c0_1, %c0_2] : memref<2x8x32xf32, #tpu.memory_space<vmem>>, vector<2x8x32xf32>
    %4 = vector.shape_cast %3 : vector<2x8x32xf32> to vector<16x32xf32>
    %c0_3 = arith.constant 0 : index
    %c0_4 = arith.constant 0 : index
    %c0_5 = arith.constant 0 : index
    %5 = vector.load %arg2[%c0_3, %c0_4, %c0_5] : memref<2x1x8xi32, #tpu.memory_space<vmem>>, vector<2x1x8xi32>
    %c0_i32_6 = arith.constant 0 : i32
    %6 = vector.broadcast %c0_i32_6 : i32 to vector<2x1x8xi32>
    %7 = arith.cmpi eq, %5, %6 : vector<2x1x8xi32>
    %cst = arith.constant -1.000000e+09 : f32
    %cst_7 = arith.constant 0.000000e+00 : f32
    %8 = vector.broadcast %cst : f32 to vector<2x1x8xf32>
    %9 = vector.broadcast %cst_7 : f32 to vector<2x1x8xf32>
    %10 = arith.select %7, %8, %9 : vector<2x1x8xi1>, vector<2x1x8xf32>
    %c0_8 = arith.constant 0 : index
    %c0_9 = arith.constant 0 : index
    %c0_10 = arith.constant 0 : index
    %11 = vector.load %arg3[%c0_8, %c0_9, %c0_10] : memref<1x1x32xf32, #tpu.memory_space<vmem>>, vector<1x1x32xf32>
    %12 = vector.shape_cast %11 : vector<1x1x32xf32> to vector<1x32xf32>
    %c0_11 = arith.constant 0 : index
    %c0_12 = arith.constant 0 : index
    %c0_13 = arith.constant 0 : index
    %13 = vector.load %arg4[%c0_11, %c0_12, %c0_13] : memref<1x1x32xf32, #tpu.memory_space<vmem>>, vector<1x1x32xf32>
    %14 = vector.shape_cast %13 : vector<1x1x32xf32> to vector<1x32xf32>
    %cst_14 = arith.constant dense<0.000000e+00> : vector<16xf32>
    %15 = vector.multi_reduction <add>, %4, %cst_14 [1] : vector<16x32xf32> to vector<16xf32>
    %16 = vector.shape_cast %15 : vector<16xf32> to vector<16x1xf32>
    %cst_15 = arith.constant 3.200000e+01 : f32
    %17 = vector.broadcast %cst_15 : f32 to vector<16x1xf32>
    %18 = arith.divf %16, %17 : vector<16x1xf32>
    %19 = vector.broadcast %18 : vector<16x1xf32> to vector<16x32xf32>
    %20 = arith.subf %4, %19 : vector<16x32xf32>
    %21 = arith.mulf %20, %20 : vector<16x32xf32>
    %cst_16 = arith.constant dense<0.000000e+00> : vector<16xf32>
    %22 = vector.multi_reduction <add>, %21, %cst_16 [1] : vector<16x32xf32> to vector<16xf32>
    %23 = vector.shape_cast %22 : vector<16xf32> to vector<16x1xf32>
    %cst_17 = arith.constant 0.0322580636 : f32
    %24 = vector.broadcast %cst_17 : f32 to vector<16x1xf32>
    %25 = arith.mulf %23, %24 : vector<16x1xf32>
    %26 = vector.broadcast %12 : vector<1x32xf32> to vector<16x32xf32>
    %27 = arith.mulf %26, %20 : vector<16x32xf32>
    %28 = math.sqrt %25 : vector<16x1xf32>
    %cst_18 = arith.constant 9.99999997E-7 : f32
    %29 = vector.broadcast %cst_18 : f32 to vector<16x1xf32>
    %30 = arith.addf %28, %29 : vector<16x1xf32>
    %31 = vector.broadcast %30 : vector<16x1xf32> to vector<16x32xf32>
    %32 = arith.divf %27, %31 : vector<16x32xf32>
    %33 = vector.broadcast %14 : vector<1x32xf32> to vector<16x32xf32>
    %34 = arith.addf %32, %33 : vector<16x32xf32>
    %35 = arith.truncf %34 : vector<16x32xf32> to vector<16x32xbf16>
    %c0_19 = arith.constant 0 : index
    %c0_20 = arith.constant 0 : index
    %c0_21 = arith.constant 0 : index
    %36 = vector.load %arg5[%c0_19, %c0_20, %c0_21] : memref<1x32x96xbf16, #tpu.memory_space<vmem>>, vector<1x32x96xbf16>
    %37 = vector.shape_cast %36 : vector<1x32x96xbf16> to vector<32x96xbf16>
    %cst_22 = arith.constant dense<0.000000e+00> : vector<16x96xf32>
    %38 = tpu.matmul %35, %37, %cst_22 {dimension_numbers = #tpu.dot_dimension_numbers<[1], [0], [0], [1], [0, 0, 1, 1], [], []>} : vector<16x32xbf16>, vector<32x96xbf16>, vector<16x96xf32> -> vector<16x96xf32>
    %c0_23 = arith.constant 0 : index
    %c0_24 = arith.constant 0 : index
    %c0_25 = arith.constant 0 : index
    %39 = vector.load %arg6[%c0_23, %c0_24, %c0_25] : memref<1x1x96xf32, #tpu.memory_space<vmem>>, vector<1x1x96xf32>
    %40 = vector.shape_cast %39 : vector<1x1x96xf32> to vector<1x96xf32>
    %41 = vector.broadcast %40 : vector<1x96xf32> to vector<16x96xf32>
    %42 = arith.addf %38, %41 : vector<16x96xf32>
    %43 = vector.extract_strided_slice %42 {offsets = [0, 0], sizes = [16, 32], strides = [1, 1]} : vector<16x96xf32> to vector<16x32xf32>
    %44 = vector.extract_strided_slice %42 {offsets = [0, 32], sizes = [16, 32], strides = [1, 1]} : vector<16x96xf32> to vector<16x32xf32>
    %45 = vector.extract_strided_slice %42 {offsets = [0, 64], sizes = [16, 32], strides = [1, 1]} : vector<16x96xf32> to vector<16x32xf32>
    %cst_26 = arith.constant 0.353553385 : f32
    %46 = vector.broadcast %cst_26 : f32 to vector<16x32xf32>
    %47 = arith.mulf %43, %46 : vector<16x32xf32>
    %48 = vector.shape_cast %47 : vector<16x32xf32> to vector<2x8x32xf32>
    %49 = vector.shape_cast %44 : vector<16x32xf32> to vector<2x8x32xf32>
    %50 = vector.shape_cast %45 : vector<16x32xf32> to vector<2x8x32xf32>
    %51 = vector.shape_cast %10 : vector<2x1x8xf32> to vector<2x1x8xf32>
    %52 = vector.broadcast %51 : vector<2x1x8xf32> to vector<2x8x8xf32>
    %53 = vector.extract_strided_slice %48 {offsets = [0, 0, 0], sizes = [2, 8, 8], strides = [1, 1, 1]} : vector<2x8x32xf32> to vector<2x8x8xf32>
    %54 = arith.truncf %53 : vector<2x8x8xf32> to vector<2x8x8xbf16>
    %55 = vector.extract_strided_slice %49 {offsets = [0, 0, 0], sizes = [2, 8, 8], strides = [1, 1, 1]} : vector<2x8x32xf32> to vector<2x8x8xf32>
    %56 = arith.truncf %55 : vector<2x8x8xf32> to vector<2x8x8xbf16>
    %57 = vector.extract_strided_slice %50 {offsets = [0, 0, 0], sizes = [2, 8, 8], strides = [1, 1, 1]} : vector<2x8x32xf32> to vector<2x8x8xf32>
    %58 = arith.truncf %57 : vector<2x8x8xf32> to vector<2x8x8xbf16>
    "tpu.trace_start"() <{level = 10 : i32, message = "bqd,bkd->bqk"}> : () -> ()
    %cst_27 = arith.constant dense<0.000000e+00> : vector<2x8x8xf32>
    %59 = tpu.matmul %54, %56, %cst_27 {dimension_numbers = #tpu.dot_dimension_numbers<[2], [2], [1], [1], [0, 0, 0, 1, 1, 1], [0], [0]>} : vector<2x8x8xbf16>, vector<2x8x8xbf16>, vector<2x8x8xf32> -> vector<2x8x8xf32>
    "tpu.trace_stop"() : () -> ()
    %60 = arith.addf %59, %52 : vector<2x8x8xf32>
    %cst_28 = arith.constant dense<0xFF800000> : vector<2x8xf32>
    %61 = vector.multi_reduction <maximumf>, %60, %cst_28 [2] : vector<2x8x8xf32> to vector<2x8xf32>
    %62 = vector.shape_cast %61 : vector<2x8xf32> to vector<2x8x1xf32>
    %63 = vector.broadcast %62 : vector<2x8x1xf32> to vector<2x8x8xf32>
    %64 = arith.subf %60, %63 : vector<2x8x8xf32>
    %65 = math.exp %64 : vector<2x8x8xf32>
    %cst_29 = arith.constant dense<0.000000e+00> : vector<2x8xf32>
    %66 = vector.multi_reduction <add>, %65, %cst_29 [2] : vector<2x8x8xf32> to vector<2x8xf32>
    %67 = vector.shape_cast %66 : vector<2x8xf32> to vector<2x8x1xf32>
    %68 = tpu.reciprocal %67 {approx = true} : vector<2x8x1xf32> -> vector<2x8x1xf32>
    %69 = vector.broadcast %68 : vector<2x8x1xf32> to vector<2x8x8xf32>
    %70 = arith.mulf %65, %69 : vector<2x8x8xf32>
    %71 = arith.truncf %70 : vector<2x8x8xf32> to vector<2x8x8xbf16>
    "tpu.trace_start"() <{level = 10 : i32, message = "bqk,bkd->bqd"}> : () -> ()
    %cst_30 = arith.constant dense<0.000000e+00> : vector<2x8x8xf32>
    %72 = tpu.matmul %71, %58, %cst_30 {dimension_numbers = #tpu.dot_dimension_numbers<[2], [1], [1], [2], [0, 0, 0, 1, 1, 2], [0], [0]>} : vector<2x8x8xbf16>, vector<2x8x8xbf16>, vector<2x8x8xf32> -> vector<2x8x8xf32>
    "tpu.trace_stop"() : () -> ()
    %73 = vector.extract_strided_slice %48 {offsets = [0, 0, 8], sizes = [2, 8, 8], strides = [1, 1, 1]} : vector<2x8x32xf32> to vector<2x8x8xf32>
    %74 = arith.truncf %73 : vector<2x8x8xf32> to vector<2x8x8xbf16>
    %75 = vector.extract_strided_slice %49 {offsets = [0, 0, 8], sizes = [2, 8, 8], strides = [1, 1, 1]} : vector<2x8x32xf32> to vector<2x8x8xf32>
    %76 = arith.truncf %75 : vector<2x8x8xf32> to vector<2x8x8xbf16>
    %77 = vector.extract_strided_slice %50 {offsets = [0, 0, 8], sizes = [2, 8, 8], strides = [1, 1, 1]} : vector<2x8x32xf32> to vector<2x8x8xf32>
    %78 = arith.truncf %77 : vector<2x8x8xf32> to vector<2x8x8xbf16>
    "tpu.trace_start"() <{level = 10 : i32, message = "bqd,bkd->bqk"}> : () -> ()
    %cst_31 = arith.constant dense<0.000000e+00> : vector<2x8x8xf32>
    %79 = tpu.matmul %74, %76, %cst_31 {dimension_numbers = #tpu.dot_dimension_numbers<[2], [2], [1], [1], [0, 0, 0, 1, 1, 1], [0], [0]>} : vector<2x8x8xbf16>, vector<2x8x8xbf16>, vector<2x8x8xf32> -> vector<2x8x8xf32>
    "tpu.trace_stop"() : () -> ()
    %80 = arith.addf %79, %52 : vector<2x8x8xf32>
    %cst_32 = arith.constant dense<0xFF800000> : vector<2x8xf32>
    %81 = vector.multi_reduction <maximumf>, %80, %cst_32 [2] : vector<2x8x8xf32> to vector<2x8xf32>
    %82 = vector.shape_cast %81 : vector<2x8xf32> to vector<2x8x1xf32>
    %83 = vector.broadcast %82 : vector<2x8x1xf32> to vector<2x8x8xf32>
    %84 = arith.subf %80, %83 : vector<2x8x8xf32>
    %85 = math.exp %84 : vector<2x8x8xf32>
    %cst_33 = arith.constant dense<0.000000e+00> : vector<2x8xf32>
    %86 = vector.multi_reduction <add>, %85, %cst_33 [2] : vector<2x8x8xf32> to vector<2x8xf32>
    %87 = vector.shape_cast %86 : vector<2x8xf32> to vector<2x8x1xf32>
    %88 = tpu.reciprocal %87 {approx = true} : vector<2x8x1xf32> -> vector<2x8x1xf32>
    %89 = vector.broadcast %88 : vector<2x8x1xf32> to vector<2x8x8xf32>
    %90 = arith.mulf %85, %89 : vector<2x8x8xf32>
    %91 = arith.truncf %90 : vector<2x8x8xf32> to vector<2x8x8xbf16>
    "tpu.trace_start"() <{level = 10 : i32, message = "bqk,bkd->bqd"}> : () -> ()
    %cst_34 = arith.constant dense<0.000000e+00> : vector<2x8x8xf32>
    %92 = tpu.matmul %91, %78, %cst_34 {dimension_numbers = #tpu.dot_dimension_numbers<[2], [1], [1], [2], [0, 0, 0, 1, 1, 2], [0], [0]>} : vector<2x8x8xbf16>, vector<2x8x8xbf16>, vector<2x8x8xf32> -> vector<2x8x8xf32>
    "tpu.trace_stop"() : () -> ()
    %93 = vector.extract_strided_slice %48 {offsets = [0, 0, 16], sizes = [2, 8, 8], strides = [1, 1, 1]} : vector<2x8x32xf32> to vector<2x8x8xf32>
    %94 = arith.truncf %93 : vector<2x8x8xf32> to vector<2x8x8xbf16>
    %95 = vector.extract_strided_slice %49 {offsets = [0, 0, 16], sizes = [2, 8, 8], strides = [1, 1, 1]} : vector<2x8x32xf32> to vector<2x8x8xf32>
    %96 = arith.truncf %95 : vector<2x8x8xf32> to vector<2x8x8xbf16>
    %97 = vector.extract_strided_slice %50 {offsets = [0, 0, 16], sizes = [2, 8, 8], strides = [1, 1, 1]} : vector<2x8x32xf32> to vector<2x8x8xf32>
    %98 = arith.truncf %97 : vector<2x8x8xf32> to vector<2x8x8xbf16>
    "tpu.trace_start"() <{level = 10 : i32, message = "bqd,bkd->bqk"}> : () -> ()
    %cst_35 = arith.constant dense<0.000000e+00> : vector<2x8x8xf32>
    %99 = tpu.matmul %94, %96, %cst_35 {dimension_numbers = #tpu.dot_dimension_numbers<[2], [2], [1], [1], [0, 0, 0, 1, 1, 1], [0], [0]>} : vector<2x8x8xbf16>, vector<2x8x8xbf16>, vector<2x8x8xf32> -> vector<2x8x8xf32>
    "tpu.trace_stop"() : () -> ()
    %100 = arith.addf %99, %52 : vector<2x8x8xf32>
    %cst_36 = arith.constant dense<0xFF800000> : vector<2x8xf32>
    %101 = vector.multi_reduction <maximumf>, %100, %cst_36 [2] : vector<2x8x8xf32> to vector<2x8xf32>
    %102 = vector.shape_cast %101 : vector<2x8xf32> to vector<2x8x1xf32>
    %103 = vector.broadcast %102 : vector<2x8x1xf32> to vector<2x8x8xf32>
    %104 = arith.subf %100, %103 : vector<2x8x8xf32>
    %105 = math.exp %104 : vector<2x8x8xf32>
    %cst_37 = arith.constant dense<0.000000e+00> : vector<2x8xf32>
    %106 = vector.multi_reduction <add>, %105, %cst_37 [2] : vector<2x8x8xf32> to vector<2x8xf32>
    %107 = vector.shape_cast %106 : vector<2x8xf32> to vector<2x8x1xf32>
    %108 = tpu.reciprocal %107 {approx = true} : vector<2x8x1xf32> -> vector<2x8x1xf32>
    %109 = vector.broadcast %108 : vector<2x8x1xf32> to vector<2x8x8xf32>
    %110 = arith.mulf %105, %109 : vector<2x8x8xf32>
    %111 = arith.truncf %110 : vector<2x8x8xf32> to vector<2x8x8xbf16>
    "tpu.trace_start"() <{level = 10 : i32, message = "bqk,bkd->bqd"}> : () -> ()
    %cst_38 = arith.constant dense<0.000000e+00> : vector<2x8x8xf32>
    %112 = tpu.matmul %111, %98, %cst_38 {dimension_numbers = #tpu.dot_dimension_numbers<[2], [1], [1], [2], [0, 0, 0, 1, 1, 2], [0], [0]>} : vector<2x8x8xbf16>, vector<2x8x8xbf16>, vector<2x8x8xf32> -> vector<2x8x8xf32>
    "tpu.trace_stop"() : () -> ()
    %113 = vector.extract_strided_slice %48 {offsets = [0, 0, 24], sizes = [2, 8, 8], strides = [1, 1, 1]} : vector<2x8x32xf32> to vector<2x8x8xf32>
    %114 = arith.truncf %113 : vector<2x8x8xf32> to vector<2x8x8xbf16>
    %115 = vector.extract_strided_slice %49 {offsets = [0, 0, 24], sizes = [2, 8, 8], strides = [1, 1, 1]} : vector<2x8x32xf32> to vector<2x8x8xf32>
    %116 = arith.truncf %115 : vector<2x8x8xf32> to vector<2x8x8xbf16>
    %117 = vector.extract_strided_slice %50 {offsets = [0, 0, 24], sizes = [2, 8, 8], strides = [1, 1, 1]} : vector<2x8x32xf32> to vector<2x8x8xf32>
    %118 = arith.truncf %117 : vector<2x8x8xf32> to vector<2x8x8xbf16>
    "tpu.trace_start"() <{level = 10 : i32, message = "bqd,bkd->bqk"}> : () -> ()
    %cst_39 = arith.constant dense<0.000000e+00> : vector<2x8x8xf32>
    %119 = tpu.matmul %114, %116, %cst_39 {dimension_numbers = #tpu.dot_dimension_numbers<[2], [2], [1], [1], [0, 0, 0, 1, 1, 1], [0], [0]>} : vector<2x8x8xbf16>, vector<2x8x8xbf16>, vector<2x8x8xf32> -> vector<2x8x8xf32>
    "tpu.trace_stop"() : () -> ()
    %120 = arith.addf %119, %52 : vector<2x8x8xf32>
    %cst_40 = arith.constant dense<0xFF800000> : vector<2x8xf32>
    %121 = vector.multi_reduction <maximumf>, %120, %cst_40 [2] : vector<2x8x8xf32> to vector<2x8xf32>
    %122 = vector.shape_cast %121 : vector<2x8xf32> to vector<2x8x1xf32>
    %123 = vector.broadcast %122 : vector<2x8x1xf32> to vector<2x8x8xf32>
    %124 = arith.subf %120, %123 : vector<2x8x8xf32>
    %125 = math.exp %124 : vector<2x8x8xf32>
    %cst_41 = arith.constant dense<0.000000e+00> : vector<2x8xf32>
    %126 = vector.multi_reduction <add>, %125, %cst_41 [2] : vector<2x8x8xf32> to vector<2x8xf32>
    %127 = vector.shape_cast %126 : vector<2x8xf32> to vector<2x8x1xf32>
    %128 = tpu.reciprocal %127 {approx = true} : vector<2x8x1xf32> -> vector<2x8x1xf32>
    %129 = vector.broadcast %128 : vector<2x8x1xf32> to vector<2x8x8xf32>
    %130 = arith.mulf %125, %129 : vector<2x8x8xf32>
    %131 = arith.truncf %130 : vector<2x8x8xf32> to vector<2x8x8xbf16>
    "tpu.trace_start"() <{level = 10 : i32, message = "bqk,bkd->bqd"}> : () -> ()
    %cst_42 = arith.constant dense<0.000000e+00> : vector<2x8x8xf32>
    %132 = tpu.matmul %131, %118, %cst_42 {dimension_numbers = #tpu.dot_dimension_numbers<[2], [1], [1], [2], [0, 0, 0, 1, 1, 2], [0], [0]>} : vector<2x8x8xbf16>, vector<2x8x8xbf16>, vector<2x8x8xf32> -> vector<2x8x8xf32>
    "tpu.trace_stop"() : () -> ()
    %133 = tpu.concatenate %72, %92, %112, %132 in 2 : vector<2x8x8xf32>, vector<2x8x8xf32>, vector<2x8x8xf32>, vector<2x8x8xf32> -> vector<2x8x32xf32>
    %134 = vector.shape_cast %133 : vector<2x8x32xf32> to vector<16x32xf32>
    %135 = arith.truncf %134 : vector<16x32xf32> to vector<16x32xbf16>
    %c0_43 = arith.constant 0 : index
    %c0_44 = arith.constant 0 : index
    %c0_45 = arith.constant 0 : index
    %136 = vector.load %arg7[%c0_43, %c0_44, %c0_45] : memref<1x32x32xbf16, #tpu.memory_space<vmem>>, vector<1x32x32xbf16>
    %137 = vector.shape_cast %136 : vector<1x32x32xbf16> to vector<32x32xbf16>
    %cst_46 = arith.constant dense<0.000000e+00> : vector<16x32xf32>
    %138 = tpu.matmul %135, %137, %cst_46 {dimension_numbers = #tpu.dot_dimension_numbers<[1], [0], [0], [1], [0, 0, 1, 1], [], []>} : vector<16x32xbf16>, vector<32x32xbf16>, vector<16x32xf32> -> vector<16x32xf32>
    %139 = arith.addf %4, %138 : vector<16x32xf32>
    %c0_47 = arith.constant 0 : index
    %c0_48 = arith.constant 0 : index
    %c0_49 = arith.constant 0 : index
    %140 = vector.load %arg8[%c0_47, %c0_48, %c0_49] : memref<1x1x32xf32, #tpu.memory_space<vmem>>, vector<1x1x32xf32>
    %141 = vector.shape_cast %140 : vector<1x1x32xf32> to vector<1x32xf32>
    %142 = vector.broadcast %141 : vector<1x32xf32> to vector<16x32xf32>
    %143 = arith.addf %139, %142 : vector<16x32xf32>
    %c0_50 = arith.constant 0 : index
    %c0_51 = arith.constant 0 : index
    %c0_52 = arith.constant 0 : index
    %144 = vector.load %arg9[%c0_50, %c0_51, %c0_52] : memref<1x1x32xf32, #tpu.memory_space<vmem>>, vector<1x1x32xf32>
    %145 = vector.shape_cast %144 : vector<1x1x32xf32> to vector<1x32xf32>
    %c0_53 = arith.constant 0 : index
    %c0_54 = arith.constant 0 : index
    %c0_55 = arith.constant 0 : index
    %146 = vector.load %arg10[%c0_53, %c0_54, %c0_55] : memref<1x1x32xf32, #tpu.memory_space<vmem>>, vector<1x1x32xf32>
    %147 = vector.shape_cast %146 : vector<1x1x32xf32> to vector<1x32xf32>
    %cst_56 = arith.constant dense<0.000000e+00> : vector<16xf32>
    %148 = vector.multi_reduction <add>, %143, %cst_56 [1] : vector<16x32xf32> to vector<16xf32>
    %149 = vector.shape_cast %148 : vector<16xf32> to vector<16x1xf32>
    %cst_57 = arith.constant 3.200000e+01 : f32
    %150 = vector.broadcast %cst_57 : f32 to vector<16x1xf32>
    %151 = arith.divf %149, %150 : vector<16x1xf32>
    %152 = vector.broadcast %151 : vector<16x1xf32> to vector<16x32xf32>
    %153 = arith.subf %143, %152 : vector<16x32xf32>
    %154 = arith.mulf %153, %153 : vector<16x32xf32>
    %cst_58 = arith.constant dense<0.000000e+00> : vector<16xf32>
    %155 = vector.multi_reduction <add>, %154, %cst_58 [1] : vector<16x32xf32> to vector<16xf32>
    %156 = vector.shape_cast %155 : vector<16xf32> to vector<16x1xf32>
    %cst_59 = arith.constant 0.0322580636 : f32
    %157 = vector.broadcast %cst_59 : f32 to vector<16x1xf32>
    %158 = arith.mulf %156, %157 : vector<16x1xf32>
    %159 = vector.broadcast %145 : vector<1x32xf32> to vector<16x32xf32>
    %160 = arith.mulf %159, %153 : vector<16x32xf32>
    %161 = math.sqrt %158 : vector<16x1xf32>
    %cst_60 = arith.constant 9.99999997E-7 : f32
    %162 = vector.broadcast %cst_60 : f32 to vector<16x1xf32>
    %163 = arith.addf %161, %162 : vector<16x1xf32>
    %164 = vector.broadcast %163 : vector<16x1xf32> to vector<16x32xf32>
    %165 = arith.divf %160, %164 : vector<16x32xf32>
    %166 = vector.broadcast %147 : vector<1x32xf32> to vector<16x32xf32>
    %167 = arith.addf %165, %166 : vector<16x32xf32>
    %168 = arith.truncf %167 : vector<16x32xf32> to vector<16x32xbf16>
    %c0_61 = arith.constant 0 : index
    %c0_62 = arith.constant 0 : index
    %c0_63 = arith.constant 0 : index
    %169 = vector.load %arg11[%c0_61, %c0_62, %c0_63] : memref<1x32x64xbf16, #tpu.memory_space<vmem>>, vector<1x32x64xbf16>
    %170 = vector.shape_cast %169 : vector<1x32x64xbf16> to vector<32x64xbf16>
    %cst_64 = arith.constant dense<0.000000e+00> : vector<16x64xf32>
    %171 = tpu.matmul %168, %170, %cst_64 {dimension_numbers = #tpu.dot_dimension_numbers<[1], [0], [0], [1], [0, 0, 1, 1], [], []>} : vector<16x32xbf16>, vector<32x64xbf16>, vector<16x64xf32> -> vector<16x64xf32>
    %c0_65 = arith.constant 0 : index
    %c0_66 = arith.constant 0 : index
    %c0_67 = arith.constant 0 : index
    %172 = vector.load %arg12[%c0_65, %c0_66, %c0_67] : memref<1x1x64xf32, #tpu.memory_space<vmem>>, vector<1x1x64xf32>
    %173 = vector.shape_cast %172 : vector<1x1x64xf32> to vector<1x64xf32>
    %174 = vector.broadcast %173 : vector<1x64xf32> to vector<16x64xf32>
    %175 = arith.addf %171, %174 : vector<16x64xf32>
    %cst_68 = arith.constant 0.000000e+00 : f32
    %176 = vector.broadcast %cst_68 : f32 to vector<16x64xf32>
    %177 = arith.maximumf %175, %176 : vector<16x64xf32>
    %178 = arith.truncf %177 : vector<16x64xf32> to vector<16x64xbf16>
    %c0_69 = arith.constant 0 : index
    %c0_70 = arith.constant 0 : index
    %c0_71 = arith.constant 0 : index
    %179 = vector.load %arg13[%c0_69, %c0_70, %c0_71] : memref<1x64x32xbf16, #tpu.memory_space<vmem>>, vector<1x64x32xbf16>
    %180 = vector.shape_cast %179 : vector<1x64x32xbf16> to vector<64x32xbf16>
    %cst_72 = arith.constant dense<0.000000e+00> : vector<16x32xf32>
    %181 = tpu.matmul %178, %180, %cst_72 {dimension_numbers = #tpu.dot_dimension_numbers<[1], [0], [0], [1], [0, 0, 1, 1], [], []>} : vector<16x64xbf16>, vector<64x32xbf16>, vector<16x32xf32> -> vector<16x32xf32>
    %182 = arith.addf %143, %181 : vector<16x32xf32>
    %c0_73 = arith.constant 0 : index
    %c0_74 = arith.constant 0 : index
    %c0_75 = arith.constant 0 : index
    %183 = vector.load %arg14[%c0_73, %c0_74, %c0_75] : memref<1x1x32xf32, #tpu.memory_space<vmem>>, vector<1x1x32xf32>
    %184 = vector.shape_cast %183 : vector<1x1x32xf32> to vector<1x32xf32>
    %185 = vector.broadcast %184 : vector<1x32xf32> to vector<16x32xf32>
    %186 = arith.addf %182, %185 : vector<16x32xf32>
    %c1_i32 = arith.constant 1 : i32
    %187 = arith.cmpi slt, %arg0, %c1_i32 : i32
    %188 = arith.extui %187 : i1 to i32
    %c0_i32_76 = arith.constant 0 : i32
    %189 = arith.cmpi ne, %188, %c0_i32_76 : i32
    scf.if %189 {
      %193 = vector.shape_cast %186 : vector<16x32xf32> to vector<2x8x32xf32>
      %c0_79 = arith.constant 0 : index
      %c0_80 = arith.constant 0 : index
      %c0_81 = arith.constant 0 : index
      %194 = vector.load %arg17[%c0_79, %c0_80, %c0_81] : memref<2x8x32xf32, #tpu.memory_space<vmem>>, vector<2x8x32xf32>
      tpu.vector_store %arg17[%c0_79, %c0_80, %c0_81], %193 {strides = array<i32>} : memref<2x8x32xf32, #tpu.memory_space<vmem>>, vector<2x8x32xf32>,
    } else {
    }
    %c1_i32_77 = arith.constant 1 : i32
    %190 = arith.cmpi eq, %arg0, %c1_i32_77 : i32
    %191 = arith.extui %190 : i1 to i32
    %c0_i32_78 = arith.constant 0 : i32
    %192 = arith.cmpi ne, %191, %c0_i32_78 : i32
    scf.if %192 {
      %c0_79 = arith.constant 0 : index
      %c0_80 = arith.constant 0 : index
      %193 = vector.load %arg15[%c0_79, %c0_80] : memref<1x32xf32, #tpu.memory_space<vmem>>, vector<1x32xf32>
      %c0_81 = arith.constant 0 : index
      %c0_82 = arith.constant 0 : index
      %194 = vector.load %arg16[%c0_81, %c0_82] : memref<1x32xf32, #tpu.memory_space<vmem>>, vector<1x32xf32>
      %cst_83 = arith.constant dense<0.000000e+00> : vector<16xf32>
      %195 = vector.multi_reduction <add>, %186, %cst_83 [1] : vector<16x32xf32> to vector<16xf32>
      %196 = vector.shape_cast %195 : vector<16xf32> to vector<16x1xf32>
      %cst_84 = arith.constant 3.200000e+01 : f32
      %197 = vector.broadcast %cst_84 : f32 to vector<16x1xf32>
      %198 = arith.divf %196, %197 : vector<16x1xf32>
      %199 = vector.broadcast %198 : vector<16x1xf32> to vector<16x32xf32>
      %200 = arith.subf %186, %199 : vector<16x32xf32>
      %201 = arith.mulf %200, %200 : vector<16x32xf32>
      %cst_85 = arith.constant dense<0.000000e+00> : vector<16xf32>
      %202 = vector.multi_reduction <add>, %201, %cst_85 [1] : vector<16x32xf32> to vector<16xf32>
      %203 = vector.shape_cast %202 : vector<16xf32> to vector<16x1xf32>
      %cst_86 = arith.constant 0.0322580636 : f32
      %204 = vector.broadcast %cst_86 : f32 to vector<16x1xf32>
      %205 = arith.mulf %203, %204 : vector<16x1xf32>
      %206 = vector.broadcast %193 : vector<1x32xf32> to vector<16x32xf32>
      %207 = arith.mulf %206, %200 : vector<16x32xf32>
      %208 = math.sqrt %205 : vector<16x1xf32>
      %cst_87 = arith.constant 9.99999997E-7 : f32
      %209 = vector.broadcast %cst_87 : f32 to vector<16x1xf32>
      %210 = arith.addf %208, %209 : vector<16x1xf32>
      %211 = vector.broadcast %210 : vector<16x1xf32> to vector<16x32xf32>
      %212 = arith.divf %207, %211 : vector<16x32xf32>
      %213 = vector.broadcast %194 : vector<1x32xf32> to vector<16x32xf32>
      %214 = arith.addf %212, %213 : vector<16x32xf32>
      %215 = vector.shape_cast %214 : vector<16x32xf32> to vector<2x8x32xf32>
      %c0_88 = arith.constant 0 : index
      %c0_89 = arith.constant 0 : index
      %c0_90 = arith.constant 0 : index
      %216 = vector.load %arg17[%c0_88, %c0_89, %c0_90] : memref<2x8x32xf32, #tpu.memory_space<vmem>>, vector<2x8x32xf32>
      tpu.vector_store %arg17[%c0_88, %c0_89, %c0_90], %215 {strides = array<i32>} : memref<2x8x32xf32, #tpu.memory_space<vmem>>, vector<2x8x32xf32>,
    } else {
    }
    return
  }
  func.func @transform_0(%arg0: i32) -> (i32, i32, i32) {
    %c0_i32 = arith.constant 0 : i32
    %c0_i32_0 = arith.constant 0 : i32
    %c0_i32_1 = arith.constant 0 : i32
    %c0_i32_2 = arith.constant 0 : i32
    return %c0_i32, %c0_i32_0, %c0_i32_1 : i32, i32, i32
  }
  func.func @transform_1(%arg0: i32) -> (i32, i32, i32) {
    %c0_i32 = arith.constant 0 : i32
    %c0_i32_0 = arith.constant 0 : i32
    %c0_i32_1 = arith.constant 0 : i32
    %c0_i32_2 = arith.constant 0 : i32
    return %c0_i32, %c0_i32_0, %c0_i32_1 : i32, i32, i32
  }
  func.func @transform_2(%arg0: i32) -> (i32, i32, i32) {
    %c0_i32 = arith.constant 0 : i32
    %c0_i32_0 = arith.constant 0 : i32
    %c0_i32_1 = arith.constant 0 : i32
    return %arg0, %c0_i32, %c0_i32_0 : i32, i32, i32
  }
  func.func @transform_3(%arg0: i32) -> (i32, i32, i32) {
    %c0_i32 = arith.constant 0 : i32
    %c0_i32_0 = arith.constant 0 : i32
    %c0_i32_1 = arith.constant 0 : i32
    return %arg0, %c0_i32, %c0_i32_0 : i32, i32, i32
  }
  func.func @transform_4(%arg0: i32) -> (i32, i32, i32) {
    %c0_i32 = arith.constant 0 : i32
    %c0_i32_0 = arith.constant 0 : i32
    %c0_i32_1 = arith.constant 0 : i32
    return %arg0, %c0_i32, %c0_i32_0 : i32, i32, i32
  }
  func.func @transform_5(%arg0: i32) -> (i32, i32, i32) {
    %c0_i32 = arith.constant 0 : i32
    %c0_i32_0 = arith.constant 0 : i32
    %c0_i32_1 = arith.constant 0 : i32
    return %arg0, %c0_i32, %c0_i32_0 : i32, i32, i32
  }
  func.func @transform_6(%arg0: i32) -> (i32, i32, i32) {
    %c0_i32 = arith.constant 0 : i32
    %c0_i32_0 = arith.constant 0 : i32
    %c0_i32_1 = arith.constant 0 : i32
    return %arg0, %c0_i32, %c0_i32_0 : i32, i32, i32
  }
  func.func @transform_7(%arg0: i32) -> (i32, i32, i32) {
    %c0_i32 = arith.constant 0 : i32
    %c0_i32_0 = arith.constant 0 : i32
    %c0_i32_1 = arith.constant 0 : i32
    return %arg0, %c0_i32, %c0_i32_0 : i32, i32, i32
  }
  func.func @transform_8(%arg0: i32) -> (i32, i32, i32) {
    %c0_i32 = arith.constant 0 : i32
    %c0_i32_0 = arith.constant 0 : i32
    %c0_i32_1 = arith.constant 0 : i32
    return %arg0, %c0_i32, %c0_i32_0 : i32, i32, i32
  }
  func.func @transform_9(%arg0: i32) -> (i32, i32, i32) {
    %c0_i32 = arith.constant 0 : i32
    %c0_i32_0 = arith.constant 0 : i32
    %c0_i32_1 = arith.constant 0 : i32
    return %arg0, %c0_i32, %c0_i32_0 : i32, i32, i32
  }
  func.func @transform_10(%arg0: i32) -> (i32, i32, i32) {
    %c0_i32 = arith.constant 0 : i32
    %c0_i32_0 = arith.constant 0 : i32
    %c0_i32_1 = arith.constant 0 : i32
    return %arg0, %c0_i32, %c0_i32_0 : i32, i32, i32
  }
  func.func @transform_11(%arg0: i32) -> (i32, i32, i32) {
    %c0_i32 = arith.constant 0 : i32
    %c0_i32_0 = arith.constant 0 : i32
    %c0_i32_1 = arith.constant 0 : i32
    return %arg0, %c0_i32, %c0_i32_0 : i32, i32, i32
  }
  func.func @transform_12(%arg0: i32) -> (i32, i32, i32) {
    %c0_i32 = arith.constant 0 : i32
    %c0_i32_0 = arith.constant 0 : i32
    %c0_i32_1 = arith.constant 0 : i32
    return %arg0, %c0_i32, %c0_i32_0 : i32, i32, i32
  }
  func.func @transform_13(%arg0: i32) -> (i32, i32, i32) {
    %c0_i32 = arith.constant 0 : i32
    %c0_i32_0 = arith.constant 0 : i32
    %c0_i32_1 = arith.constant 0 : i32
    return %arg0, %c0_i32, %c0_i32_0 : i32, i32, i32
  }
  func.func @transform_14(%arg0: i32) -> (i32, i32) {
    %c0_i32 = arith.constant 0 : i32
    %c0_i32_0 = arith.constant 0 : i32
    %c0_i32_1 = arith.constant 0 : i32
    return %c0_i32, %c0_i32_0 : i32, i32
  }
  func.func @transform_15(%arg0: i32) -> (i32, i32) {
    %c0_i32 = arith.constant 0 : i32
    %c0_i32_0 = arith.constant 0 : i32
    %c0_i32_1 = arith.constant 0 : i32
    return %c0_i32, %c0_i32_0 : i32, i32
  }
  func.func @transform_16(%arg0: i32) -> (i32, i32, i32) {
    %c0_i32 = arith.constant 0 : i32
    %c0_i32_0 = arith.constant 0 : i32
    %c0_i32_1 = arith.constant 0 : i32
    %c0_i32_2 = arith.constant 0 : i32
    return %c0_i32, %c0_i32_0, %c0_i32_1 : i32, i32, i32
  }
}

module attributes {stable_mosaic.version = 11 : i64} {
  func.func @_generator_kernel(%arg0: i32, %arg1: memref<16x32xf32, #tpu.memory_space<vmem>>, %arg2: memref<1x32xf32, #tpu.memory_space<vmem>>, %arg3: memref<1x32xf32, #tpu.memory_space<vmem>>, %arg4: memref<32x128xbf16, #tpu.memory_space<vmem>>, %arg5: memref<1x128xf32, #tpu.memory_space<vmem>>, %arg6: memref<16x128xf32, #tpu.memory_space<vmem>>) attributes {dimension_semantics = [#tpu.dimension_semantics<parallel>], iteration_bounds = array<i64: 1>, scalar_prefetch = 0 : i64, scratch_operands = 0 : i64, tpu.core_type = #tpu.core_type<tc>, window_params = [{transform_indices = @transform_0, window_bounds = array<i64: 16, 32>}, {pipeline_mode = #tpu.pipeline_mode<synchronous>, transform_indices = @transform_1, window_bounds = array<i64: 1, 32>}, {pipeline_mode = #tpu.pipeline_mode<synchronous>, transform_indices = @transform_2, window_bounds = array<i64: 1, 32>}, {pipeline_mode = #tpu.pipeline_mode<synchronous>, transform_indices = @transform_3, window_bounds = array<i64: 32, 128>}, {pipeline_mode = #tpu.pipeline_mode<synchronous>, transform_indices = @transform_4, window_bounds = array<i64: 1, 128>}, {transform_indices = @transform_5, window_bounds = array<i64: 16, 128>}]} {
    %c0 = arith.constant 0 : index
    %c0_0 = arith.constant 0 : index
    %0 = vector.load %arg1[%c0, %c0_0] : memref<16x32xf32, #tpu.memory_space<vmem>>, vector<16x32xf32>
    %c0_1 = arith.constant 0 : index
    %c0_2 = arith.constant 0 : index
    %1 = vector.load %arg2[%c0_1, %c0_2] : memref<1x32xf32, #tpu.memory_space<vmem>>, vector<1x32xf32>
    %c0_3 = arith.constant 0 : index
    %c0_4 = arith.constant 0 : index
    %2 = vector.load %arg3[%c0_3, %c0_4] : memref<1x32xf32, #tpu.memory_space<vmem>>, vector<1x32xf32>
    %cst = arith.constant dense<0.000000e+00> : vector<16xf32>
    %3 = vector.multi_reduction <add>, %0, %cst [1] : vector<16x32xf32> to vector<16xf32>
    %4 = vector.shape_cast %3 : vector<16xf32> to vector<16x1xf32>
    %cst_5 = arith.constant 3.200000e+01 : f32
    %5 = vector.broadcast %cst_5 : f32 to vector<16x1xf32>
    %6 = arith.divf %4, %5 : vector<16x1xf32>
    %7 = vector.broadcast %6 : vector<16x1xf32> to vector<16x32xf32>
    %8 = arith.subf %0, %7 : vector<16x32xf32>
    %9 = arith.mulf %8, %8 : vector<16x32xf32>
    %cst_6 = arith.constant dense<0.000000e+00> : vector<16xf32>
    %10 = vector.multi_reduction <add>, %9, %cst_6 [1] : vector<16x32xf32> to vector<16xf32>
    %11 = vector.shape_cast %10 : vector<16xf32> to vector<16x1xf32>
    %cst_7 = arith.constant 0.0322580636 : f32
    %12 = vector.broadcast %cst_7 : f32 to vector<16x1xf32>
    %13 = arith.mulf %11, %12 : vector<16x1xf32>
    %14 = vector.broadcast %1 : vector<1x32xf32> to vector<16x32xf32>
    %15 = arith.mulf %14, %8 : vector<16x32xf32>
    %16 = math.sqrt %13 : vector<16x1xf32>
    %cst_8 = arith.constant 9.99999997E-7 : f32
    %17 = vector.broadcast %cst_8 : f32 to vector<16x1xf32>
    %18 = arith.addf %16, %17 : vector<16x1xf32>
    %19 = vector.broadcast %18 : vector<16x1xf32> to vector<16x32xf32>
    %20 = arith.divf %15, %19 : vector<16x32xf32>
    %21 = vector.broadcast %2 : vector<1x32xf32> to vector<16x32xf32>
    %22 = arith.addf %20, %21 : vector<16x32xf32>
    %23 = arith.truncf %22 : vector<16x32xf32> to vector<16x32xbf16>
    %c0_9 = arith.constant 0 : index
    %c0_10 = arith.constant 0 : index
    %24 = vector.load %arg4[%c0_9, %c0_10] : memref<32x128xbf16, #tpu.memory_space<vmem>>, vector<32x128xbf16>
    %cst_11 = arith.constant dense<0.000000e+00> : vector<16x128xf32>
    %25 = tpu.matmul %23, %24, %cst_11 {dimension_numbers = #tpu.dot_dimension_numbers<[1], [0], [0], [1], [0, 0, 1, 1], [], []>} : vector<16x32xbf16>, vector<32x128xbf16>, vector<16x128xf32> -> vector<16x128xf32>
    %c0_12 = arith.constant 0 : index
    %c0_13 = arith.constant 0 : index
    %26 = vector.load %arg5[%c0_12, %c0_13] : memref<1x128xf32, #tpu.memory_space<vmem>>, vector<1x128xf32>
    %27 = vector.broadcast %26 : vector<1x128xf32> to vector<16x128xf32>
    %28 = arith.addf %25, %27 : vector<16x128xf32>
    %cst_14 = arith.constant dense<0xFF800000> : vector<16xf32>
    %29 = vector.multi_reduction <maximumf>, %28, %cst_14 [1] : vector<16x128xf32> to vector<16xf32>
    %30 = vector.shape_cast %29 : vector<16xf32> to vector<16x1xf32>
    %31 = vector.broadcast %30 : vector<16x1xf32> to vector<16x128xf32>
    %32 = arith.subf %28, %31 : vector<16x128xf32>
    %33 = math.exp %32 : vector<16x128xf32>
    %cst_15 = arith.constant dense<0.000000e+00> : vector<16xf32>
    %34 = vector.multi_reduction <add>, %33, %cst_15 [1] : vector<16x128xf32> to vector<16xf32>
    %35 = vector.shape_cast %34 : vector<16xf32> to vector<16x1xf32>
    %36 = math.log %35 : vector<16x1xf32>
    %37 = arith.addf %36, %30 : vector<16x1xf32>
    %38 = vector.broadcast %37 : vector<16x1xf32> to vector<16x128xf32>
    %39 = arith.subf %28, %38 : vector<16x128xf32>
    %c0_16 = arith.constant 0 : index
    %c0_17 = arith.constant 0 : index
    %40 = vector.load %arg6[%c0_16, %c0_17] : memref<16x128xf32, #tpu.memory_space<vmem>>, vector<16x128xf32>
    tpu.vector_store %arg6[%c0_16, %c0_17], %39 {strides = array<i32>} : memref<16x128xf32, #tpu.memory_space<vmem>>, vector<16x128xf32>,
    return
  }
  func.func @transform_0(%arg0: i32) -> (i32, i32) {
    %c0_i32 = arith.constant 0 : i32
    %c0_i32_0 = arith.constant 0 : i32
    return %arg0, %c0_i32 : i32, i32
  }
  func.func @transform_1(%arg0: i32) -> (i32, i32) {
    %c0_i32 = arith.constant 0 : i32
    %c0_i32_0 = arith.constant 0 : i32
    %c0_i32_1 = arith.constant 0 : i32
    return %c0_i32, %c0_i32_0 : i32, i32
  }
  func.func @transform_2(%arg0: i32) -> (i32, i32) {
    %c0_i32 = arith.constant 0 : i32
    %c0_i32_0 = arith.constant 0 : i32
    %c0_i32_1 = arith.constant 0 : i32
    return %c0_i32, %c0_i32_0 : i32, i32
  }
  func.func @transform_3(%arg0: i32) -> (i32, i32) {
    %c0_i32 = arith.constant 0 : i32
    %c0_i32_0 = arith.constant 0 : i32
    %c0_i32_1 = arith.constant 0 : i32
    return %c0_i32, %c0_i32_0 : i32, i32
  }
  func.func @transform_4(%arg0: i32) -> (i32, i32) {
    %c0_i32 = arith.constant 0 : i32
    %c0_i32_0 = arith.constant 0 : i32
    %c0_i32_1 = arith.constant 0 : i32
    return %c0_i32, %c0_i32_0 : i32, i32
  }
  func.func @transform_5(%arg0: i32) -> (i32, i32) {
    %c0_i32 = arith.constant 0 : i32
    %c0_i32_0 = arith.constant 0 : i32
    return %arg0, %c0_i32 : i32, i32
  }
}

module attributes {stable_mosaic.version = 11 : i64} {
  func.func @_dec_stack_kernel(%arg0: i32, %arg1: memref<2x8x32xf32, #tpu.memory_space<vmem>>, %arg2: memref<2x8x32xf32, #tpu.memory_space<vmem>>, %arg3: memref<2x1x8xi32, #tpu.memory_space<vmem>>, %arg4: memref<2x8x8xi32, #tpu.memory_space<vmem>>, %arg5: memref<1x1x32xf32, #tpu.memory_space<vmem>>, %arg6: memref<1x1x32xf32, #tpu.memory_space<vmem>>, %arg7: memref<1x32x96xbf16, #tpu.memory_space<vmem>>, %arg8: memref<1x1x96xf32, #tpu.memory_space<vmem>>, %arg9: memref<1x32x32xbf16, #tpu.memory_space<vmem>>, %arg10: memref<1x1x32xf32, #tpu.memory_space<vmem>>, %arg11: memref<1x1x32xf32, #tpu.memory_space<vmem>>, %arg12: memref<1x1x32xf32, #tpu.memory_space<vmem>>, %arg13: memref<1x32x32xbf16, #tpu.memory_space<vmem>>, %arg14: memref<1x1x32xf32, #tpu.memory_space<vmem>>, %arg15: memref<1x32x64xbf16, #tpu.memory_space<vmem>>, %arg16: memref<1x1x64xf32, #tpu.memory_space<vmem>>, %arg17: memref<1x32x32xbf16, #tpu.memory_space<vmem>>, %arg18: memref<1x1x32xf32, #tpu.memory_space<vmem>>, %arg19: memref<1x1x32xf32, #tpu.memory_space<vmem>>, %arg20: memref<1x1x32xf32, #tpu.memory_space<vmem>>, %arg21: memref<1x32x64xbf16, #tpu.memory_space<vmem>>, %arg22: memref<1x1x64xf32, #tpu.memory_space<vmem>>, %arg23: memref<1x64x32xbf16, #tpu.memory_space<vmem>>, %arg24: memref<1x1x32xf32, #tpu.memory_space<vmem>>, %arg25: memref<2x8x32xf32, #tpu.memory_space<vmem>>) attributes {dimension_semantics = [#tpu.dimension_semantics<arbitrary>], iteration_bounds = array<i64: 2>, scalar_prefetch = 0 : i64, scratch_operands = 0 : i64, tpu.core_type = #tpu.core_type<tc>, window_params = [{pipeline_mode = #tpu.pipeline_mode<synchronous>, transform_indices = @transform_0, window_bounds = array<i64: 2, 8, 32>}, {pipeline_mode = #tpu.pipeline_mode<synchronous>, transform_indices = @transform_1, window_bounds = array<i64: 2, 8, 32>}, {pipeline_mode = #tpu.pipeline_mode<synchronous>, transform_indices = @transform_2, window_bounds = array<i64: 2, 1, 8>}, {pipeline_mode = #tpu.pipeline_mode<synchronous>, transform_indices = @transform_3, window_bounds = array<i64: 2, 8, 8>}, {transform_indices = @transform_4, window_bounds = array<i64: 1, 1, 32>}, {transform_indices = @transform_5, window_bounds = array<i64: 1, 1, 32>}, {transform_indices = @transform_6, window_bounds = array<i64: 1, 32, 96>}, {transform_indices = @transform_7, window_bounds = array<i64: 1, 1, 96>}, {transform_indices = @transform_8, window_bounds = array<i64: 1, 32, 32>}, {transform_indices = @transform_9, window_bounds = array<i64: 1, 1, 32>}, {transform_indices = @transform_10, window_bounds = array<i64: 1, 1, 32>}, {transform_indices = @transform_11, window_bounds = array<i64: 1, 1, 32>}, {transform_indices = @transform_12, window_bounds = array<i64: 1, 32, 32>}, {transform_indices = @transform_13, window_bounds = array<i64: 1, 1, 32>}, {transform_indices = @transform_14, window_bounds = array<i64: 1, 32, 64>}, {transform_indices = @transform_15, window_bounds = array<i64: 1, 1, 64>}, {transform_indices = @transform_16, window_bounds = array<i64: 1, 32, 32>}, {transform_indices = @transform_17, window_bounds = array<i64: 1, 1, 32>}, {transform_indices = @transform_18, window_bounds = array<i64: 1, 1, 32>}, {transform_indices = @transform_19, window_bounds = array<i64: 1, 1, 32>}, {transform_indices = @transform_20, window_bounds = array<i64: 1, 32, 64>}, {transform_indices = @transform_21, window_bounds = array<i64: 1, 1, 64>}, {transform_indices = @transform_22, window_bounds = array<i64: 1, 64, 32>}, {transform_indices = @transform_23, window_bounds = array<i64: 1, 1, 32>}, {pipeline_mode = #tpu.pipeline_mode<synchronous>, transform_indices = @transform_24, window_bounds = array<i64: 2, 8, 32>}]} {
    %c0_i32 = arith.constant 0 : i32
    %0 = arith.cmpi eq, %arg0, %c0_i32 : i32
    %1 = arith.extui %0 : i1 to i32
    %c0_i32_0 = arith.constant 0 : i32
    %2 = arith.cmpi ne, %1, %c0_i32_0 : i32
    scf.if %2 {
      %c0_137 = arith.constant 0 : index
      %c0_138 = arith.constant 0 : index
      %c0_139 = arith.constant 0 : index
      %335 = vector.load %arg1[%c0_137, %c0_138, %c0_139] : memref<2x8x32xf32, #tpu.memory_space<vmem>>, vector<2x8x32xf32>
      %c0_140 = arith.constant 0 : index
      %c0_141 = arith.constant 0 : index
      %c0_142 = arith.constant 0 : index
      %336 = vector.load %arg25[%c0_140, %c0_141, %c0_142] : memref<2x8x32xf32, #tpu.memory_space<vmem>>, vector<2x8x32xf32>
      tpu.vector_store %arg25[%c0_140, %c0_141, %c0_142], %335 {strides = array<i32>} : memref<2x8x32xf32, #tpu.memory_space<vmem>>, vector<2x8x32xf32>,
    } else {
    }
    %c0 = arith.constant 0 : index
    %c0_1 = arith.constant 0 : index
    %c0_2 = arith.constant 0 : index
    %3 = vector.load %arg25[%c0, %c0_1, %c0_2] : memref<2x8x32xf32, #tpu.memory_space<vmem>>, vector<2x8x32xf32>
    %c0_3 = arith.constant 0 : index
    %c0_4 = arith.constant 0 : index
    %c0_5 = arith.constant 0 : index
    %4 = vector.load %arg2[%c0_3, %c0_4, %c0_5] : memref<2x8x32xf32, #tpu.memory_space<vmem>>, vector<2x8x32xf32>
    %5 = vector.shape_cast %3 : vector<2x8x32xf32> to vector<16x32xf32>
    %6 = vector.shape_cast %4 : vector<2x8x32xf32> to vector<16x32xf32>
    %c0_6 = arith.constant 0 : index
    %c0_7 = arith.constant 0 : index
    %c0_8 = arith.constant 0 : index
    %7 = vector.load %arg4[%c0_6, %c0_7, %c0_8] : memref<2x8x8xi32, #tpu.memory_space<vmem>>, vector<2x8x8xi32>
    %c0_i32_9 = arith.constant 0 : i32
    %8 = vector.broadcast %c0_i32_9 : i32 to vector<2x8x8xi32>
    %9 = arith.cmpi eq, %7, %8 : vector<2x8x8xi32>
    %cst = arith.constant -1.000000e+09 : f32
    %cst_10 = arith.constant 0.000000e+00 : f32
    %10 = vector.broadcast %cst : f32 to vector<2x8x8xf32>
    %11 = vector.broadcast %cst_10 : f32 to vector<2x8x8xf32>
    %12 = arith.select %9, %10, %11 : vector<2x8x8xi1>, vector<2x8x8xf32>
    %c0_11 = arith.constant 0 : index
    %c0_12 = arith.constant 0 : index
    %c0_13 = arith.constant 0 : index
    %13 = vector.load %arg3[%c0_11, %c0_12, %c0_13] : memref<2x1x8xi32, #tpu.memory_space<vmem>>, vector<2x1x8xi32>
    %c0_i32_14 = arith.constant 0 : i32
    %14 = vector.broadcast %c0_i32_14 : i32 to vector<2x1x8xi32>
    %15 = arith.cmpi eq, %13, %14 : vector<2x1x8xi32>
    %cst_15 = arith.constant -1.000000e+09 : f32
    %cst_16 = arith.constant 0.000000e+00 : f32
    %16 = vector.broadcast %cst_15 : f32 to vector<2x1x8xf32>
    %17 = vector.broadcast %cst_16 : f32 to vector<2x1x8xf32>
    %18 = arith.select %15, %16, %17 : vector<2x1x8xi1>, vector<2x1x8xf32>
    %c0_17 = arith.constant 0 : index
    %c0_18 = arith.constant 0 : index
    %c0_19 = arith.constant 0 : index
    %19 = vector.load %arg5[%c0_17, %c0_18, %c0_19] : memref<1x1x32xf32, #tpu.memory_space<vmem>>, vector<1x1x32xf32>
    %20 = vector.shape_cast %19 : vector<1x1x32xf32> to vector<1x32xf32>
    %c0_20 = arith.constant 0 : index
    %c0_21 = arith.constant 0 : index
    %c0_22 = arith.constant 0 : index
    %21 = vector.load %arg6[%c0_20, %c0_21, %c0_22] : memref<1x1x32xf32, #tpu.memory_space<vmem>>, vector<1x1x32xf32>
    %22 = vector.shape_cast %21 : vector<1x1x32xf32> to vector<1x32xf32>
    %cst_23 = arith.constant dense<0.000000e+00> : vector<16xf32>
    %23 = vector.multi_reduction <add>, %5, %cst_23 [1] : vector<16x32xf32> to vector<16xf32>
    %24 = vector.shape_cast %23 : vector<16xf32> to vector<16x1xf32>
    %cst_24 = arith.constant 3.200000e+01 : f32
    %25 = vector.broadcast %cst_24 : f32 to vector<16x1xf32>
    %26 = arith.divf %24, %25 : vector<16x1xf32>
    %27 = vector.broadcast %26 : vector<16x1xf32> to vector<16x32xf32>
    %28 = arith.subf %5, %27 : vector<16x32xf32>
    %29 = arith.mulf %28, %28 : vector<16x32xf32>
    %cst_25 = arith.constant dense<0.000000e+00> : vector<16xf32>
    %30 = vector.multi_reduction <add>, %29, %cst_25 [1] : vector<16x32xf32> to vector<16xf32>
    %31 = vector.shape_cast %30 : vector<16xf32> to vector<16x1xf32>
    %cst_26 = arith.constant 0.0322580636 : f32
    %32 = vector.broadcast %cst_26 : f32 to vector<16x1xf32>
    %33 = arith.mulf %31, %32 : vector<16x1xf32>
    %34 = vector.broadcast %20 : vector<1x32xf32> to vector<16x32xf32>
    %35 = arith.mulf %34, %28 : vector<16x32xf32>
    %36 = math.sqrt %33 : vector<16x1xf32>
    %cst_27 = arith.constant 9.99999997E-7 : f32
    %37 = vector.broadcast %cst_27 : f32 to vector<16x1xf32>
    %38 = arith.addf %36, %37 : vector<16x1xf32>
    %39 = vector.broadcast %38 : vector<16x1xf32> to vector<16x32xf32>
    %40 = arith.divf %35, %39 : vector<16x32xf32>
    %41 = vector.broadcast %22 : vector<1x32xf32> to vector<16x32xf32>
    %42 = arith.addf %40, %41 : vector<16x32xf32>
    %43 = arith.truncf %42 : vector<16x32xf32> to vector<16x32xbf16>
    %c0_28 = arith.constant 0 : index
    %c0_29 = arith.constant 0 : index
    %c0_30 = arith.constant 0 : index
    %44 = vector.load %arg7[%c0_28, %c0_29, %c0_30] : memref<1x32x96xbf16, #tpu.memory_space<vmem>>, vector<1x32x96xbf16>
    %45 = vector.shape_cast %44 : vector<1x32x96xbf16> to vector<32x96xbf16>
    %cst_31 = arith.constant dense<0.000000e+00> : vector<16x96xf32>
    %46 = tpu.matmul %43, %45, %cst_31 {dimension_numbers = #tpu.dot_dimension_numbers<[1], [0], [0], [1], [0, 0, 1, 1], [], []>} : vector<16x32xbf16>, vector<32x96xbf16>, vector<16x96xf32> -> vector<16x96xf32>
    %c0_32 = arith.constant 0 : index
    %c0_33 = arith.constant 0 : index
    %c0_34 = arith.constant 0 : index
    %47 = vector.load %arg8[%c0_32, %c0_33, %c0_34] : memref<1x1x96xf32, #tpu.memory_space<vmem>>, vector<1x1x96xf32>
    %48 = vector.shape_cast %47 : vector<1x1x96xf32> to vector<1x96xf32>
    %49 = vector.broadcast %48 : vector<1x96xf32> to vector<16x96xf32>
    %50 = arith.addf %46, %49 : vector<16x96xf32>
    %51 = vector.extract_strided_slice %50 {offsets = [0, 0], sizes = [16, 32], strides = [1, 1]} : vector<16x96xf32> to vector<16x32xf32>
    %52 = vector.extract_strided_slice %50 {offsets = [0, 32], sizes = [16, 32], strides = [1, 1]} : vector<16x96xf32> to vector<16x32xf32>
    %53 = vector.extract_strided_slice %50 {offsets = [0, 64], sizes = [16, 32], strides = [1, 1]} : vector<16x96xf32> to vector<16x32xf32>
    %cst_35 = arith.constant 0.353553385 : f32
    %54 = vector.broadcast %cst_35 : f32 to vector<16x32xf32>
    %55 = arith.mulf %51, %54 : vector<16x32xf32>
    %56 = vector.shape_cast %55 : vector<16x32xf32> to vector<2x8x32xf32>
    %57 = vector.shape_cast %52 : vector<16x32xf32> to vector<2x8x32xf32>
    %58 = vector.shape_cast %53 : vector<16x32xf32> to vector<2x8x32xf32>
    %59 = vector.extract_strided_slice %56 {offsets = [0, 0, 0], sizes = [2, 8, 8], strides = [1, 1, 1]} : vector<2x8x32xf32> to vector<2x8x8xf32>
    %60 = arith.truncf %59 : vector<2x8x8xf32> to vector<2x8x8xbf16>
    %61 = vector.extract_strided_slice %57 {offsets = [0, 0, 0], sizes = [2, 8, 8], strides = [1, 1, 1]} : vector<2x8x32xf32> to vector<2x8x8xf32>
    %62 = arith.truncf %61 : vector<2x8x8xf32> to vector<2x8x8xbf16>
    %63 = vector.extract_strided_slice %58 {offsets = [0, 0, 0], sizes = [2, 8, 8], strides = [1, 1, 1]} : vector<2x8x32xf32> to vector<2x8x8xf32>
    %64 = arith.truncf %63 : vector<2x8x8xf32> to vector<2x8x8xbf16>
    "tpu.trace_start"() <{level = 10 : i32, message = "bqd,bkd->bqk"}> : () -> ()
    %cst_36 = arith.constant dense<0.000000e+00> : vector<2x8x8xf32>
    %65 = tpu.matmul %60, %62, %cst_36 {dimension_numbers = #tpu.dot_dimension_numbers<[2], [2], [1], [1], [0, 0, 0, 1, 1, 1], [0], [0]>} : vector<2x8x8xbf16>, vector<2x8x8xbf16>, vector<2x8x8xf32> -> vector<2x8x8xf32>
    "tpu.trace_stop"() : () -> ()
    %66 = arith.addf %65, %12 : vector<2x8x8xf32>
    %cst_37 = arith.constant dense<0xFF800000> : vector<2x8xf32>
    %67 = vector.multi_reduction <maximumf>, %66, %cst_37 [2] : vector<2x8x8xf32> to vector<2x8xf32>
    %68 = vector.shape_cast %67 : vector<2x8xf32> to vector<2x8x1xf32>
    %69 = vector.broadcast %68 : vector<2x8x1xf32> to vector<2x8x8xf32>
    %70 = arith.subf %66, %69 : vector<2x8x8xf32>
    %71 = math.exp %70 : vector<2x8x8xf32>
    %cst_38 = arith.constant dense<0.000000e+00> : vector<2x8xf32>
    %72 = vector.multi_reduction <add>, %71, %cst_38 [2] : vector<2x8x8xf32> to vector<2x8xf32>
    %73 = vector.shape_cast %72 : vector<2x8xf32> to vector<2x8x1xf32>
    %74 = tpu.reciprocal %73 {approx = true} : vector<2x8x1xf32> -> vector<2x8x1xf32>
    %75 = vector.broadcast %74 : vector<2x8x1xf32> to vector<2x8x8xf32>
    %76 = arith.mulf %71, %75 : vector<2x8x8xf32>
    %77 = arith.truncf %76 : vector<2x8x8xf32> to vector<2x8x8xbf16>
    "tpu.trace_start"() <{level = 10 : i32, message = "bqk,bkd->bqd"}> : () -> ()
    %cst_39 = arith.constant dense<0.000000e+00> : vector<2x8x8xf32>
    %78 = tpu.matmul %77, %64, %cst_39 {dimension_numbers = #tpu.dot_dimension_numbers<[2], [1], [1], [2], [0, 0, 0, 1, 1, 2], [0], [0]>} : vector<2x8x8xbf16>, vector<2x8x8xbf16>, vector<2x8x8xf32> -> vector<2x8x8xf32>
    "tpu.trace_stop"() : () -> ()
    %79 = vector.extract_strided_slice %56 {offsets = [0, 0, 8], sizes = [2, 8, 8], strides = [1, 1, 1]} : vector<2x8x32xf32> to vector<2x8x8xf32>
    %80 = arith.truncf %79 : vector<2x8x8xf32> to vector<2x8x8xbf16>
    %81 = vector.extract_strided_slice %57 {offsets = [0, 0, 8], sizes = [2, 8, 8], strides = [1, 1, 1]} : vector<2x8x32xf32> to vector<2x8x8xf32>
    %82 = arith.truncf %81 : vector<2x8x8xf32> to vector<2x8x8xbf16>
    %83 = vector.extract_strided_slice %58 {offsets = [0, 0, 8], sizes = [2, 8, 8], strides = [1, 1, 1]} : vector<2x8x32xf32> to vector<2x8x8xf32>
    %84 = arith.truncf %83 : vector<2x8x8xf32> to vector<2x8x8xbf16>
    "tpu.trace_start"() <{level = 10 : i32, message = "bqd,bkd->bqk"}> : () -> ()
    %cst_40 = arith.constant dense<0.000000e+00> : vector<2x8x8xf32>
    %85 = tpu.matmul %80, %82, %cst_40 {dimension_numbers = #tpu.dot_dimension_numbers<[2], [2], [1], [1], [0, 0, 0, 1, 1, 1], [0], [0]>} : vector<2x8x8xbf16>, vector<2x8x8xbf16>, vector<2x8x8xf32> -> vector<2x8x8xf32>
    "tpu.trace_stop"() : () -> ()
    %86 = arith.addf %85, %12 : vector<2x8x8xf32>
    %cst_41 = arith.constant dense<0xFF800000> : vector<2x8xf32>
    %87 = vector.multi_reduction <maximumf>, %86, %cst_41 [2] : vector<2x8x8xf32> to vector<2x8xf32>
    %88 = vector.shape_cast %87 : vector<2x8xf32> to vector<2x8x1xf32>
    %89 = vector.broadcast %88 : vector<2x8x1xf32> to vector<2x8x8xf32>
    %90 = arith.subf %86, %89 : vector<2x8x8xf32>
    %91 = math.exp %90 : vector<2x8x8xf32>
    %cst_42 = arith.constant dense<0.000000e+00> : vector<2x8xf32>
    %92 = vector.multi_reduction <add>, %91, %cst_42 [2] : vector<2x8x8xf32> to vector<2x8xf32>
    %93 = vector.shape_cast %92 : vector<2x8xf32> to vector<2x8x1xf32>
    %94 = tpu.reciprocal %93 {approx = true} : vector<2x8x1xf32> -> vector<2x8x1xf32>
    %95 = vector.broadcast %94 : vector<2x8x1xf32> to vector<2x8x8xf32>
    %96 = arith.mulf %91, %95 : vector<2x8x8xf32>
    %97 = arith.truncf %96 : vector<2x8x8xf32> to vector<2x8x8xbf16>
    "tpu.trace_start"() <{level = 10 : i32, message = "bqk,bkd->bqd"}> : () -> ()
    %cst_43 = arith.constant dense<0.000000e+00> : vector<2x8x8xf32>
    %98 = tpu.matmul %97, %84, %cst_43 {dimension_numbers = #tpu.dot_dimension_numbers<[2], [1], [1], [2], [0, 0, 0, 1, 1, 2], [0], [0]>} : vector<2x8x8xbf16>, vector<2x8x8xbf16>, vector<2x8x8xf32> -> vector<2x8x8xf32>
    "tpu.trace_stop"() : () -> ()
    %99 = vector.extract_strided_slice %56 {offsets = [0, 0, 16], sizes = [2, 8, 8], strides = [1, 1, 1]} : vector<2x8x32xf32> to vector<2x8x8xf32>
    %100 = arith.truncf %99 : vector<2x8x8xf32> to vector<2x8x8xbf16>
    %101 = vector.extract_strided_slice %57 {offsets = [0, 0, 16], sizes = [2, 8, 8], strides = [1, 1, 1]} : vector<2x8x32xf32> to vector<2x8x8xf32>
    %102 = arith.truncf %101 : vector<2x8x8xf32> to vector<2x8x8xbf16>
    %103 = vector.extract_strided_slice %58 {offsets = [0, 0, 16], sizes = [2, 8, 8], strides = [1, 1, 1]} : vector<2x8x32xf32> to vector<2x8x8xf32>
    %104 = arith.truncf %103 : vector<2x8x8xf32> to vector<2x8x8xbf16>
    "tpu.trace_start"() <{level = 10 : i32, message = "bqd,bkd->bqk"}> : () -> ()
    %cst_44 = arith.constant dense<0.000000e+00> : vector<2x8x8xf32>
    %105 = tpu.matmul %100, %102, %cst_44 {dimension_numbers = #tpu.dot_dimension_numbers<[2], [2], [1], [1], [0, 0, 0, 1, 1, 1], [0], [0]>} : vector<2x8x8xbf16>, vector<2x8x8xbf16>, vector<2x8x8xf32> -> vector<2x8x8xf32>
    "tpu.trace_stop"() : () -> ()
    %106 = arith.addf %105, %12 : vector<2x8x8xf32>
    %cst_45 = arith.constant dense<0xFF800000> : vector<2x8xf32>
    %107 = vector.multi_reduction <maximumf>, %106, %cst_45 [2] : vector<2x8x8xf32> to vector<2x8xf32>
    %108 = vector.shape_cast %107 : vector<2x8xf32> to vector<2x8x1xf32>
    %109 = vector.broadcast %108 : vector<2x8x1xf32> to vector<2x8x8xf32>
    %110 = arith.subf %106, %109 : vector<2x8x8xf32>
    %111 = math.exp %110 : vector<2x8x8xf32>
    %cst_46 = arith.constant dense<0.000000e+00> : vector<2x8xf32>
    %112 = vector.multi_reduction <add>, %111, %cst_46 [2] : vector<2x8x8xf32> to vector<2x8xf32>
    %113 = vector.shape_cast %112 : vector<2x8xf32> to vector<2x8x1xf32>
    %114 = tpu.reciprocal %113 {approx = true} : vector<2x8x1xf32> -> vector<2x8x1xf32>
    %115 = vector.broadcast %114 : vector<2x8x1xf32> to vector<2x8x8xf32>
    %116 = arith.mulf %111, %115 : vector<2x8x8xf32>
    %117 = arith.truncf %116 : vector<2x8x8xf32> to vector<2x8x8xbf16>
    "tpu.trace_start"() <{level = 10 : i32, message = "bqk,bkd->bqd"}> : () -> ()
    %cst_47 = arith.constant dense<0.000000e+00> : vector<2x8x8xf32>
    %118 = tpu.matmul %117, %104, %cst_47 {dimension_numbers = #tpu.dot_dimension_numbers<[2], [1], [1], [2], [0, 0, 0, 1, 1, 2], [0], [0]>} : vector<2x8x8xbf16>, vector<2x8x8xbf16>, vector<2x8x8xf32> -> vector<2x8x8xf32>
    "tpu.trace_stop"() : () -> ()
    %119 = vector.extract_strided_slice %56 {offsets = [0, 0, 24], sizes = [2, 8, 8], strides = [1, 1, 1]} : vector<2x8x32xf32> to vector<2x8x8xf32>
    %120 = arith.truncf %119 : vector<2x8x8xf32> to vector<2x8x8xbf16>
    %121 = vector.extract_strided_slice %57 {offsets = [0, 0, 24], sizes = [2, 8, 8], strides = [1, 1, 1]} : vector<2x8x32xf32> to vector<2x8x8xf32>
    %122 = arith.truncf %121 : vector<2x8x8xf32> to vector<2x8x8xbf16>
    %123 = vector.extract_strided_slice %58 {offsets = [0, 0, 24], sizes = [2, 8, 8], strides = [1, 1, 1]} : vector<2x8x32xf32> to vector<2x8x8xf32>
    %124 = arith.truncf %123 : vector<2x8x8xf32> to vector<2x8x8xbf16>
    "tpu.trace_start"() <{level = 10 : i32, message = "bqd,bkd->bqk"}> : () -> ()
    %cst_48 = arith.constant dense<0.000000e+00> : vector<2x8x8xf32>
    %125 = tpu.matmul %120, %122, %cst_48 {dimension_numbers = #tpu.dot_dimension_numbers<[2], [2], [1], [1], [0, 0, 0, 1, 1, 1], [0], [0]>} : vector<2x8x8xbf16>, vector<2x8x8xbf16>, vector<2x8x8xf32> -> vector<2x8x8xf32>
    "tpu.trace_stop"() : () -> ()
    %126 = arith.addf %125, %12 : vector<2x8x8xf32>
    %cst_49 = arith.constant dense<0xFF800000> : vector<2x8xf32>
    %127 = vector.multi_reduction <maximumf>, %126, %cst_49 [2] : vector<2x8x8xf32> to vector<2x8xf32>
    %128 = vector.shape_cast %127 : vector<2x8xf32> to vector<2x8x1xf32>
    %129 = vector.broadcast %128 : vector<2x8x1xf32> to vector<2x8x8xf32>
    %130 = arith.subf %126, %129 : vector<2x8x8xf32>
    %131 = math.exp %130 : vector<2x8x8xf32>
    %cst_50 = arith.constant dense<0.000000e+00> : vector<2x8xf32>
    %132 = vector.multi_reduction <add>, %131, %cst_50 [2] : vector<2x8x8xf32> to vector<2x8xf32>
    %133 = vector.shape_cast %132 : vector<2x8xf32> to vector<2x8x1xf32>
    %134 = tpu.reciprocal %133 {approx = true} : vector<2x8x1xf32> -> vector<2x8x1xf32>
    %135 = vector.broadcast %134 : vector<2x8x1xf32> to vector<2x8x8xf32>
    %136 = arith.mulf %131, %135 : vector<2x8x8xf32>
    %137 = arith.truncf %136 : vector<2x8x8xf32> to vector<2x8x8xbf16>
    "tpu.trace_start"() <{level = 10 : i32, message = "bqk,bkd->bqd"}> : () -> ()
    %cst_51 = arith.constant dense<0.000000e+00> : vector<2x8x8xf32>
    %138 = tpu.matmul %137, %124, %cst_51 {dimension_numbers = #tpu.dot_dimension_numbers<[2], [1], [1], [2], [0, 0, 0, 1, 1, 2], [0], [0]>} : vector<2x8x8xbf16>, vector<2x8x8xbf16>, vector<2x8x8xf32> -> vector<2x8x8xf32>
    "tpu.trace_stop"() : () -> ()
    %139 = tpu.concatenate %78, %98, %118, %138 in 2 : vector<2x8x8xf32>, vector<2x8x8xf32>, vector<2x8x8xf32>, vector<2x8x8xf32> -> vector<2x8x32xf32>
    %140 = vector.shape_cast %139 : vector<2x8x32xf32> to vector<16x32xf32>
    %141 = arith.truncf %140 : vector<16x32xf32> to vector<16x32xbf16>
    %c0_52 = arith.constant 0 : index
    %c0_53 = arith.constant 0 : index
    %c0_54 = arith.constant 0 : index
    %142 = vector.load %arg9[%c0_52, %c0_53, %c0_54] : memref<1x32x32xbf16, #tpu.memory_space<vmem>>, vector<1x32x32xbf16>
    %143 = vector.shape_cast %142 : vector<1x32x32xbf16> to vector<32x32xbf16>
    %cst_55 = arith.constant dense<0.000000e+00> : vector<16x32xf32>
    %144 = tpu.matmul %141, %143, %cst_55 {dimension_numbers = #tpu.dot_dimension_numbers<[1], [0], [0], [1], [0, 0, 1, 1], [], []>} : vector<16x32xbf16>, vector<32x32xbf16>, vector<16x32xf32> -> vector<16x32xf32>
    %145 = arith.addf %5, %144 : vector<16x32xf32>
    %c0_56 = arith.constant 0 : index
    %c0_57 = arith.constant 0 : index
    %c0_58 = arith.constant 0 : index
    %146 = vector.load %arg10[%c0_56, %c0_57, %c0_58] : memref<1x1x32xf32, #tpu.memory_space<vmem>>, vector<1x1x32xf32>
    %147 = vector.shape_cast %146 : vector<1x1x32xf32> to vector<1x32xf32>
    %148 = vector.broadcast %147 : vector<1x32xf32> to vector<16x32xf32>
    %149 = arith.addf %145, %148 : vector<16x32xf32>
    %c0_59 = arith.constant 0 : index
    %c0_60 = arith.constant 0 : index
    %c0_61 = arith.constant 0 : index
    %150 = vector.load %arg11[%c0_59, %c0_60, %c0_61] : memref<1x1x32xf32, #tpu.memory_space<vmem>>, vector<1x1x32xf32>
    %151 = vector.shape_cast %150 : vector<1x1x32xf32> to vector<1x32xf32>
    %c0_62 = arith.constant 0 : index
    %c0_63 = arith.constant 0 : index
    %c0_64 = arith.constant 0 : index
    %152 = vector.load %arg12[%c0_62, %c0_63, %c0_64] : memref<1x1x32xf32, #tpu.memory_space<vmem>>, vector<1x1x32xf32>
    %153 = vector.shape_cast %152 : vector<1x1x32xf32> to vector<1x32xf32>
    %cst_65 = arith.constant dense<0.000000e+00> : vector<16xf32>
    %154 = vector.multi_reduction <add>, %149, %cst_65 [1] : vector<16x32xf32> to vector<16xf32>
    %155 = vector.shape_cast %154 : vector<16xf32> to vector<16x1xf32>
    %cst_66 = arith.constant 3.200000e+01 : f32
    %156 = vector.broadcast %cst_66 : f32 to vector<16x1xf32>
    %157 = arith.divf %155, %156 : vector<16x1xf32>
    %158 = vector.broadcast %157 : vector<16x1xf32> to vector<16x32xf32>
    %159 = arith.subf %149, %158 : vector<16x32xf32>
    %160 = arith.mulf %159, %159 : vector<16x32xf32>
    %cst_67 = arith.constant dense<0.000000e+00> : vector<16xf32>
    %161 = vector.multi_reduction <add>, %160, %cst_67 [1] : vector<16x32xf32> to vector<16xf32>
    %162 = vector.shape_cast %161 : vector<16xf32> to vector<16x1xf32>
    %cst_68 = arith.constant 0.0322580636 : f32
    %163 = vector.broadcast %cst_68 : f32 to vector<16x1xf32>
    %164 = arith.mulf %162, %163 : vector<16x1xf32>
    %165 = vector.broadcast %151 : vector<1x32xf32> to vector<16x32xf32>
    %166 = arith.mulf %165, %159 : vector<16x32xf32>
    %167 = math.sqrt %164 : vector<16x1xf32>
    %cst_69 = arith.constant 9.99999997E-7 : f32
    %168 = vector.broadcast %cst_69 : f32 to vector<16x1xf32>
    %169 = arith.addf %167, %168 : vector<16x1xf32>
    %170 = vector.broadcast %169 : vector<16x1xf32> to vector<16x32xf32>
    %171 = arith.divf %166, %170 : vector<16x32xf32>
    %172 = vector.broadcast %153 : vector<1x32xf32> to vector<16x32xf32>
    %173 = arith.addf %171, %172 : vector<16x32xf32>
    %174 = arith.truncf %173 : vector<16x32xf32> to vector<16x32xbf16>
    %c0_70 = arith.constant 0 : index
    %c0_71 = arith.constant 0 : index
    %c0_72 = arith.constant 0 : index
    %175 = vector.load %arg13[%c0_70, %c0_71, %c0_72] : memref<1x32x32xbf16, #tpu.memory_space<vmem>>, vector<1x32x32xbf16>
    %176 = vector.shape_cast %175 : vector<1x32x32xbf16> to vector<32x32xbf16>
    %cst_73 = arith.constant dense<0.000000e+00> : vector<16x32xf32>
    %177 = tpu.matmul %174, %176, %cst_73 {dimension_numbers = #tpu.dot_dimension_numbers<[1], [0], [0], [1], [0, 0, 1, 1], [], []>} : vector<16x32xbf16>, vector<32x32xbf16>, vector<16x32xf32> -> vector<16x32xf32>
    %c0_74 = arith.constant 0 : index
    %c0_75 = arith.constant 0 : index
    %c0_76 = arith.constant 0 : index
    %178 = vector.load %arg14[%c0_74, %c0_75, %c0_76] : memref<1x1x32xf32, #tpu.memory_space<vmem>>, vector<1x1x32xf32>
    %179 = vector.shape_cast %178 : vector<1x1x32xf32> to vector<1x32xf32>
    %180 = vector.broadcast %179 : vector<1x32xf32> to vector<16x32xf32>
    %181 = arith.addf %177, %180 : vector<16x32xf32>
    %182 = arith.truncf %6 : vector<16x32xf32> to vector<16x32xbf16>
    %c0_77 = arith.constant 0 : index
    %c0_78 = arith.constant 0 : index
    %c0_79 = arith.constant 0 : index
    %183 = vector.load %arg15[%c0_77, %c0_78, %c0_79] : memref<1x32x64xbf16, #tpu.memory_space<vmem>>, vector<1x32x64xbf16>
    %184 = vector.shape_cast %183 : vector<1x32x64xbf16> to vector<32x64xbf16>
    %cst_80 = arith.constant dense<0.000000e+00> : vector<16x64xf32>
    %185 = tpu.matmul %182, %184, %cst_80 {dimension_numbers = #tpu.dot_dimension_numbers<[1], [0], [0], [1], [0, 0, 1, 1], [], []>} : vector<16x32xbf16>, vector<32x64xbf16>, vector<16x64xf32> -> vector<16x64xf32>
    %c0_81 = arith.constant 0 : index
    %c0_82 = arith.constant 0 : index
    %c0_83 = arith.constant 0 : index
    %186 = vector.load %arg16[%c0_81, %c0_82, %c0_83] : memref<1x1x64xf32, #tpu.memory_space<vmem>>, vector<1x1x64xf32>
    %187 = vector.shape_cast %186 : vector<1x1x64xf32> to vector<1x64xf32>
    %188 = vector.broadcast %187 : vector<1x64xf32> to vector<16x64xf32>
    %189 = arith.addf %185, %188 : vector<16x64xf32>
    %190 = vector.extract_strided_slice %189 {offsets = [0, 0], sizes = [16, 32], strides = [1, 1]} : vector<16x64xf32> to vector<16x32xf32>
    %191 = vector.extract_strided_slice %189 {offsets = [0, 32], sizes = [16, 32], strides = [1, 1]} : vector<16x64xf32> to vector<16x32xf32>
    %cst_84 = arith.constant 0.353553385 : f32
    %192 = vector.broadcast %cst_84 : f32 to vector<16x32xf32>
    %193 = arith.mulf %181, %192 : vector<16x32xf32>
    %194 = vector.shape_cast %193 : vector<16x32xf32> to vector<2x8x32xf32>
    %195 = vector.shape_cast %190 : vector<16x32xf32> to vector<2x8x32xf32>
    %196 = vector.shape_cast %191 : vector<16x32xf32> to vector<2x8x32xf32>
    %197 = vector.shape_cast %18 : vector<2x1x8xf32> to vector<2x1x8xf32>
    %198 = vector.broadcast %197 : vector<2x1x8xf32> to vector<2x8x8xf32>
    %199 = vector.extract_strided_slice %194 {offsets = [0, 0, 0], sizes = [2, 8, 8], strides = [1, 1, 1]} : vector<2x8x32xf32> to vector<2x8x8xf32>
    %200 = arith.truncf %199 : vector<2x8x8xf32> to vector<2x8x8xbf16>
    %201 = vector.extract_strided_slice %195 {offsets = [0, 0, 0], sizes = [2, 8, 8], strides = [1, 1, 1]} : vector<2x8x32xf32> to vector<2x8x8xf32>
    %202 = arith.truncf %201 : vector<2x8x8xf32> to vector<2x8x8xbf16>
    %203 = vector.extract_strided_slice %196 {offsets = [0, 0, 0], sizes = [2, 8, 8], strides = [1, 1, 1]} : vector<2x8x32xf32> to vector<2x8x8xf32>
    %204 = arith.truncf %203 : vector<2x8x8xf32> to vector<2x8x8xbf16>
    "tpu.trace_start"() <{level = 10 : i32, message = "bqd,bkd->bqk"}> : () -> ()
    %cst_85 = arith.constant dense<0.000000e+00> : vector<2x8x8xf32>
    %205 = tpu.matmul %200, %202, %cst_85 {dimension_numbers = #tpu.dot_dimension_numbers<[2], [2], [1], [1], [0, 0, 0, 1, 1, 1], [0], [0]>} : vector<2x8x8xbf16>, vector<2x8x8xbf16>, vector<2x8x8xf32> -> vector<2x8x8xf32>
    "tpu.trace_stop"() : () -> ()
    %206 = arith.addf %205, %198 : vector<2x8x8xf32>
    %cst_86 = arith.constant dense<0xFF800000> : vector<2x8xf32>
    %207 = vector.multi_reduction <maximumf>, %206, %cst_86 [2] : vector<2x8x8xf32> to vector<2x8xf32>
    %208 = vector.shape_cast %207 : vector<2x8xf32> to vector<2x8x1xf32>
    %209 = vector.broadcast %208 : vector<2x8x1xf32> to vector<2x8x8xf32>
    %210 = arith.subf %206, %209 : vector<2x8x8xf32>
    %211 = math.exp %210 : vector<2x8x8xf32>
    %cst_87 = arith.constant dense<0.000000e+00> : vector<2x8xf32>
    %212 = vector.multi_reduction <add>, %211, %cst_87 [2] : vector<2x8x8xf32> to vector<2x8xf32>
    %213 = vector.shape_cast %212 : vector<2x8xf32> to vector<2x8x1xf32>
    %214 = tpu.reciprocal %213 {approx = true} : vector<2x8x1xf32> -> vector<2x8x1xf32>
    %215 = vector.broadcast %214 : vector<2x8x1xf32> to vector<2x8x8xf32>
    %216 = arith.mulf %211, %215 : vector<2x8x8xf32>
    %217 = arith.truncf %216 : vector<2x8x8xf32> to vector<2x8x8xbf16>
    "tpu.trace_start"() <{level = 10 : i32, message = "bqk,bkd->bqd"}> : () -> ()
    %cst_88 = arith.constant dense<0.000000e+00> : vector<2x8x8xf32>
    %218 = tpu.matmul %217, %204, %cst_88 {dimension_numbers = #tpu.dot_dimension_numbers<[2], [1], [1], [2], [0, 0, 0, 1, 1, 2], [0], [0]>} : vector<2x8x8xbf16>, vector<2x8x8xbf16>, vector<2x8x8xf32> -> vector<2x8x8xf32>
    "tpu.trace_stop"() : () -> ()
    %219 = vector.extract_strided_slice %194 {offsets = [0, 0, 8], sizes = [2, 8, 8], strides = [1, 1, 1]} : vector<2x8x32xf32> to vector<2x8x8xf32>
    %220 = arith.truncf %219 : vector<2x8x8xf32> to vector<2x8x8xbf16>
    %221 = vector.extract_strided_slice %195 {offsets = [0, 0, 8], sizes = [2, 8, 8], strides = [1, 1, 1]} : vector<2x8x32xf32> to vector<2x8x8xf32>
    %222 = arith.truncf %221 : vector<2x8x8xf32> to vector<2x8x8xbf16>
    %223 = vector.extract_strided_slice %196 {offsets = [0, 0, 8], sizes = [2, 8, 8], strides = [1, 1, 1]} : vector<2x8x32xf32> to vector<2x8x8xf32>
    %224 = arith.truncf %223 : vector<2x8x8xf32> to vector<2x8x8xbf16>
    "tpu.trace_start"() <{level = 10 : i32, message = "bqd,bkd->bqk"}> : () -> ()
    %cst_89 = arith.constant dense<0.000000e+00> : vector<2x8x8xf32>
    %225 = tpu.matmul %220, %222, %cst_89 {dimension_numbers = #tpu.dot_dimension_numbers<[2], [2], [1], [1], [0, 0, 0, 1, 1, 1], [0], [0]>} : vector<2x8x8xbf16>, vector<2x8x8xbf16>, vector<2x8x8xf32> -> vector<2x8x8xf32>
    "tpu.trace_stop"() : () -> ()
    %226 = arith.addf %225, %198 : vector<2x8x8xf32>
    %cst_90 = arith.constant dense<0xFF800000> : vector<2x8xf32>
    %227 = vector.multi_reduction <maximumf>, %226, %cst_90 [2] : vector<2x8x8xf32> to vector<2x8xf32>
    %228 = vector.shape_cast %227 : vector<2x8xf32> to vector<2x8x1xf32>
    %229 = vector.broadcast %228 : vector<2x8x1xf32> to vector<2x8x8xf32>
    %230 = arith.subf %226, %229 : vector<2x8x8xf32>
    %231 = math.exp %230 : vector<2x8x8xf32>
    %cst_91 = arith.constant dense<0.000000e+00> : vector<2x8xf32>
    %232 = vector.multi_reduction <add>, %231, %cst_91 [2] : vector<2x8x8xf32> to vector<2x8xf32>
    %233 = vector.shape_cast %232 : vector<2x8xf32> to vector<2x8x1xf32>
    %234 = tpu.reciprocal %233 {approx = true} : vector<2x8x1xf32> -> vector<2x8x1xf32>
    %235 = vector.broadcast %234 : vector<2x8x1xf32> to vector<2x8x8xf32>
    %236 = arith.mulf %231, %235 : vector<2x8x8xf32>
    %237 = arith.truncf %236 : vector<2x8x8xf32> to vector<2x8x8xbf16>
    "tpu.trace_start"() <{level = 10 : i32, message = "bqk,bkd->bqd"}> : () -> ()
    %cst_92 = arith.constant dense<0.000000e+00> : vector<2x8x8xf32>
    %238 = tpu.matmul %237, %224, %cst_92 {dimension_numbers = #tpu.dot_dimension_numbers<[2], [1], [1], [2], [0, 0, 0, 1, 1, 2], [0], [0]>} : vector<2x8x8xbf16>, vector<2x8x8xbf16>, vector<2x8x8xf32> -> vector<2x8x8xf32>
    "tpu.trace_stop"() : () -> ()
    %239 = vector.extract_strided_slice %194 {offsets = [0, 0, 16], sizes = [2, 8, 8], strides = [1, 1, 1]} : vector<2x8x32xf32> to vector<2x8x8xf32>
    %240 = arith.truncf %239 : vector<2x8x8xf32> to vector<2x8x8xbf16>
    %241 = vector.extract_strided_slice %195 {offsets = [0, 0, 16], sizes = [2, 8, 8], strides = [1, 1, 1]} : vector<2x8x32xf32> to vector<2x8x8xf32>
    %242 = arith.truncf %241 : vector<2x8x8xf32> to vector<2x8x8xbf16>
    %243 = vector.extract_strided_slice %196 {offsets = [0, 0, 16], sizes = [2, 8, 8], strides = [1, 1, 1]} : vector<2x8x32xf32> to vector<2x8x8xf32>
    %244 = arith.truncf %243 : vector<2x8x8xf32> to vector<2x8x8xbf16>
    "tpu.trace_start"() <{level = 10 : i32, message = "bqd,bkd->bqk"}> : () -> ()
    %cst_93 = arith.constant dense<0.000000e+00> : vector<2x8x8xf32>
    %245 = tpu.matmul %240, %242, %cst_93 {dimension_numbers = #tpu.dot_dimension_numbers<[2], [2], [1], [1], [0, 0, 0, 1, 1, 1], [0], [0]>} : vector<2x8x8xbf16>, vector<2x8x8xbf16>, vector<2x8x8xf32> -> vector<2x8x8xf32>
    "tpu.trace_stop"() : () -> ()
    %246 = arith.addf %245, %198 : vector<2x8x8xf32>
    %cst_94 = arith.constant dense<0xFF800000> : vector<2x8xf32>
    %247 = vector.multi_reduction <maximumf>, %246, %cst_94 [2] : vector<2x8x8xf32> to vector<2x8xf32>
    %248 = vector.shape_cast %247 : vector<2x8xf32> to vector<2x8x1xf32>
    %249 = vector.broadcast %248 : vector<2x8x1xf32> to vector<2x8x8xf32>
    %250 = arith.subf %246, %249 : vector<2x8x8xf32>
    %251 = math.exp %250 : vector<2x8x8xf32>
    %cst_95 = arith.constant dense<0.000000e+00> : vector<2x8xf32>
    %252 = vector.multi_reduction <add>, %251, %cst_95 [2] : vector<2x8x8xf32> to vector<2x8xf32>
    %253 = vector.shape_cast %252 : vector<2x8xf32> to vector<2x8x1xf32>
    %254 = tpu.reciprocal %253 {approx = true} : vector<2x8x1xf32> -> vector<2x8x1xf32>
    %255 = vector.broadcast %254 : vector<2x8x1xf32> to vector<2x8x8xf32>
    %256 = arith.mulf %251, %255 : vector<2x8x8xf32>
    %257 = arith.truncf %256 : vector<2x8x8xf32> to vector<2x8x8xbf16>
    "tpu.trace_start"() <{level = 10 : i32, message = "bqk,bkd->bqd"}> : () -> ()
    %cst_96 = arith.constant dense<0.000000e+00> : vector<2x8x8xf32>
    %258 = tpu.matmul %257, %244, %cst_96 {dimension_numbers = #tpu.dot_dimension_numbers<[2], [1], [1], [2], [0, 0, 0, 1, 1, 2], [0], [0]>} : vector<2x8x8xbf16>, vector<2x8x8xbf16>, vector<2x8x8xf32> -> vector<2x8x8xf32>
    "tpu.trace_stop"() : () -> ()
    %259 = vector.extract_strided_slice %194 {offsets = [0, 0, 24], sizes = [2, 8, 8], strides = [1, 1, 1]} : vector<2x8x32xf32> to vector<2x8x8xf32>
    %260 = arith.truncf %259 : vector<2x8x8xf32> to vector<2x8x8xbf16>
    %261 = vector.extract_strided_slice %195 {offsets = [0, 0, 24], sizes = [2, 8, 8], strides = [1, 1, 1]} : vector<2x8x32xf32> to vector<2x8x8xf32>
    %262 = arith.truncf %261 : vector<2x8x8xf32> to vector<2x8x8xbf16>
    %263 = vector.extract_strided_slice %196 {offsets = [0, 0, 24], sizes = [2, 8, 8], strides = [1, 1, 1]} : vector<2x8x32xf32> to vector<2x8x8xf32>
    %264 = arith.truncf %263 : vector<2x8x8xf32> to vector<2x8x8xbf16>
    "tpu.trace_start"() <{level = 10 : i32, message = "bqd,bkd->bqk"}> : () -> ()
    %cst_97 = arith.constant dense<0.000000e+00> : vector<2x8x8xf32>
    %265 = tpu.matmul %260, %262, %cst_97 {dimension_numbers = #tpu.dot_dimension_numbers<[2], [2], [1], [1], [0, 0, 0, 1, 1, 1], [0], [0]>} : vector<2x8x8xbf16>, vector<2x8x8xbf16>, vector<2x8x8xf32> -> vector<2x8x8xf32>
    "tpu.trace_stop"() : () -> ()
    %266 = arith.addf %265, %198 : vector<2x8x8xf32>
    %cst_98 = arith.constant dense<0xFF800000> : vector<2x8xf32>
    %267 = vector.multi_reduction <maximumf>, %266, %cst_98 [2] : vector<2x8x8xf32> to vector<2x8xf32>
    %268 = vector.shape_cast %267 : vector<2x8xf32> to vector<2x8x1xf32>
    %269 = vector.broadcast %268 : vector<2x8x1xf32> to vector<2x8x8xf32>
    %270 = arith.subf %266, %269 : vector<2x8x8xf32>
    %271 = math.exp %270 : vector<2x8x8xf32>
    %cst_99 = arith.constant dense<0.000000e+00> : vector<2x8xf32>
    %272 = vector.multi_reduction <add>, %271, %cst_99 [2] : vector<2x8x8xf32> to vector<2x8xf32>
    %273 = vector.shape_cast %272 : vector<2x8xf32> to vector<2x8x1xf32>
    %274 = tpu.reciprocal %273 {approx = true} : vector<2x8x1xf32> -> vector<2x8x1xf32>
    %275 = vector.broadcast %274 : vector<2x8x1xf32> to vector<2x8x8xf32>
    %276 = arith.mulf %271, %275 : vector<2x8x8xf32>
    %277 = arith.truncf %276 : vector<2x8x8xf32> to vector<2x8x8xbf16>
    "tpu.trace_start"() <{level = 10 : i32, message = "bqk,bkd->bqd"}> : () -> ()
    %cst_100 = arith.constant dense<0.000000e+00> : vector<2x8x8xf32>
    %278 = tpu.matmul %277, %264, %cst_100 {dimension_numbers = #tpu.dot_dimension_numbers<[2], [1], [1], [2], [0, 0, 0, 1, 1, 2], [0], [0]>} : vector<2x8x8xbf16>, vector<2x8x8xbf16>, vector<2x8x8xf32> -> vector<2x8x8xf32>
    "tpu.trace_stop"() : () -> ()
    %279 = tpu.concatenate %218, %238, %258, %278 in 2 : vector<2x8x8xf32>, vector<2x8x8xf32>, vector<2x8x8xf32>, vector<2x8x8xf32> -> vector<2x8x32xf32>
    %280 = vector.shape_cast %279 : vector<2x8x32xf32> to vector<16x32xf32>
    %281 = arith.truncf %280 : vector<16x32xf32> to vector<16x32xbf16>
    %c0_101 = arith.constant 0 : index
    %c0_102 = arith.constant 0 : index
    %c0_103 = arith.constant 0 : index
    %282 = vector.load %arg17[%c0_101, %c0_102, %c0_103] : memref<1x32x32xbf16, #tpu.memory_space<vmem>>, vector<1x32x32xbf16>
    %283 = vector.shape_cast %282 : vector<1x32x32xbf16> to vector<32x32xbf16>
    %cst_104 = arith.constant dense<0.000000e+00> : vector<16x32xf32>
    %284 = tpu.matmul %281, %283, %cst_104 {dimension_numbers = #tpu.dot_dimension_numbers<[1], [0], [0], [1], [0, 0, 1, 1], [], []>} : vector<16x32xbf16>, vector<32x32xbf16>, vector<16x32xf32> -> vector<16x32xf32>
    %285 = arith.addf %149, %284 : vector<16x32xf32>
    %c0_105 = arith.constant 0 : index
    %c0_106 = arith.constant 0 : index
    %c0_107 = arith.constant 0 : index
    %286 = vector.load %arg18[%c0_105, %c0_106, %c0_107] : memref<1x1x32xf32, #tpu.memory_space<vmem>>, vector<1x1x32xf32>
    %287 = vector.shape_cast %286 : vector<1x1x32xf32> to vector<1x32xf32>
    %288 = vector.broadcast %287 : vector<1x32xf32> to vector<16x32xf32>
    %289 = arith.addf %285, %288 : vector<16x32xf32>
    %c0_108 = arith.constant 0 : index
    %c0_109 = arith.constant 0 : index
    %c0_110 = arith.constant 0 : index
    %290 = vector.load %arg19[%c0_108, %c0_109, %c0_110] : memref<1x1x32xf32, #tpu.memory_space<vmem>>, vector<1x1x32xf32>
    %291 = vector.shape_cast %290 : vector<1x1x32xf32> to vector<1x32xf32>
    %c0_111 = arith.constant 0 : index
    %c0_112 = arith.constant 0 : index
    %c0_113 = arith.constant 0 : index
    %292 = vector.load %arg20[%c0_111, %c0_112, %c0_113] : memref<1x1x32xf32, #tpu.memory_space<vmem>>, vector<1x1x32xf32>
    %293 = vector.shape_cast %292 : vector<1x1x32xf32> to vector<1x32xf32>
    %cst_114 = arith.constant dense<0.000000e+00> : vector<16xf32>
    %294 = vector.multi_reduction <add>, %289, %cst_114 [1] : vector<16x32xf32> to vector<16xf32>
    %295 = vector.shape_cast %294 : vector<16xf32> to vector<16x1xf32>
    %cst_115 = arith.constant 3.200000e+01 : f32
    %296 = vector.broadcast %cst_115 : f32 to vector<16x1xf32>
    %297 = arith.divf %295, %296 : vector<16x1xf32>
    %298 = vector.broadcast %297 : vector<16x1xf32> to vector<16x32xf32>
    %299 = arith.subf %289, %298 : vector<16x32xf32>
    %300 = arith.mulf %299, %299 : vector<16x32xf32>
    %cst_116 = arith.constant dense<0.000000e+00> : vector<16xf32>
    %301 = vector.multi_reduction <add>, %300, %cst_116 [1] : vector<16x32xf32> to vector<16xf32>
    %302 = vector.shape_cast %301 : vector<16xf32> to vector<16x1xf32>
    %cst_117 = arith.constant 0.0322580636 : f32
    %303 = vector.broadcast %cst_117 : f32 to vector<16x1xf32>
    %304 = arith.mulf %302, %303 : vector<16x1xf32>
    %305 = vector.broadcast %291 : vector<1x32xf32> to vector<16x32xf32>
    %306 = arith.mulf %305, %299 : vector<16x32xf32>
    %307 = math.sqrt %304 : vector<16x1xf32>
    %cst_118 = arith.constant 9.99999997E-7 : f32
    %308 = vector.broadcast %cst_118 : f32 to vector<16x1xf32>
    %309 = arith.addf %307, %308 : vector<16x1xf32>
    %310 = vector.broadcast %309 : vector<16x1xf32> to vector<16x32xf32>
    %311 = arith.divf %306, %310 : vector<16x32xf32>
    %312 = vector.broadcast %293 : vector<1x32xf32> to vector<16x32xf32>
    %313 = arith.addf %311, %312 : vector<16x32xf32>
    %314 = arith.truncf %313 : vector<16x32xf32> to vector<16x32xbf16>
    %c0_119 = arith.constant 0 : index
    %c0_120 = arith.constant 0 : index
    %c0_121 = arith.constant 0 : index
    %315 = vector.load %arg21[%c0_119, %c0_120, %c0_121] : memref<1x32x64xbf16, #tpu.memory_space<vmem>>, vector<1x32x64xbf16>
    %316 = vector.shape_cast %315 : vector<1x32x64xbf16> to vector<32x64xbf16>
    %cst_122 = arith.constant dense<0.000000e+00> : vector<16x64xf32>
    %317 = tpu.matmul %314, %316, %cst_122 {dimension_numbers = #tpu.dot_dimension_numbers<[1], [0], [0], [1], [0, 0, 1, 1], [], []>} : vector<16x32xbf16>, vector<32x64xbf16>, vector<16x64xf32> -> vector<16x64xf32>
    %c0_123 = arith.constant 0 : index
    %c0_124 = arith.constant 0 : index
    %c0_125 = arith.constant 0 : index
    %318 = vector.load %arg22[%c0_123, %c0_124, %c0_125] : memref<1x1x64xf32, #tpu.memory_space<vmem>>, vector<1x1x64xf32>
    %319 = vector.shape_cast %318 : vector<1x1x64xf32> to vector<1x64xf32>
    %320 = vector.broadcast %319 : vector<1x64xf32> to vector<16x64xf32>
    %321 = arith.addf %317, %320 : vector<16x64xf32>
    %cst_126 = arith.constant 0.000000e+00 : f32
    %322 = vector.broadcast %cst_126 : f32 to vector<16x64xf32>
    %323 = arith.maximumf %321, %322 : vector<16x64xf32>
    %324 = arith.truncf %323 : vector<16x64xf32> to vector<16x64xbf16>
    %c0_127 = arith.constant 0 : index
    %c0_128 = arith.constant 0 : index
    %c0_129 = arith.constant 0 : index
    %325 = vector.load %arg23[%c0_127, %c0_128, %c0_129] : memref<1x64x32xbf16, #tpu.memory_space<vmem>>, vector<1x64x32xbf16>
    %326 = vector.shape_cast %325 : vector<1x64x32xbf16> to vector<64x32xbf16>
    %cst_130 = arith.constant dense<0.000000e+00> : vector<16x32xf32>
    %327 = tpu.matmul %324, %326, %cst_130 {dimension_numbers = #tpu.dot_dimension_numbers<[1], [0], [0], [1], [0, 0, 1, 1], [], []>} : vector<16x64xbf16>, vector<64x32xbf16>, vector<16x32xf32> -> vector<16x32xf32>
    %328 = arith.addf %289, %327 : vector<16x32xf32>
    %c0_131 = arith.constant 0 : index
    %c0_132 = arith.constant 0 : index
    %c0_133 = arith.constant 0 : index
    %329 = vector.load %arg24[%c0_131, %c0_132, %c0_133] : memref<1x1x32xf32, #tpu.memory_space<vmem>>, vector<1x1x32xf32>
    %330 = vector.shape_cast %329 : vector<1x1x32xf32> to vector<1x32xf32>
    %331 = vector.broadcast %330 : vector<1x32xf32> to vector<16x32xf32>
    %332 = arith.addf %328, %331 : vector<16x32xf32>
    %333 = vector.shape_cast %332 : vector<16x32xf32> to vector<2x8x32xf32>
    %c0_134 = arith.constant 0 : index
    %c0_135 = arith.constant 0 : index
    %c0_136 = arith.constant 0 : index
    %334 = vector.load %arg25[%c0_134, %c0_135, %c0_136] : memref<2x8x32xf32, #tpu.memory_space<vmem>>, vector<2x8x32xf32>
    tpu.vector_store %arg25[%c0_134, %c0_135, %c0_136], %333 {strides = array<i32>} : memref<2x8x32xf32, #tpu.memory_space<vmem>>, vector<2x8x32xf32>,
    return
  }
  func.func @transform_0(%arg0: i32) -> (i32, i32, i32) {
    %c0_i32 = arith.constant 0 : i32
    %c0_i32_0 = arith.constant 0 : i32
    %c0_i32_1 = arith.constant 0 : i32
    %c0_i32_2 = arith.constant 0 : i32
    return %c0_i32, %c0_i32_0, %c0_i32_1 : i32, i32, i32
  }
  func.func @transform_1(%arg0: i32) -> (i32, i32, i32) {
    %c0_i32 = arith.constant 0 : i32
    %c0_i32_0 = arith.constant 0 : i32
    %c0_i32_1 = arith.constant 0 : i32
    %c0_i32_2 = arith.constant 0 : i32
    return %c0_i32, %c0_i32_0, %c0_i32_1 : i32, i32, i32
  }
  func.func @transform_2(%arg0: i32) -> (i32, i32, i32) {
    %c0_i32 = arith.constant 0 : i32
    %c0_i32_0 = arith.constant 0 : i32
    %c0_i32_1 = arith.constant 0 : i32
    %c0_i32_2 = arith.constant 0 : i32
    return %c0_i32, %c0_i32_0, %c0_i32_1 : i32, i32, i32
  }
  func.func @transform_3(%arg0: i32) -> (i32, i32, i32) {
    %c0_i32 = arith.constant 0 : i32
    %c0_i32_0 = arith.constant 0 : i32
    %c0_i32_1 = arith.constant 0 : i32
    %c0_i32_2 = arith.constant 0 : i32
    return %c0_i32, %c0_i32_0, %c0_i32_1 : i32, i32, i32
  }
  func.func @transform_4(%arg0: i32) -> (i32, i32, i32) {
    %c0_i32 = arith.constant 0 : i32
    %c0_i32_0 = arith.constant 0 : i32
    %c0_i32_1 = arith.constant 0 : i32
    return %arg0, %c0_i32, %c0_i32_0 : i32, i32, i32
  }
  func.func @transform_5(%arg0: i32) -> (i32, i32, i32) {
    %c0_i32 = arith.constant 0 : i32
    %c0_i32_0 = arith.constant 0 : i32
    %c0_i32_1 = arith.constant 0 : i32
    return %arg0, %c0_i32, %c0_i32_0 : i32, i32, i32
  }
  func.func @transform_6(%arg0: i32) -> (i32, i32, i32) {
    %c0_i32 = arith.constant 0 : i32
    %c0_i32_0 = arith.constant 0 : i32
    %c0_i32_1 = arith.constant 0 : i32
    return %arg0, %c0_i32, %c0_i32_0 : i32, i32, i32
  }
  func.func @transform_7(%arg0: i32) -> (i32, i32, i32) {
    %c0_i32 = arith.constant 0 : i32
    %c0_i32_0 = arith.constant 0 : i32
    %c0_i32_1 = arith.constant 0 : i32
    return %arg0, %c0_i32, %c0_i32_0 : i32, i32, i32
  }
  func.func @transform_8(%arg0: i32) -> (i32, i32, i32) {
    %c0_i32 = arith.constant 0 : i32
    %c0_i32_0 = arith.constant 0 : i32
    %c0_i32_1 = arith.constant 0 : i32
    return %arg0, %c0_i32, %c0_i32_0 : i32, i32, i32
  }
  func.func @transform_9(%arg0: i32) -> (i32, i32, i32) {
    %c0_i32 = arith.constant 0 : i32
    %c0_i32_0 = arith.constant 0 : i32
    %c0_i32_1 = arith.constant 0 : i32
    return %arg0, %c0_i32, %c0_i32_0 : i32, i32, i32
  }
  func.func @transform_10(%arg0: i32) -> (i32, i32, i32) {
    %c0_i32 = arith.constant 0 : i32
    %c0_i32_0 = arith.constant 0 : i32
    %c0_i32_1 = arith.constant 0 : i32
    return %arg0, %c0_i32, %c0_i32_0 : i32, i32, i32
  }
  func.func @transform_11(%arg0: i32) -> (i32, i32, i32) {
    %c0_i32 = arith.constant 0 : i32
    %c0_i32_0 = arith.constant 0 : i32
    %c0_i32_1 = arith.constant 0 : i32
    return %arg0, %c0_i32, %c0_i32_0 : i32, i32, i32
  }
  func.func @transform_12(%arg0: i32) -> (i32, i32, i32) {
    %c0_i32 = arith.constant 0 : i32
    %c0_i32_0 = arith.constant 0 : i32
    %c0_i32_1 = arith.constant 0 : i32
    return %arg0, %c0_i32, %c0_i32_0 : i32, i32, i32
  }
  func.func @transform_13(%arg0: i32) -> (i32, i32, i32) {
    %c0_i32 = arith.constant 0 : i32
    %c0_i32_0 = arith.constant 0 : i32
    %c0_i32_1 = arith.constant 0 : i32
    return %arg0, %c0_i32, %c0_i32_0 : i32, i32, i32
  }
  func.func @transform_14(%arg0: i32) -> (i32, i32, i32) {
    %c0_i32 = arith.constant 0 : i32
    %c0_i32_0 = arith.constant 0 : i32
    %c0_i32_1 = arith.constant 0 : i32
    return %arg0, %c0_i32, %c0_i32_0 : i32, i32, i32
  }
  func.func @transform_15(%arg0: i32) -> (i32, i32, i32) {
    %c0_i32 = arith.constant 0 : i32
    %c0_i32_0 = arith.constant 0 : i32
    %c0_i32_1 = arith.constant 0 : i32
    return %arg0, %c0_i32, %c0_i32_0 : i32, i32, i32
  }
  func.func @transform_16(%arg0: i32) -> (i32, i32, i32) {
    %c0_i32 = arith.constant 0 : i32
    %c0_i32_0 = arith.constant 0 : i32
    %c0_i32_1 = arith.constant 0 : i32
    return %arg0, %c0_i32, %c0_i32_0 : i32, i32, i32
  }
  func.func @transform_17(%arg0: i32) -> (i32, i32, i32) {
    %c0_i32 = arith.constant 0 : i32
    %c0_i32_0 = arith.constant 0 : i32
    %c0_i32_1 = arith.constant 0 : i32
    return %arg0, %c0_i32, %c0_i32_0 : i32, i32, i32
  }
  func.func @transform_18(%arg0: i32) -> (i32, i32, i32) {
    %c0_i32 = arith.constant 0 : i32
    %c0_i32_0 = arith.constant 0 : i32
    %c0_i32_1 = arith.constant 0 : i32
    return %arg0, %c0_i32, %c0_i32_0 : i32, i32, i32
  }
  func.func @transform_19(%arg0: i32) -> (i32, i32, i32) {
    %c0_i32 = arith.constant 0 : i32
    %c0_i32_0 = arith.constant 0 : i32
    %c0_i32_1 = arith.constant 0 : i32
    return %arg0, %c0_i32, %c0_i32_0 : i32, i32, i32
  }
  func.func @transform_20(%arg0: i32) -> (i32, i32, i32) {
    %c0_i32 = arith.constant 0 : i32
    %c0_i32_0 = arith.constant 0 : i32
    %c0_i32_1 = arith.constant 0 : i32
    return %arg0, %c0_i32, %c0_i32_0 : i32, i32, i32
  }
  func.func @transform_21(%arg0: i32) -> (i32, i32, i32) {
    %c0_i32 = arith.constant 0 : i32
    %c0_i32_0 = arith.constant 0 : i32
    %c0_i32_1 = arith.constant 0 : i32
    return %arg0, %c0_i32, %c0_i32_0 : i32, i32, i32
  }
  func.func @transform_22(%arg0: i32) -> (i32, i32, i32) {
    %c0_i32 = arith.constant 0 : i32
    %c0_i32_0 = arith.constant 0 : i32
    %c0_i32_1 = arith.constant 0 : i32
    return %arg0, %c0_i32, %c0_i32_0 : i32, i32, i32
  }
  func.func @transform_23(%arg0: i32) -> (i32, i32, i32) {
    %c0_i32 = arith.constant 0 : i32
    %c0_i32_0 = arith.constant 0 : i32
    %c0_i32_1 = arith.constant 0 : i32
    return %arg0, %c0_i32, %c0_i32_0 : i32, i32, i32
  }
  func.func @transform_24(%arg0: i32) -> (i32, i32, i32) {
    %c0_i32 = arith.constant 0 : i32
    %c0_i32_0 = arith.constant 0 : i32
    %c0_i32_1 = arith.constant 0 : i32
    %c0_i32_2 = arith.constant 0 : i32
    return %c0_i32, %c0_i32_0, %c0_i32_1 : i32, i32, i32
  }
}

</mosaic_0001>

<bundles_post_ra>
// kernel: forward.5
= control target key start
LH: loop header
LB: loop body
LE: loop exit
PB: predicated region body
PF: predicated region fallthrough
CT: control target
= control target key end

     0   :  { %vm25_vm0 = vcmask 261120   ;;  %v216_v14 = vmov 0.0   ;;  %vm217_vm1 = vmmov 0   ;;  %s280_s0 = inlined_call_operand.vmem [shape: f32[16,32], index: 0, kind: input, shape index: {}]   ;;  %s281_s3 = inlined_call_operand.vmem [shape: bf16[32,128], index: 3, kind: input, shape index: {}]   ;;  %s282_s1 = inlined_call_operand.vmem [shape: f32[1,32], index: 1, kind: input, shape index: {}]   ;;  %s283_s2 = inlined_call_operand.vmem [shape: f32[1,32], index: 2, kind: input, shape index: {}]   ;;  %s284_s4 = inlined_call_operand.vmem [shape: f32[1,128], index: 4, kind: input, shape index: {}]   ;;  %s285_s5 = inlined_call_operand.vmem [shape: f32[16,128], index: 5, kind: output, shape index: {}]  }
   0x1   :  { %v21_v0 = vld [vmem:[%s280_s0] sm:$0xff]  ;;  %v22_v1 = vld [vmem:[%s280_s0 + $0x8] sm:$0xff]  ;;  %188 = vmatprep.subr.bf16.mxu0 %v216_v14  ;;  %192 = vmatprep.mubr.msk.bf16.mxu0 %vm217_vm1, %v216_v14 }
   0x2   :  { %v26_v2 = vsel %vm25_vm0, %v21_v0, 0.0  ;;  %v29_v3 = vsel %vm25_vm0, %v22_v1, 0.0  ;;  %v198_v15 = vld [vmem:[%s281_s3] sm:$0xff]   ;;  %v199_v16 = vld [vmem:[%s281_s3 + $0x8] sm:$0xff]  }
   0x3   :  { %27 = vadd.xlane.f32.xlu0 %v26_v2  ;;  %189 = vmatpush3.bf16.msra.mxu0 %v198_v15  ;;  %v179_v33 = vld [vmem:[%s282_s1] ss:$0 sm:$0xff] }
   0x4   :  { %190 = vmatprep.subr.bf16.mxu0 %v216_v14  ;;  %v180_v39 = vld [vmem:[%s283_s2] ss:$0 sm:$0xff] }
   0x5   :  { %v181_v44 = vld [vmem:[%s284_s4] ss:$0 sm:$0xff] }
   0x7   :  { %30 = vadd.xlane.f32.xlu0 %v29_v3  ;;  %191 = vmatpush3.bf16.msra.mxu0 %v199_v16 }
  0x90   :  { %v28_v4 = vpop.xlane.xlu0 %27 }
  0x91   :  { %v33_v5 = vmul.f32 0.03125, %v28_v4 }
  0x93   :  { %v35_v6 = vsub.f32 %v21_v0, %v33_v5 }
  0x94   :  { %v31_v7 = vpop.xlane.xlu0 %30 }
  0x95   :  { %v34_v8 = vmul.f32 0.03125, %v31_v7  ;;  %v37_v9 = vmul.f32 %v35_v6, %v35_v6  ;;  %v53_v35 = vmul.f32 %v179_v33, %v35_v6 }
  0x97   :  { %v36_v10 = vsub.f32 %v22_v1, %v34_v8  ;;  %v39_v11 = vsel %vm25_vm0, %v37_v9, 0.0 }
  0x98   :  { %40 = vadd.xlane.f32.xlu1 %v39_v11 }
  0x99   :  { %v38_v12 = vmul.f32 %v36_v10, %v36_v10  ;;  %v54_v36 = vmul.f32 %v179_v33, %v36_v10 }
  0x9b   :  { %v42_v13 = vsel %vm25_vm0, %v38_v12, 0.0 }
  0x9c   :  { %43 = vadd.xlane.f32.xlu1 %v42_v13 }
 0x125   :  { %v41_v17 = vpop.xlane.xlu1 %40 }
 0x126   :  { %v45_v18 = vmul.f32 0.032258064, %v41_v17 }
 0x128   :  { %200 = vrsqrt.f32 %v45_v18  ;;  %vm57_vm2 = vcmp.eq.f32.partialorder %v45_v18, inf  ;;  %v60_v23 = vand.u32 2147483648, %v45_v18  ;;  %vm59_vm3 = vcmp.eq.f32.partialorder %v45_v18, 0.0 }
 0x129   :  { %v44_v19 = vpop.xlane.xlu1 %43 }
 0x12a   :  { %v46_v20 = vmul.f32 0.032258064, %v44_v19 }
 0x12c   :  { %202 = vrsqrt.f32 %v46_v20  ;;  %vm64_vm4 = vcmp.eq.f32.partialorder %v46_v20, inf  ;;  %v67_v29 = vand.u32 2147483648, %v46_v20  ;;  %vm66_vm5 = vcmp.eq.f32.partialorder %v46_v20, 0.0 }
 0x132   :  { %v201_v21 = vpop.eup %200 }
 0x133   :  { %v56_v22 = vmul.f32 %v201_v21, %v45_v18 }
 0x135   :  { %v58_v24 = vsel %vm57_vm2, %v45_v18, %v56_v22 }
 0x136   :  { %v203_v25 = vpop.eup %202  ;;  %v61_v26 = vsel %vm59_vm3, %v60_v23, %v58_v24 }
 0x137   :  { %v69_v27 = vadd.f32 1e-06, %v61_v26  ;;  %v63_v28 = vmul.f32 %v203_v25, %v46_v20 }
 0x139   :  { %204 = vrcp.f32 %v69_v27  ;;  %v65_v30 = vsel %vm64_vm4, %v46_v20, %v63_v28 }
 0x13a   :  { %v68_v31 = vsel %vm66_vm5, %v67_v29, %v65_v30 }
 0x13b   :  { %v70_v32 = vadd.f32 1e-06, %v68_v31 }
 0x13d   :  { %206 = vrcp.f32 %v70_v32 }
 0x143   :  { %v205_v34 = vpop.eup %204 }
 0x144   :  { %v72_v37 = vmul.f32 %v205_v34, %v53_v35 }
 0x146   :  { %v81_v41 = vadd.f32 %v180_v39, %v72_v37 }
 0x147   :  { %v207_v38 = vpop.eup %206 }
 0x148   :  { %v74_v40 = vmul.f32 %v207_v38, %v54_v36 }
 0x14a   :  { %v82_v42 = vadd.f32 %v180_v39, %v74_v40 }
 0x14c   :  { %v83_v43 = vpack.c.bf16 %v82_v42, %v81_v41 }
 0x14e   :  { %193 = vmatmul.mubr.msk.bf16.vlgmr.msra.gmra.mrb[0].mxu0 %vm25_vm0, %v83_v43 }
 0x221   :  { %v144_v45 = vpop.f32.mrb[0].mxu0 }
 0x222   :  { %v145_v46 = vadd.f32 %v181_v44, %v144_v45  ;;  %v194_v47 = vpop.f32.mrb[1].mxu0 }
 0x223   :  { %v147_v48 = vpop.f32.mrb[2].mxu0 }
 0x224   :  { %v148_v49 = vadd.f32 %v181_v44, %v147_v48  ;;  %151 = vmax.xlane.f32.xlu0 %v145_v46  ;;  %v195_v50 = vpop.f32.mrb[3].mxu0 }
 0x226   :  { %153 = vmax.xlane.f32.xlu1 %v148_v49 }
 0x2b1   :  { %v152_v51 = vpop.xlane.xlu0 %151 }
 0x2b2   :  { %v155_v52 = vsub.f32 %v145_v46, %v152_v51 }
 0x2b3   :  { %v154_v53 = vpop.xlane.xlu1 %153 }
 0x2b4   :  { %v157_v54 = vmul.f32 1.442695, %v155_v52  ;;  %v156_v55 = vsub.f32 %v148_v49, %v154_v53 }
 0x2b6   :  { %208 = vpow2.f32 %v157_v54  ;;  %v159_v56 = vmul.f32 1.442695, %v156_v55 }
 0x2b8   :  { %210 = vpow2.f32 %v159_v56 }
 0x2c0   :  { %v209_v57 = vpop.eup %208 }
 0x2c1   :  { %161 = vadd.xlane.f32.xlu0 %v209_v57 }
 0x2c2   :  { %v211_v58 = vpop.eup %210 }
 0x2c3   :  { %163 = vadd.xlane.f32.xlu1 %v211_v58 }
 0x34e   :  { %v162_v59 = vpop.xlane.xlu0 %161 }
 0x34f   :  { %212 = vlog2.f32 %v162_v59 }
 0x350   :  { %v164_v60 = vpop.xlane.xlu1 %163 }
 0x351   :  { %214 = vlog2.f32 %v164_v60 }
 0x359   :  { %v213_v61 = vpop.eup %212 }
 0x35a   :  { %v166_v62 = vmul.f32 0.6931472, %v213_v61 }
 0x35b   :  { %v215_v63 = vpop.eup %214 }
 0x35c   :  { %v169_v0 = vadd.f32 %v166_v62, %v152_v51  ;;  %v168_v1 = vmul.f32 0.6931472, %v215_v63 }
 0x35e   :  { %v171_v2 = vsub.f32 %v145_v46, %v169_v0  ;;  %v170_v3 = vadd.f32 %v168_v1, %v154_v53 }
 0x360   :  { %173 = vst [vmem:[%s285_s5] sm:$0xff] %v171_v2  ;;  %v172_v4 = vsub.f32 %v148_v49, %v170_v3 }
 0x362   :  { %174 = vst [vmem:[%s285_s5 + $0x8] sm:$0xff] %v172_v4 }

// kernel: forward.3
= control target key start
LH: loop header
LB: loop body
LE: loop exit
PB: predicated region body
PF: predicated region fallthrough
CT: control target
= control target key end

     0   :  { %s2705_s21 = smov 0   ;;  %s3087_s0 = inlined_call_operand.vmem [shape: f32[2,8,32], index: 0, kind: input, shape index: {}]   ;;  %s3088_s1 = inlined_call_operand.vmem [shape: s32[2,1,8], index: 1, kind: input, shape index: {}]   ;;  %s3089_s2 = inlined_call_operand.vmem [shape: f32[2,1,32], index: 2, kind: input, shape index: {}]   ;;  %s3090_s3 = inlined_call_operand.vmem [shape: f32[2,1,32], index: 3, kind: input, shape index: {}]   ;;  %s3091_s4 = inlined_call_operand.vmem [shape: bf16[2,32,96], index: 4, kind: input, shape index: {}]   ;;  %s3092_s5 = inlined_call_operand.vmem [shape: f32[2,1,96], index: 5, kind: input, shape index: {}]   ;;  %s3093_s6 = inlined_call_operand.vmem [shape: bf16[2,32,32], index: 6, kind: input, shape index: {}]   ;;  %s3094_s7 = inlined_call_operand.vmem [shape: f32[2,1,32], index: 7, kind: input, shape index: {}]   ;;  %s3095_s8 = inlined_call_operand.vmem [shape: f32[2,1,32], index: 8, kind: input, shape index: {}]   ;;  %s3096_s9 = inlined_call_operand.vmem [shape: f32[2,1,32], index: 9, kind: input, shape index: {}]   ;;  %s3097_s10 = inlined_call_operand.vmem [shape: bf16[2,32,64], index: 10, kind: input, shape index: {}]   ;;  %s3098_s11 = inlined_call_operand.vmem [shape: f32[2,1,64], index: 11, kind: input, shape index: {}]   ;;  %s3099_s12 = inlined_call_operand.vmem [shape: bf16[2,64,32], index: 12, kind: input, shape index: {}]   ;;  %s3100_s13 = inlined_call_operand.vmem [shape: f32[2,1,32], index: 13, kind: input, shape index: {}]   ;;  %s3101_s14 = inlined_call_operand.vmem [shape: f32[1,32], index: 14, kind: input, shape index: {}]   ;;  %s3102_s15 = inlined_call_operand.vmem [shape: f32[1,32], index: 15, kind: input, shape index: {}]   ;;  %s3103_s16 = inlined_call_operand.vmem [shape: f32[2,8,32], index: 16, kind: output, shape index: {}]  }
   0x1   :  { %3108 = sst [smem:[#allocation4_spill]] %s3087_s0 }
   0x2   :  { %3109 = sst [smem:[#allocation5_spill]] %s3088_s1 }
   0x3   :  { %3110 = sst [smem:[#allocation6_spill]] %s3091_s4 }
   0x4   :  { %3111 = sst [smem:[#allocation7_spill]] %s3093_s6 }
   0x5   :  { %3112 = sst [smem:[#allocation8_spill]] %s3101_s14 }
   0x6   :  { %3113 = sst [smem:[#allocation9_spill]] %s3102_s15 }
   0x7 LB: > { %3114 = sst [smem:[#allocation2_spill]] %s2602_s21  ;;  %s2711_s22 = sadd.s32 4294967295, %s2602_s21   ;;  %s2602_s21 = sphi %s2705_s21, %s26_s21  }
   0x8   : > { %p2255_p0 = scmp.ge.s32.totalorder %s2602_s21, 1  ;;  %p551_p1 = scmp.lt.s32.totalorder %s2602_s21, 3 }
   0xa   : > { %p552_p2 = pnand %p2255_p0, %p551_p1 }
   0xc   : > { %555 = sbr.rel (%p552_p2) target bundleno = 4513 (0x11a1), region = 84 }
  0x13   : > { %p635_p3 = scmp.lt.s32.totalorder %s2711_s22, 1  ;;  %s3115_s4 = sld [smem:[#allocation6_spill]] }
  0x14   : > { %s3116_s6 = sld [smem:[#allocation7_spill]]  ;;  %p2264_p4 = scmp.ne.s32.totalorder %s2711_s22, 0 }
  0x15   : > { %s2717_s23 = scalar_select %p635_p3, %s2711_s22, 1 }
  0x16   : > { %683 = sbr.rel (%p2264_p4) target bundleno = 30 (0x1e), region = 88  ;;  %s3118_s19 = sld [smem:[#allocation4_spill]] (!%p2264_p4)  ;;  %vm686_vm0 = vcmask (!%p2264_p4), 261120  }
  0x17   : > { %s2309_s30 = sshll.u32 %s2717_s23, 4  ;;  %s659_s1 = scalar_lea.vmem %s3095_s8, %s2717_s23 }
  0x18   : > { %s662_s18 = scalar_lea.vmem %s3096_s9, %s2717_s23  ;;  %s678_s0 = scalar_lea.vmem %s3100_s13, %s2717_s23 }
  0x19   : > { %s2735_s24 = scalar_lea.vmem %s3115_s4, %s2309_s30  ;;  %s2757_s4 = scalar_lea.vmem %s3097_s10, %s2309_s30 }
  0x1a   : > { %s2740_s15 = scalar_lea.vmem %s3116_s6, %s2309_s30  ;;  %s670_s6 = scalar_lea.vmem %s3098_s11, %s2717_s23 }
  0x1b   : > { %3117 = sst [smem:[#allocation3_spill]] %s2740_s15  ;;  %s2312_s15 = sshll.u32 %s2717_s23, 5 }
  0x1c   : > { %s2767_s27 = scalar_lea.vmem %s3099_s12, %s2312_s15  ;;  %v684_v0 = vld [vmem:[%s3118_s19] sm:$0xff] (!%p2264_p4)  ;;  %v685_v1 = vld [vmem:[%s3118_s19 + $0x8] sm:$0xff] (!%p2264_p4) }
  0x1d   : > { %687 = vst.msk [vmem:[%s3103_s16] sm:$0xff] %vm686_vm0, %v684_v0  ;;  %688 = vst.msk [vmem:[%s3103_s16 + $0x8] sm:$0xff] %vm686_vm0, %v685_v1 }
  0x1e PF: > { %vm699_vm1 = vcmask 261120   ;;  %v2530_v16 = vld [vmem:[%s2735_s24] sm:$0xff]   ;;  %v2604_v17 = vmov 0.0   ;;  %vm2605_vm2 = vmmov 0   ;;  %v2531_v18 = vld [vmem:[%s2735_s24 + $0x8] sm:$0xff]   ;;  %s3119_s21 = scalar_lea.vmem %s3089_s2, %s2717_s23  ;;  %s3120_s15 = scalar_lea.vmem %s3090_s3, %s2717_s23  ;;  %vm846_vm7 = vcmask 64512  }
  0x1f   : > { %2359 = vmatprep.subr.bf16.mxu0 %v2604_v17  ;;  %2363 = vmatprep.mubr.msk.bf16.mxu0 %vm2605_vm2, %v2604_v17  ;;  %v2265_v35 = vld [vmem:[%s3119_s21] ss:$0 sm:$0xff]  ;;  %s3121_s28 = scalar_lea.vmem %s3092_s5, %s2717_s23  ;;  %s2606_s17 = smov 96   ;;  %v829_v63 = vlaneseq  ;;  %vm971_vm10 = vcmask 1043456   ;;  %vm1751_vm11 = vcmask 130048   ;;  %vm1754_vm12 = vcmask 195584  }
  0x20   : > { %2360 = vmatpush3.bf16.msra.mxu0 %v2530_v16  ;;  %2367 = vmatprep.subr.bf16.mxu1 %v2604_v17  ;;  %v2266_v41 = vld [vmem:[%s3120_s15] ss:$0 sm:$0xff]  ;;  %s3122_s20 = sld [smem:[#allocation5_spill]]  ;;  %s2607_s14 = smov 64  }
  0x21   : > { %2361 = vmatprep.subr.bf16.mxu0 %v2604_v17  ;;  %2369 = vmatprep.mubr.msk.bf16.mxu1 %vm2605_vm2, %v2604_v17  ;;  %v2267_v46 = vld [vmem:[%s3121_s28] ss:$0 sm:$0xff]  ;;  %v830_v1 = vshrl.u32 %v829_v63, 7  ;;  %s2608_s15 = smov 88   ;;  %s2609_s26 = smov 120  }
  0x22   : > { %s2610_s29 = smov 56   ;;  %s2611_s28 = smov 80  }
  0x23   : > { %s2613_s30 = smov 48   ;;  %s2614_s24 = smov 72  }
  0x24   : > { %v2789_v2 = vld [vmem:[%s3103_s16] sm:$0xff]  ;;  %v2794_v3 = vld [vmem:[%s3103_s16 + $0x8] sm:$0xff]  ;;  %2362 = vmatpush3.bf16.msra.mxu0 %v2531_v18  ;;  %s2615_s21 = smov 104   ;;  %s2616_s25 = smov 40  }
  0x25   : > { %v700_v4 = vsel %vm699_vm1, %v2789_v2, 0.0  ;;  %v703_v5 = vsel %vm699_vm1, %v2794_v3, 0.0  ;;  %2373 = vmatprep.subr.bf16.mxu0 %v2604_v17  ;;  %p2303_p5 = scmp.ge.s32.totalorder %s2711_s22, 1 }
  0x26   : > { %701 = vadd.xlane.f32.xlu0 %v700_v4  ;;  %v691_v0 = vld [vmem:[%s3122_s20] sm:$0x1]  ;;  %v692_v4 = vld [vmem:[%s3122_s20 + $0x1] sm:$0x1] }
  0x27   : > { %vm693_vm8 = vcmp.eq.s32.totalorder %v691_v0, 0  ;;  %vm694_vm9 = vcmp.eq.s32.totalorder %v692_v4, 0 }
  0x2a   : > { %704 = vadd.xlane.f32.xlu0 %v703_v5  ;;  %v831_v5 = vsub.s32 0, %v830_v1 }
  0xb3   : > { %v702_v6 = vpop.xlane.xlu0 %701 }
  0xb4   : > { %v707_v7 = vmul.f32 0.03125, %v702_v6  ;;  %v695_v6 = vsel %vm693_vm8, -1e+09, %v2604_v17 }
  0xb6   : > { %v709_v8 = vsub.f32 %v2789_v2, %v707_v7  ;;  %v696_v7 = vsel %vm694_vm9, -1e+09, %v2604_v17 }
  0xb7   : > { %v705_v9 = vpop.xlane.xlu0 %704 }
  0xb8   : > { %v708_v10 = vmul.f32 0.03125, %v705_v9  ;;  %v711_v11 = vmul.f32 %v709_v8, %v709_v8  ;;  %v727_v37 = vmul.f32 %v2265_v35, %v709_v8  ;;  %v2862_v8 = vrot.slane %v695_v6, %v831_v5 }
  0xb9   : > { %v2864_v9 = vrot.slane %v696_v7, %v831_v5 }
  0xba   : > { %v710_v12 = vsub.f32 %v2794_v3, %v708_v10  ;;  %v713_v13 = vsel %vm699_vm1, %v711_v11, 0.0 }
  0xbb   : > { %714 = vadd.xlane.f32.xlu1 %v713_v13 }
  0xbc   : > { %v712_v14 = vmul.f32 %v710_v12, %v710_v12  ;;  %v728_v38 = vmul.f32 %v2265_v35, %v710_v12 }
  0xbe   : > { %v716_v15 = vsel %vm699_vm1, %v712_v14, 0.0 }
  0xbf   : > { %717 = vadd.xlane.f32.xlu1 %v716_v15 }
 0x148   : > { %v715_v19 = vpop.xlane.xlu1 %714 }
 0x149   : > { %v719_v20 = vmul.f32 0.032258064, %v715_v19 }
 0x14b   : > { %2540 = vrsqrt.f32 %v719_v20  ;;  %vm731_vm3 = vcmp.eq.f32.partialorder %v719_v20, inf  ;;  %v734_v25 = vand.u32 2147483648, %v719_v20  ;;  %vm733_vm4 = vcmp.eq.f32.partialorder %v719_v20, 0.0 }
 0x14c   : > { %v718_v21 = vpop.xlane.xlu1 %717 }
 0x14d   : > { %v720_v22 = vmul.f32 0.032258064, %v718_v21 }
 0x14f   : > { %2542 = vrsqrt.f32 %v720_v22  ;;  %vm738_vm5 = vcmp.eq.f32.partialorder %v720_v22, inf  ;;  %v741_v31 = vand.u32 2147483648, %v720_v22  ;;  %vm740_vm6 = vcmp.eq.f32.partialorder %v720_v22, 0.0 }
 0x155   : > { %v2541_v23 = vpop.eup %2540 }
 0x156   : > { %v730_v24 = vmul.f32 %v2541_v23, %v719_v20 }
 0x158   : > { %v732_v26 = vsel %vm731_vm3, %v719_v20, %v730_v24 }
 0x159   : > { %v2543_v27 = vpop.eup %2542  ;;  %v735_v28 = vsel %vm733_vm4, %v734_v25, %v732_v26 }
 0x15a   : > { %v743_v29 = vadd.f32 1e-06, %v735_v28  ;;  %v737_v30 = vmul.f32 %v2543_v27, %v720_v22 }
 0x15c   : > { %2544 = vrcp.f32 %v743_v29  ;;  %v739_v32 = vsel %vm738_vm5, %v720_v22, %v737_v30 }
 0x15d   : > { %v742_v33 = vsel %vm740_vm6, %v741_v31, %v739_v32 }
 0x15e   : > { %v744_v34 = vadd.f32 1e-06, %v742_v33 }
 0x160   : > { %2546 = vrcp.f32 %v744_v34 }
 0x166   : > { %v2545_v36 = vpop.eup %2544 }
 0x167   : > { %v746_v39 = vmul.f32 %v2545_v36, %v727_v37 }
 0x169   : > { %v755_v43 = vadd.f32 %v2266_v41, %v746_v39 }
 0x16a   : > { %v2547_v40 = vpop.eup %2546 }
 0x16b   : > { %v748_v42 = vmul.f32 %v2547_v40, %v728_v38 }
 0x16d   : > { %v756_v44 = vadd.f32 %v2266_v41, %v748_v42 }
 0x16f   : > { %v757_v45 = vpack.c.bf16 %v756_v44, %v755_v43 }
 0x171   : > { %2364 = vmatmul.mubr.msk.bf16.vlgmr.msra.gmra.mrb[0].mxu0 %vm699_vm1, %v757_v45 }
 0x172   : > { %2375 = vmatprep.mubr.msk.bf16.mxu0 %vm2605_vm2, %v2604_v17 }
 0x244   : > { %v818_v47 = vpop.f32.mrb[0].mxu0 }
 0x245   : > { %v819_v48 = vadd.f32 %v2267_v46, %v818_v47  ;;  %v2365_v49 = vpop.f32.mrb[1].mxu0 }
 0x246   : > { %v821_v50 = vpop.f32.mrb[2].mxu0 }
 0x247   : > { %v2832_v51 = vpack.c.bf16 %v819_v48, %v819_v48  ;;  %v822_v52 = vadd.f32 %v2267_v46, %v821_v50  ;;  %v2366_v53 = vpop.f32.mrb[3].mxu0  ;;  %v825_v58 = vmul.f32 0.35355338, %v819_v48 }
 0x249   : > { %v2834_v54 = vpack.c.bf16 %v822_v52, %v822_v52  ;;  %844 = vrot.lane.b32.xlu0 %v2832_v51, %s2606_s17  ;;  %v826_v60 = vmul.f32 0.35355338, %v822_v52  ;;  %v2842_v61 = vpack.c.bf16 %v825_v58, %v825_v58 }
 0x24b   : > { %894 = vrot.lane.b32.xlu1 %v2834_v54, %s2606_s17  ;;  %v2844_v62 = vpack.c.bf16 %v826_v60, %v826_v60  ;;  %s2612_s17 = smov 112  }
 0x2bb   : > { %v845_v55 = vpop.permute.xlu0 %844 }
 0x2bc   : > { %v851_v56 = vsel %vm846_vm7, %v845_v55, 0 }
 0x2bd   : > { %2368 = vmatpush3.bf16.xpose.msra.mxu1 %v851_v56  ;;  %v895_v57 = vpop.permute.xlu1 %894 }
 0x2be   : > { %v900_v59 = vsel %vm846_vm7, %v895_v57, 0  ;;  %2379 = vmatprep.subr.bf16.mxu1 %v2604_v17 }
 0x2bf   : > { %2374 = vmatpush3.bf16.xpose.msra.mxu0 %v900_v59 }
 0x2c0   : > { %2385 = vmatprep.subr.bf16.mxu0 %v2604_v17 }
 0x2c4   : > { %2370 = vmatmul.mubr.msk.bf16.vlgmr.msra.gmra.mrb[0].mxu1 %vm846_vm7, %v2842_v61 }
 0x2c5   : > { %2381 = vmatprep.mubr.msk.bf16.mxu1 %vm2605_vm2, %v2604_v17 }
 0x2c6   : > { %2376 = vmatmul.mubr.msk.bf16.vlgmr.msra.gmra.mrb[4].mxu0 %vm846_vm7, %v2844_v62 }
 0x2c7   : > { %2387 = vmatprep.mubr.msk.bf16.mxu0 %vm2605_vm2, %v2604_v17 }
 0x397   : > { %v887_v10 = vpop.f32.mrb[0].mxu1 }
 0x398   : > { %v888_v11 = vadd.f32 %v887_v10, %v2862_v8  ;;  %v2371_v12 = vpop.f32.mrb[1].mxu1 }
 0x399   : > { %v890_v13 = vpop.f32.mrb[2].mxu1  ;;  %v936_v14 = vpop.f32.mrb[4].mxu0 }
 0x39a   : > { %v937_v15 = vadd.f32 %v936_v14, %v2864_v9  ;;  %v2372_v16 = vpop.f32.mrb[3].mxu1  ;;  %v2377_v18 = vpop.f32.mrb[5].mxu0  ;;  %v942_v19 = vsel %vm846_vm7, %v888_v11, -inf }
 0x39b   : > { %943 = vmax.xlane.f32.xlu1 %v942_v19  ;;  %v939_v20 = vpop.f32.mrb[6].mxu0 }
 0x39c   : > { %v2378_v21 = vpop.f32.mrb[7].mxu0  ;;  %v945_v22 = vsel %vm846_vm7, %v937_v15, -inf }
 0x39d   : > { %946 = vmax.xlane.f32.xlu0 %v945_v22 }
 0x3ac   : > { %1015 = vrot.lane.b32.xlu1 %v2834_v54, %s2607_s14 }
 0x3b0   : > { %1066 = vrot.lane.b32.xlu1 %v2832_v51, %s2608_s15 }
 0x428   : > { %v944_v23 = vpop.xlane.xlu1 %943 }
 0x429   : > { %v948_v24 = vsub.f32 %v888_v11, %v944_v23 }
 0x42a   : > { %v947_v25 = vpop.xlane.xlu0 %946 }
 0x42b   : > { %v950_v26 = vmul.f32 1.442695, %v948_v24  ;;  %v949_v27 = vsub.f32 %v937_v15, %v947_v25 }
 0x42c   : > { %v1016_v28 = vpop.permute.xlu1 %1015 }
 0x42d   : > { %2548 = vpow2.f32 %v950_v26  ;;  %v952_v29 = vmul.f32 1.442695, %v949_v27  ;;  %v1021_v30 = vsel %vm971_vm10, %v1016_v28, 0 }
 0x42e   : > { %2386 = vmatpush3.bf16.msra.mxu0 %v1021_v30 }
 0x42f   : > { %2550 = vpow2.f32 %v952_v29  ;;  %2397 = vmatprep.subr.bf16.mxu0 %v2604_v17 }
 0x430   : > { %v1067_v35 = vpop.permute.xlu1 %1066 }
 0x431   : > { %v1072_v46 = vsel %vm846_vm7, %v1067_v35, 0 }
 0x437   : > { %v2549_v31 = vpop.eup %2548 }
 0x438   : > { %v954_v32 = vsel %vm846_vm7, %v2549_v31, 0.0 }
 0x439   : > { %v2551_v33 = vpop.eup %2550  ;;  %955 = vadd.xlane.f32.xlu0 %v954_v32 }
 0x43a   : > { %v957_v34 = vsel %vm846_vm7, %v2551_v33, 0.0 }
 0x43b   : > { %958 = vadd.xlane.f32.xlu1 %v957_v34 }
 0x44c   : > { %1117 = vrot.lane.b32.xlu1 %v2834_v54, %s2608_s15  ;;  %s2618_s15 = smov 16  }
 0x44f   : > { %966 = vrot.lane.b32.xlu0 %v2832_v51, %s2607_s14  ;;  %s2617_s14 = smov 8  }
 0x450   : > { %1115 = vrot.lane.b32.xlu1 %v2844_v62, %s2609_s26 }
 0x453   : > { %1064 = vrot.lane.b32.xlu0 %v2842_v61, %s2609_s26  ;;  %s3123_s26 = sld [smem:[#allocation3_spill]] }
 0x4c6   : > { %v956_v36 = vpop.xlane.xlu0 %955 }
 0x4c7   : > { %2552 = vrcp.f32 %v956_v36 }
 0x4c8   : > { %v959_v37 = vpop.xlane.xlu1 %958 }
 0x4c9   : > { %2554 = vrcp.f32 %v959_v37 }
 0x4ca   : > { %v967_v38 = vpop.permute.xlu0 %966 }
 0x4cb   : > { %v973_v39 = vsel %vm971_vm10, %v967_v38, 0 }
 0x4cc   : > { %2380 = vmatpush3.bf16.msra.mxu1 %v973_v39  ;;  %v1118_v45 = vpop.permute.xlu1 %1117 }
 0x4cd   : > { %2391 = vmatprep.subr.bf16.mxu1 %v2604_v17  ;;  %v1123_v48 = vsel %vm846_vm7, %v1118_v45, 0 }
 0x4ce   : > { %v1065_v49 = vpop.permute.xlu0 %1064 }
 0x4d0   : > { %v1116_v50 = vpop.permute.xlu1 %1115 }
 0x4d1   : > { %v2553_v40 = vpop.eup %2552 }
 0x4d2   : > { %v962_v41 = vmul.f32 %v2553_v40, %v2549_v31 }
 0x4d3   : > { %v2555_v42 = vpop.eup %2554 }
 0x4d4   : > { %v963_v43 = vmul.f32 %v2555_v42, %v2551_v33  ;;  %v964_v44 = vpack.c.bf16 %v962_v41, %v962_v41 }
 0x4d6   : > { %2382 = vmatmul.mubr.msk.bf16.vlgmr.msra.gmra.mrb[4].mxu1 %vm846_vm7, %v964_v44  ;;  %v965_v47 = vpack.c.bf16 %v963_v43, %v963_v43 }
 0x4d7   : > { %2392 = vmatpush3.bf16.xpose.msra.mxu1 %v1072_v46  ;;  %2393 = vmatprep.mubr.msk.bf16.mxu1 %vm2605_vm2, %v2604_v17 }
 0x4d8   : > { %2388 = vmatmul.mubr.msk.bf16.vlgmr.msra.gmra.mrb[8].mxu0 %vm846_vm7, %v965_v47  ;;  %2403 = vmatprep.subr.bf16.mxu1 %v2604_v17 }
 0x4d9   : > { %2398 = vmatpush3.bf16.xpose.msra.mxu0 %v1123_v48  ;;  %2399 = vmatprep.mubr.msk.bf16.mxu0 %vm2605_vm2, %v2604_v17 }
 0x4da   : > { %2409 = vmatprep.subr.bf16.mxu0 %v2604_v17 }
 0x4de   : > { %2394 = vmatmul.mubr.msk.bf16.vlgmr.msra.gmra.mrb[8].mxu1 %vm846_vm7, %v1065_v49 }
 0x4df   : > { %2405 = vmatprep.mubr.msk.bf16.mxu1 %vm2605_vm2, %v2604_v17 }
 0x4e0   : > { %2400 = vmatmul.mubr.msk.bf16.vlgmr.msra.gmra.mrb[12].mxu0 %vm846_vm7, %v1116_v50 }
 0x4e1   : > { %2411 = vmatprep.mubr.msk.bf16.mxu0 %vm2605_vm2, %v2604_v17 }
 0x5a9   : > { %v2898_v52 = vpop.f32.mrb[4].mxu1 }
 0x5aa   : > { %v2383_v53 = vpop.f32.mrb[5].mxu1 }
 0x5ab   : > { %v1012_v55 = vpop.f32.mrb[6].mxu1  ;;  %v2900_v56 = vpop.f32.mrb[8].mxu0 }
 0x5ac   : > { %v2384_v57 = vpop.f32.mrb[7].mxu1  ;;  %v2389_v58 = vpop.f32.mrb[9].mxu0 }
 0x5ad   : > { %v1060_v59 = vpop.f32.mrb[10].mxu0 }
 0x5ae   : > { %v2390_v60 = vpop.f32.mrb[11].mxu0 }
 0x5b1   : > { %v1108_v63 = vpop.f32.mrb[8].mxu1 }
 0x5b2   : > { %v1109_v0 = vadd.f32 %v1108_v63, %v2862_v8  ;;  %v2395_v1 = vpop.f32.mrb[9].mxu1 }
 0x5b3   : > { %v1111_v4 = vpop.f32.mrb[10].mxu1  ;;  %v1159_v5 = vpop.f32.mrb[12].mxu0 }
 0x5b4   : > { %v1160_v6 = vadd.f32 %v1159_v5, %v2864_v9  ;;  %v2396_v7 = vpop.f32.mrb[11].mxu1  ;;  %v2401_v10 = vpop.f32.mrb[13].mxu0  ;;  %v1165_v11 = vsel %vm846_vm7, %v1109_v0, -inf }
 0x5b5   : > { %1166 = vmax.xlane.f32.xlu0 %v1165_v11  ;;  %v1162_v12 = vpop.f32.mrb[14].mxu0 }
 0x5b6   : > { %v2402_v13 = vpop.f32.mrb[15].mxu0  ;;  %v1168_v14 = vsel %vm846_vm7, %v1160_v6, -inf }
 0x5b7   : > { %1169 = vmax.xlane.f32.xlu1 %v1168_v14 }
 0x5c8   : > { %1237 = vrot.lane.b32.xlu1 %v2834_v54, %s2610_s29 }
 0x5cc   : > { %1287 = vrot.lane.b32.xlu1 %v2832_v51, %s2611_s28 }
 0x5d0   : > { %1337 = vrot.lane.b32.xlu1 %v2834_v54, %s2611_s28 }
 0x5d4   : > { %1335 = vrot.lane.b32.xlu1 %v2844_v62, %s2612_s17 }
 0x642   : > { %v1167_v15 = vpop.xlane.xlu0 %1166 }
 0x643   : > { %v1171_v16 = vsub.f32 %v1109_v0, %v1167_v15 }
 0x644   : > { %v1170_v18 = vpop.xlane.xlu1 %1169 }
 0x645   : > { %v1173_v19 = vmul.f32 1.442695, %v1171_v16  ;;  %v1172_v20 = vsub.f32 %v1160_v6, %v1170_v18 }
 0x647   : > { %2556 = vpow2.f32 %v1173_v19  ;;  %v1175_v21 = vmul.f32 1.442695, %v1172_v20 }
 0x648   : > { %v1238_v22 = vpop.permute.xlu1 %1237 }
 0x649   : > { %2558 = vpow2.f32 %v1175_v21  ;;  %v1243_v23 = vsel %vm971_vm10, %v1238_v22, 0 }
 0x64a   : > { %2410 = vmatpush3.bf16.msra.mxu0 %v1243_v23 }
 0x64b   : > { %2421 = vmatprep.subr.bf16.mxu0 %v2604_v17 }
 0x64c   : > { %v1288_v33 = vpop.permute.xlu1 %1287 }
 0x64d   : > { %v1293_v39 = vsel %vm846_vm7, %v1288_v33, 0 }
 0x650   : > { %v1338_v38 = vpop.permute.xlu1 %1337 }
 0x651   : > { %v2557_v24 = vpop.eup %2556  ;;  %v1343_v41 = vsel %vm846_vm7, %v1338_v38, 0 }
 0x652   : > { %v1177_v25 = vsel %vm846_vm7, %v2557_v24, 0.0 }
 0x653   : > { %v2559_v26 = vpop.eup %2558  ;;  %1178 = vadd.xlane.f32.xlu0 %v1177_v25 }
 0x654   : > { %v1180_v27 = vsel %vm846_vm7, %v2559_v26, 0.0  ;;  %v1336_v43 = vpop.permute.xlu1 %1335 }
 0x657   : > { %1181 = vadd.xlane.f32.xlu0 %v1180_v27 }
 0x66d   : > { %1189 = vrot.lane.b32.xlu0 %v2832_v51, %s2610_s29  ;;  %s2619_s29 = smov 24  }
 0x671   : > { %1285 = vrot.lane.b32.xlu0 %v2842_v61, %s2612_s17 }
 0x6e0   : > { %v1179_v28 = vpop.xlane.xlu0 %1178 }
 0x6e1   : > { %2560 = vrcp.f32 %v1179_v28 }
 0x6e4   : > { %v1182_v29 = vpop.xlane.xlu0 %1181 }
 0x6e5   : > { %2562 = vrcp.f32 %v1182_v29 }
 0x6e8   : > { %v1190_v30 = vpop.permute.xlu0 %1189 }
 0x6e9   : > { %v1195_v31 = vsel %vm971_vm10, %v1190_v30, 0 }
 0x6ea   : > { %2404 = vmatpush3.bf16.msra.mxu1 %v1195_v31 }
 0x6eb   : > { %v2561_v32 = vpop.eup %2560  ;;  %2415 = vmatprep.subr.bf16.mxu1 %v2604_v17 }
 0x6ec   : > { %v1185_v34 = vmul.f32 %v2561_v32, %v2557_v24  ;;  %v1286_v42 = vpop.permute.xlu0 %1285 }
 0x6ee   : > { %v1187_v35 = vpack.c.bf16 %v1185_v34, %v1185_v34 }
 0x6ef   : > { %v2563_v36 = vpop.eup %2562 }
 0x6f0   : > { %v1186_v37 = vmul.f32 %v2563_v36, %v2559_v26  ;;  %2406 = vmatmul.mubr.msk.bf16.vlgmr.msra.gmra.mrb[12].mxu1 %vm846_vm7, %v1187_v35 }
 0x6f1   : > { %2417 = vmatprep.mubr.msk.bf16.mxu1 %vm2605_vm2, %v2604_v17 }
 0x6f2   : > { %v1188_v40 = vpack.c.bf16 %v1186_v37, %v1186_v37 }
 0x6f3   : > { %2416 = vmatpush3.bf16.xpose.msra.mxu1 %v1293_v39 }
 0x6f4   : > { %2412 = vmatmul.mubr.msk.bf16.vlgmr.msra.gmra.mrb[16].mxu0 %vm846_vm7, %v1188_v40  ;;  %2427 = vmatprep.subr.bf16.mxu1 %v2604_v17 }
 0x6f5   : > { %2422 = vmatpush3.bf16.xpose.msra.mxu0 %v1343_v41  ;;  %2423 = vmatprep.mubr.msk.bf16.mxu0 %vm2605_vm2, %v2604_v17 }
 0x6f6   : > { %2433 = vmatprep.subr.bf16.mxu0 %v2604_v17 }
 0x6fa   : > { %2418 = vmatmul.mubr.msk.bf16.vlgmr.msra.gmra.mrb[16].mxu1 %vm846_vm7, %v1286_v42 }
 0x6fb   : > { %2429 = vmatprep.mubr.msk.bf16.mxu1 %vm2605_vm2, %v2604_v17 }
 0x6fc   : > { %2424 = vmatmul.mubr.msk.bf16.vlgmr.msra.gmra.mrb[20].mxu0 %vm846_vm7, %v1336_v43 }
 0x6fd   : > { %2435 = vmatprep.mubr.msk.bf16.mxu0 %vm2605_vm2, %v2604_v17 }
 0x7c3   : > { %v2934_v44 = vpop.f32.mrb[12].mxu1 }
 0x7c4   : > { %v2407_v45 = vpop.f32.mrb[13].mxu1 }
 0x7c5   : > { %v1234_v46 = vpop.f32.mrb[14].mxu1 }
 0x7c6   : > { %v2408_v47 = vpop.f32.mrb[15].mxu1 }
 0x7c7   : > { %v2936_v48 = vpop.f32.mrb[16].mxu0 }
 0x7c8   : > { %v2515_v49 = vpack.i.bf16 %v2936_v48, %v2934_v44  ;;  %v2413_v50 = vpop.f32.mrb[17].mxu0 }
 0x7c9   : > { %v1282_v53 = vpop.f32.mrb[18].mxu0 }
 0x7ca   : > { %v2414_v55 = vpop.f32.mrb[19].mxu0 }
 0x7cd   : > { %v1329_v57 = vpop.f32.mrb[16].mxu1 }
 0x7ce   : > { %v1330_v58 = vadd.f32 %v1329_v57, %v2862_v8  ;;  %v2419_v59 = vpop.f32.mrb[17].mxu1 }
 0x7cf   : > { %v1332_v60 = vpop.f32.mrb[18].mxu1  ;;  %v1379_v63 = vpop.f32.mrb[20].mxu0 }
 0x7d0   : > { %v1380_v0 = vadd.f32 %v1379_v63, %v2864_v9  ;;  %v2420_v1 = vpop.f32.mrb[19].mxu1  ;;  %v2425_v4 = vpop.f32.mrb[21].mxu0  ;;  %v1385_v5 = vsel %vm846_vm7, %v1330_v58, -inf }
 0x7d1   : > { %1386 = vmax.xlane.f32.xlu0 %v1385_v5  ;;  %v1382_v6 = vpop.f32.mrb[22].mxu0 }
 0x7d2   : > { %v2426_v7 = vpop.f32.mrb[23].mxu0  ;;  %v1388_v10 = vsel %vm846_vm7, %v1380_v0, -inf }
 0x7d3   : > { %1389 = vmax.xlane.f32.xlu1 %v1388_v10 }
 0x7e4   : > { %1457 = vrot.lane.b32.xlu1 %v2834_v54, %s2613_s30 }
 0x7e8   : > { %1507 = vrot.lane.b32.xlu1 %v2832_v51, %s2614_s24 }
 0x7ec   : > { %1557 = vrot.lane.b32.xlu1 %v2834_v54, %s2614_s24 }
 0x7f0   : > { %1555 = vrot.lane.b32.xlu1 %v2844_v62, %s2615_s21 }
 0x85e   : > { %v1387_v11 = vpop.xlane.xlu0 %1386 }
 0x85f   : > { %v1391_v12 = vsub.f32 %v1330_v58, %v1387_v11 }
 0x860   : > { %v1390_v13 = vpop.xlane.xlu1 %1389 }
 0x861   : > { %v1393_v14 = vmul.f32 1.442695, %v1391_v12  ;;  %v1392_v15 = vsub.f32 %v1380_v0, %v1390_v13 }
 0x863   : > { %2564 = vpow2.f32 %v1393_v14  ;;  %v1395_v16 = vmul.f32 1.442695, %v1392_v15 }
 0x864   : > { %v1458_v18 = vpop.permute.xlu1 %1457 }
 0x865   : > { %2566 = vpow2.f32 %v1395_v16  ;;  %v1463_v19 = vsel %vm971_vm10, %v1458_v18, 0 }
 0x866   : > { %2434 = vmatpush3.bf16.msra.mxu0 %v1463_v19 }
 0x867   : > { %2445 = vmatprep.subr.bf16.mxu0 %v2604_v17 }
 0x868   : > { %v1508_v28 = vpop.permute.xlu1 %1507 }
 0x86c   : > { %v1558_v33 = vpop.permute.xlu1 %1557 }
 0x86d   : > { %v2565_v20 = vpop.eup %2564  ;;  %v1563_v35 = vsel %vm846_vm7, %v1558_v33, 0 }
 0x86e   : > { %v1397_v21 = vsel %vm846_vm7, %v2565_v20, 0.0 }
 0x86f   : > { %v2567_v22 = vpop.eup %2566  ;;  %1398 = vadd.xlane.f32.xlu0 %v1397_v21 }
 0x870   : > { %v1400_v62 = vsel %vm846_vm7, %v2567_v22, 0.0  ;;  %v1556_v37 = vpop.permute.xlu1 %1555 }
 0x873   : > { %1401 = vadd.xlane.f32.xlu0 %v1400_v62 }
 0x889   : > { %1409 = vrot.lane.b32.xlu0 %v2832_v51, %s2613_s30  ;;  %s3124_s30 = scalar_lea.vmem %s3094_s7, %s2717_s23 }
 0x88d   : > { %1505 = vrot.lane.b32.xlu0 %v2842_v61, %s2615_s21  ;;  %v1513_v61 = vsel %vm846_vm7, %v1508_v28, 0 }
 0x8fc   : > { %v1399_v23 = vpop.xlane.xlu0 %1398 }
 0x8fd   : > { %2568 = vrcp.f32 %v1399_v23  ;;  %v2532_v23 = vld [vmem:[%s3123_s26] sm:$0xff]  }
 0x900   : > { %v1402_v24 = vpop.xlane.xlu0 %1401 }
 0x901   : > { %2570 = vrcp.f32 %v1402_v24  ;;  %v2533_v24 = vld [vmem:[%s3123_s26 + $0x8] sm:$0xff]  }
 0x904   : > { %v1410_v25 = vpop.permute.xlu0 %1409 }
 0x905   : > { %v1415_v26 = vsel %vm971_vm10, %v1410_v25, 0 }
 0x906   : > { %2428 = vmatpush3.bf16.msra.mxu1 %v1415_v26 }
 0x907   : > { %v2569_v27 = vpop.eup %2568  ;;  %2439 = vmatprep.subr.bf16.mxu1 %v2604_v17 }
 0x908   : > { %v1405_v29 = vmul.f32 %v2569_v27, %v2565_v20  ;;  %v1506_v36 = vpop.permute.xlu0 %1505 }
 0x90a   : > { %v1407_v30 = vpack.c.bf16 %v1405_v29, %v1405_v29 }
 0x90b   : > { %v2571_v31 = vpop.eup %2570 }
 0x90c   : > { %v1406_v32 = vmul.f32 %v2571_v31, %v2567_v22  ;;  %2430 = vmatmul.mubr.msk.bf16.vlgmr.msra.gmra.mrb[20].mxu1 %vm846_vm7, %v1407_v30 }
 0x90d   : > { %2441 = vmatprep.mubr.msk.bf16.mxu1 %vm2605_vm2, %v2604_v17 }
 0x90e   : > { %v1408_v34 = vpack.c.bf16 %v1406_v32, %v1406_v32 }
 0x90f   : > { %2440 = vmatpush3.bf16.xpose.msra.mxu1 %v1513_v61 }
 0x910   : > { %2436 = vmatmul.mubr.msk.bf16.vlgmr.msra.gmra.mrb[24].mxu0 %vm846_vm7, %v1408_v34  ;;  %2451 = vmatprep.subr.bf16.mxu1 %v2604_v17 }
 0x911   : > { %2446 = vmatpush3.bf16.xpose.msra.mxu0 %v1563_v35  ;;  %2447 = vmatprep.mubr.msk.bf16.mxu0 %vm2605_vm2, %v2604_v17 }
 0x912   : > { %2457 = vmatprep.subr.bf16.mxu0 %v2604_v17 }
 0x916   : > { %2442 = vmatmul.mubr.msk.bf16.vlgmr.msra.gmra.mrb[24].mxu1 %vm846_vm7, %v1506_v36 }
 0x917   : > { %2453 = vmatprep.mubr.msk.bf16.mxu1 %vm2605_vm2, %v2604_v17 }
 0x918   : > { %2448 = vmatmul.mubr.msk.bf16.vlgmr.msra.gmra.mrb[28].mxu0 %vm846_vm7, %v1556_v37 }
 0x919   : > { %2459 = vmatprep.mubr.msk.bf16.mxu0 %vm2605_vm2, %v2604_v17 }
 0x9df   : > { %v1451_v38 = vpop.f32.mrb[20].mxu1 }
 0x9e0   : > { %v2431_v39 = vpop.f32.mrb[21].mxu1 }
 0x9e1   : > { %v1454_v40 = vpop.f32.mrb[22].mxu1 }
 0x9e2   : > { %v2432_v41 = vpop.f32.mrb[23].mxu1 }
 0x9e3   : > { %v1499_v42 = vpop.f32.mrb[24].mxu0 }
 0x9e4   : > { %v2520_v43 = vpack.i.bf16 %v1499_v42, %v1451_v38  ;;  %v2437_v45 = vpop.f32.mrb[25].mxu0 }
 0x9e5   : > { %v1502_v46 = vpop.f32.mrb[26].mxu0 }
 0x9e6   : > { %v2438_v47 = vpop.f32.mrb[27].mxu0 }
 0x9e9   : > { %v1549_v50 = vpop.f32.mrb[24].mxu1 }
 0x9ea   : > { %v1550_v53 = vadd.f32 %v1549_v50, %v2862_v8  ;;  %v2443_v55 = vpop.f32.mrb[25].mxu1 }
 0x9eb   : > { %v1552_v57 = vpop.f32.mrb[26].mxu1  ;;  %v1599_v58 = vpop.f32.mrb[28].mxu0 }
 0x9ec   : > { %v1600_v59 = vadd.f32 %v1599_v58, %v2864_v9  ;;  %v2444_v60 = vpop.f32.mrb[27].mxu1  ;;  %v2449_v63 = vpop.f32.mrb[29].mxu0  ;;  %v1605_v0 = vsel %vm846_vm7, %v1550_v53, -inf }
 0x9ed   : > { %1606 = vmax.xlane.f32.xlu0 %v1605_v0  ;;  %v1602_v1 = vpop.f32.mrb[30].mxu0 }
 0x9ee   : > { %v2450_v4 = vpop.f32.mrb[31].mxu0  ;;  %v1608_v5 = vsel %vm846_vm7, %v1600_v59, -inf }
 0x9ef   : > { %1609 = vmax.xlane.f32.xlu1 %v1608_v5 }
 0xa00   : > { %1677 = vrot.lane.b32.xlu1 %v2834_v54, %s2616_s25 }
 0xa04   : > { %2516 = vrot.lane.b32.xlu1 %v2515_v49, %s2617_s14 }
 0xa08   : > { %2521 = vrot.lane.b32.xlu1 %v2520_v43, %s2618_s15 }
 0xa7a   : > { %v1607_v8 = vpop.xlane.xlu0 %1606 }
 0xa7b   : > { %v1611_v9 = vsub.f32 %v1550_v53, %v1607_v8 }
 0xa7c   : > { %v1610_v6 = vpop.xlane.xlu1 %1609 }
 0xa7d   : > { %v1613_v7 = vmul.f32 1.442695, %v1611_v9  ;;  %v1612_v10 = vsub.f32 %v1600_v59, %v1610_v6 }
 0xa7f   : > { %2572 = vpow2.f32 %v1613_v7  ;;  %v1615_v11 = vmul.f32 1.442695, %v1612_v10 }
 0xa80   : > { %v1678_v12 = vpop.permute.xlu1 %1677 }
 0xa81   : > { %2574 = vpow2.f32 %v1615_v11  ;;  %v1683_v13 = vsel %vm971_vm10, %v1678_v12, 0 }
 0xa82   : > { %2458 = vmatpush3.bf16.msra.mxu0 %v1683_v13  ;;  %v2534_v13 = vld [vmem:[%s2757_s4] sm:$0xff]  }
 0xa83   : > { %2471 = vmatprep.subr.bf16.mxu0 %v2604_v17 }
 0xa84   : > { %v2517_v61 = vpop.permute.xlu1 %2516 }
 0xa85   : > { %v2519_v35 = vunpack.i.h.bf16 %v2517_v61  ;;  %v2518_v36 = vunpack.i.l.bf16 %v2517_v61  ;;  %v2292_v61 = vld [vmem:[%s662_s18] ss:$0 sm:$0xff] }
 0xa87   : > { %v1750_v40 = vsel %vm846_vm7, %v2900_v56, %v2519_v35  ;;  %v1749_v41 = vsel %vm846_vm7, %v2898_v52, %v2518_v36  ;;  %v2290_v56 = vld [vmem:[%s3124_s30] ss:$0 sm:$0xff] }
 0xa88   : > { %v2522_v34 = vpop.permute.xlu1 %2521 }
 0xa89   : > { %v2573_v54 = vpop.eup %2572  ;;  %v2524_v37 = vunpack.i.h.bf16 %v2522_v34  ;;  %v2523_v38 = vunpack.i.l.bf16 %v2522_v34 }
 0xa8a   : > { %v1617_v44 = vsel %vm846_vm7, %v2573_v54, 0.0 }
 0xa8b   : > { %v2575_v48 = vpop.eup %2574  ;;  %1618 = vadd.xlane.f32.xlu0 %v1617_v44  ;;  %v1752_v45 = vsel %vm1751_vm11, %v1749_v41, %v2523_v38  ;;  %v1753_v46 = vsel %vm1751_vm11, %v1750_v40, %v2524_v37  ;;  %v2536_v44 = vld [vmem:[%s2767_s27] sm:$0xff]   ;;  %v2538_v38 = vld [vmem:[%s2767_s27 + $0x10] sm:$0xff]  }
 0xa8c   : > { %v1620_v49 = vsel %vm846_vm7, %v2575_v48, 0.0  ;;  %v2293_v40 = vld [vmem:[%s670_s6] ss:$0 sm:$0xff] }
 0xa8f   : > { %1621 = vadd.xlane.f32.xlu0 %v1620_v49 }
 0xaa5   : > { %1629 = vrot.lane.b32.xlu0 %v2832_v51, %s2616_s25 }
 0xb18   : > { %v1619_v14 = vpop.xlane.xlu0 %1618 }
 0xb19   : > { %2576 = vrcp.f32 %v1619_v14 }
 0xb1c   : > { %v1622_v15 = vpop.xlane.xlu0 %1621 }
 0xb1d   : > { %2578 = vrcp.f32 %v1622_v15 }
 0xb20   : > { %v1630_v16 = vpop.permute.xlu0 %1629 }
 0xb21   : > { %v1635_v18 = vsel %vm971_vm10, %v1630_v16, 0 }
 0xb22   : > { %2452 = vmatpush3.bf16.msra.mxu1 %v1635_v18 }
 0xb23   : > { %v2577_v19 = vpop.eup %2576  ;;  %2463 = vmatprep.subr.bf16.mxu1 %v2604_v17 }
 0xb24   : > { %v1625_v20 = vmul.f32 %v2577_v19, %v2573_v54  ;;  %v2535_v54 = vld [vmem:[%s2757_s4 + $0x8] sm:$0xff]  }
 0xb26   : > { %v1627_v21 = vpack.c.bf16 %v1625_v20, %v1625_v20 }
 0xb27   : > { %v2579_v22 = vpop.eup %2578 }
 0xb28   : > { %v1626_v62 = vmul.f32 %v2579_v22, %v2575_v48  ;;  %2454 = vmatmul.mubr.msk.bf16.vlgmr.msra.gmra.mrb[28].mxu1 %vm846_vm7, %v1627_v21  ;;  %v2537_v48 = vld [vmem:[%s2767_s27 + $0x8] sm:$0xff]  }
 0xb29   : > { %2467 = vmatprep.mubr.msk.bf16.mxu1 %vm2605_vm2, %v2604_v17  ;;  %2464 = vmatpush3.bf16.msra.mxu1 %v2532_v23 }
 0xb2a   : > { %v1628_v51 = vpack.c.bf16 %v1626_v62, %v1626_v62  ;;  %2465 = vmatprep.subr.bf16.mxu1 %v2604_v17 }
 0xb2c   : > { %2460 = vmatmul.mubr.msk.bf16.vlgmr.msra.gmra.mrb[32].mxu0 %vm846_vm7, %v1628_v51 }
 0xb2d   : > { %2475 = vmatprep.mubr.msk.bf16.mxu0 %vm2605_vm2, %v2604_v17  ;;  %2466 = vmatpush3.bf16.msra.mxu1 %v2533_v24 }
 0xb2e   : > { %2479 = vmatprep.subr.bf16.mxu1 %v2604_v17  ;;  %2472 = vmatpush3.bf16.msra.mxu0 %v2534_v13 }
 0xb2f   : > { %2473 = vmatprep.subr.bf16.mxu0 %v2604_v17 }
 0xb32   : > { %2474 = vmatpush3.bf16.msra.mxu0 %v2535_v54 }
 0xbfb   : > { %v1671_v25 = vpop.f32.mrb[28].mxu1 }
 0xbfc   : > { %v2455_v26 = vpop.f32.mrb[29].mxu1 }
 0xbfd   : > { %v1674_v27 = vpop.f32.mrb[30].mxu1 }
 0xbfe   : > { %v2456_v28 = vpop.f32.mrb[31].mxu1 }
 0xbff   : > { %v1719_v29 = vpop.f32.mrb[32].mxu0  ;;  %v2291_v28 = vld [vmem:[%s659_s1] ss:$0 sm:$0xff] }
 0xc00   : > { %v2525_v30 = vpack.i.bf16 %v1719_v29, %v1671_v25  ;;  %v2461_v31 = vpop.f32.mrb[33].mxu0 }
 0xc01   : > { %v1722_v32 = vpop.f32.mrb[34].mxu0 }
 0xc02   : > { %2526 = vrot.lane.b32.xlu0 %v2525_v30, %s2619_s29  ;;  %v2462_v33 = vpop.f32.mrb[35].mxu0 }
 0xc74   : > { %v2527_v39 = vpop.permute.xlu0 %2526 }
 0xc75   : > { %v2529_v42 = vunpack.i.h.bf16 %v2527_v39  ;;  %v2528_v43 = vunpack.i.l.bf16 %v2527_v39  ;;  %v2539_v39 = vld [vmem:[%s2767_s27 + $0x18] sm:$0xff]  }
 0xc77   : > { %v1756_v47 = vsel %vm1754_vm12, %v1753_v46, %v2529_v42  ;;  %v1755_v50 = vsel %vm1754_vm12, %v1752_v45, %v2528_v43 }
 0xc78   : > { %v1757_v53 = vpack.c.bf16 %v1756_v47, %v1755_v50 }
 0xc7a   : > { %2468 = vmatmul.mubr.msk.bf16.vlgmr.msra.gmra.mrb[32].mxu1 %vm699_vm1, %v1757_v53 }
 0xc7b   : > { %2487 = vmatprep.mubr.msk.bf16.mxu1 %vm2605_vm2, %v2604_v17  ;;  %2480 = vmatpush3.bf16.msra.mxu1 %v2536_v44  ;;  %vm1990_vm2 = vcmask 523264  }
 0xc7c   : > { %2481 = vmatprep.subr.bf16.mxu1 %v2604_v17 }
 0xc7f   : > { %2482 = vmatpush3.bf16.msra.mxu1 %v2537_v48 }
 0xc80   : > { %2483 = vmatprep.subr.bf16.mxu1 %v2604_v17 }
 0xc83   : > { %2484 = vmatpush3.bf16.msra.mxu1 %v2538_v38 }
 0xc84   : > { %2485 = vmatprep.subr.bf16.mxu1 %v2604_v17 }
 0xc87   : > { %2486 = vmatpush3.bf16.msra.mxu1 %v2539_v39 }
 0xd4d   : > { %v1811_v55 = vpop.f32.mrb[32].mxu1 }
 0xd4e   : > { %v1818_v52 = vadd.f32 %v1811_v55, %v2789_v2  ;;  %v2469_v57 = vpop.f32.mrb[33].mxu1 }
 0xd4f   : > { %v1814_v58 = vpop.f32.mrb[34].mxu1 }
 0xd50   : > { %v3010_v59 = vadd.f32 %v2290_v56, %v1818_v52  ;;  %v1819_v60 = vadd.f32 %v1814_v58, %v2794_v3  ;;  %v2470_v63 = vpop.f32.mrb[35].mxu1 }
 0xd52   : > { %v3013_v0 = vadd.f32 %v2290_v56, %v1819_v60  ;;  %v1831_v1 = vsel %vm699_vm1, %v3010_v59, 0.0  ;;  %v2302_v56 = vld [vmem:[%s678_s0] ss:$0 sm:$0xff] }
 0xd53   : > { %1832 = vadd.xlane.f32.xlu1 %v1831_v1 }
 0xd54   : > { %v1834_v4 = vsel %vm699_vm1, %v3013_v0, 0.0 }
 0xd55   : > { %1835 = vadd.xlane.f32.xlu0 %v1834_v4 }
 0xde0   : > { %v1833_v2 = vpop.xlane.xlu1 %1832 }
 0xde1   : > { %v1837_v5 = vmul.f32 0.03125, %v1833_v2 }
 0xde2   : > { %v1836_v8 = vpop.xlane.xlu0 %1835 }
 0xde3   : > { %v1839_v9 = vsub.f32 %v3010_v59, %v1837_v5  ;;  %v1838_v3 = vmul.f32 0.03125, %v1836_v8 }
 0xde5   : > { %v1840_v6 = vsub.f32 %v3013_v0, %v1838_v3  ;;  %v1841_v7 = vmul.f32 %v1839_v9, %v1839_v9  ;;  %v1857_v30 = vmul.f32 %v2291_v28, %v1839_v9 }
 0xde7   : > { %v1843_v10 = vsel %vm699_vm1, %v1841_v7, 0.0  ;;  %v1842_v11 = vmul.f32 %v1840_v6, %v1840_v6  ;;  %v1858_v31 = vmul.f32 %v2291_v28, %v1840_v6 }
 0xde8   : > { %1844 = vadd.xlane.f32.xlu0 %v1843_v10 }
 0xde9   : > { %v1846_v12 = vsel %vm699_vm1, %v1842_v11, 0.0 }
 0xdec   : > { %1847 = vadd.xlane.f32.xlu0 %v1846_v12 }
 0xe75   : > { %v1845_v49 = vpop.xlane.xlu0 %1844 }
 0xe76   : > { %v1849_v14 = vmul.f32 0.032258064, %v1845_v49 }
 0xe78   : > { %2580 = vrsqrt.f32 %v1849_v14  ;;  %vm1861_vm13 = vcmp.eq.f32.partialorder %v1849_v14, inf  ;;  %v1864_v20 = vand.u32 2147483648, %v1849_v14  ;;  %vm1863_vm14 = vcmp.eq.f32.partialorder %v1849_v14, 0.0 }
 0xe79   : > { %v1848_v15 = vpop.xlane.xlu0 %1847 }
 0xe7a   : > { %v1850_v16 = vmul.f32 0.032258064, %v1848_v15 }
 0xe7c   : > { %2582 = vrsqrt.f32 %v1850_v16  ;;  %vm1868_vm15 = vcmp.eq.f32.partialorder %v1850_v16, inf  ;;  %v1871_v24 = vand.u32 2147483648, %v1850_v16  ;;  %vm1870_vm0 = vcmp.eq.f32.partialorder %v1850_v16, 0.0 }
 0xe82   : > { %v2581_v18 = vpop.eup %2580 }
 0xe83   : > { %v1860_v19 = vmul.f32 %v2581_v18, %v1849_v14 }
 0xe85   : > { %v1862_v21 = vsel %vm1861_vm13, %v1849_v14, %v1860_v19 }
 0xe86   : > { %v2583_v22 = vpop.eup %2582  ;;  %v1865_v62 = vsel %vm1863_vm14, %v1864_v20, %v1862_v21 }
 0xe87   : > { %v1873_v51 = vadd.f32 1e-06, %v1865_v62  ;;  %v1867_v23 = vmul.f32 %v2583_v22, %v1850_v16 }
 0xe89   : > { %2584 = vrcp.f32 %v1873_v51  ;;  %v1869_v25 = vsel %vm1868_vm15, %v1850_v16, %v1867_v23 }
 0xe8a   : > { %v1872_v26 = vsel %vm1870_vm0, %v1871_v24, %v1869_v25 }
 0xe8b   : > { %v1874_v27 = vadd.f32 1e-06, %v1872_v26 }
 0xe8d   : > { %2586 = vrcp.f32 %v1874_v27 }
 0xe93   : > { %v2585_v29 = vpop.eup %2584 }
 0xe94   : > { %v1876_v32 = vmul.f32 %v2585_v29, %v1857_v30 }
 0xe96   : > { %v1885_v35 = vadd.f32 %v2292_v61, %v1876_v32 }
 0xe97   : > { %v2587_v33 = vpop.eup %2586 }
 0xe98   : > { %v1878_v34 = vmul.f32 %v2587_v33, %v1858_v31 }
 0xe9a   : > { %v1886_v36 = vadd.f32 %v2292_v61, %v1878_v34 }
 0xe9c   : > { %v1887_v37 = vpack.c.bf16 %v1886_v36, %v1885_v35 }
 0xe9e   : > { %2476 = vmatmul.mubr.msk.bf16.vlgmr.msra.gmra.mrb[36].mxu0 %vm699_vm1, %v1887_v37 }
 0xf71   : > { %v1948_v41 = vpop.f32.mrb[36].mxu0 }
 0xf72   : > { %v1949_v42 = vadd.f32 %v2293_v40, %v1948_v41  ;;  %v2477_v43 = vpop.f32.mrb[37].mxu0 }
 0xf73   : > { %v1951_v45 = vpop.f32.mrb[38].mxu0 }
 0xf74   : > { %v1952_v46 = vadd.f32 %v2293_v40, %v1951_v45  ;;  %v2478_v47 = vpop.f32.mrb[39].mxu0  ;;  %v1955_v50 = vmax.f32 %v1949_v42, 0.0 }
 0xf76   : > { %v1956_v53 = vmax.f32 %v1952_v46, 0.0 }
 0xf78   : > { %v1957_v55 = vpack.c.bf16 %v1956_v53, %v1955_v50 }
 0xf7a   : > { %2488 = vmatmul.mubr.msk.bf16.vlgmr.msra.gmra.mrb[36].mxu1 %vm1990_vm2, %v1957_v55 }
0x104c   : > { %2049 = sbr.rel (%p2303_p5) target bundleno = 4181 (0x1055), region = 92 }
0x104d   : > { %v2028_v17 = vpop.f32.mrb[36].mxu1 }
0x104e   : > { %v2035_v52 = vadd.f32 %v2028_v17, %v3010_v59  ;;  %v2489_v57 = vpop.f32.mrb[37].mxu1 }
0x104f   : > { %v2031_v58 = vpop.f32.mrb[38].mxu1 }
0x1050   : > { %v2044_v60 = vadd.f32 %v2302_v56, %v2035_v52  ;;  %v2036_v63 = vadd.f32 %v2031_v58, %v3013_v0  ;;  %v2490_v1 = vpop.f32.mrb[39].mxu1 }
0x1052   : > { %v2045_v4 = vadd.f32 %v2302_v56, %v2036_v63  ;;  %2050 = vst.msk [vmem:[%s3103_s16] sm:$0xff] (!%p2303_p5), %vm699_vm1, %v2044_v60 }
0x1054   : > { %2051 = vst.msk [vmem:[%s3103_s16 + $0x8] sm:$0xff] %vm699_vm1, %v2045_v4 }
0x1055 PF: > { %p2304_p6 = scmp.ne.s32.totalorder %s2711_s22, 1 }
0x1056   : > { %v2058_v59 = vsel (!%p2304_p6), %vm699_vm1, %v2044_v60, 0.0  ;;  %v2061_v0 = vsel (!%p2304_p6), %vm699_vm1, %v2045_v4, 0.0  ;;  %s3125_s29 = sld [smem:[#allocation8_spill]] (!%p2304_p6)  ;;  %s3126_s30 = sld [smem:[#allocation9_spill]] (!%p2304_p6) }
0x1057   : > { %2055 = sbr.rel (%p2304_p6) target bundleno = 4513 (0x11a1), region = 96  ;;  %2059 = vadd.xlane.f32.xlu0 (!%p2304_p6), %v2058_v59 }
0x105b   : > { %2062 = vadd.xlane.f32.xlu0 (!%p2304_p6), %v2061_v0 }
0x105c   : > { %v2305_v24 = vld [vmem:[%s3125_s29] ss:$0 sm:$0xff] (!%p2304_p6) }
0x105d   : > { %v2306_v27 = vld [vmem:[%s3126_s30] ss:$0 sm:$0xff] (!%p2304_p6) }
0x10e4   : > { %v2060_v2 = vpop.xlane.xlu0 %2059 }
0x10e5   : > { %v2064_v5 = vmul.f32 0.03125, %v2060_v2 }
0x10e7   : > { %v2066_v8 = vsub.f32 %v2044_v60, %v2064_v5 }
0x10e8   : > { %v2063_v9 = vpop.xlane.xlu0 %2062 }
0x10e9   : > { %v2065_v3 = vmul.f32 0.03125, %v2063_v9  ;;  %v2068_v6 = vmul.f32 %v2066_v8, %v2066_v8  ;;  %v2084_v25 = vmul.f32 %v2305_v24, %v2066_v8 }
0x10eb   : > { %v2067_v7 = vsub.f32 %v2045_v4, %v2065_v3  ;;  %v2070_v10 = vsel %vm699_vm1, %v2068_v6, 0.0 }
0x10ec   : > { %2071 = vadd.xlane.f32.xlu1 %v2070_v10 }
0x10ed   : > { %v2069_v11 = vmul.f32 %v2067_v7, %v2067_v7  ;;  %v2085_v29 = vmul.f32 %v2305_v24, %v2067_v7 }
0x10ef   : > { %v2073_v12 = vsel %vm699_vm1, %v2069_v11, 0.0 }
0x10f0   : > { %2074 = vadd.xlane.f32.xlu1 %v2073_v12 }
0x1179   : > { %v2072_v13 = vpop.xlane.xlu1 %2071 }
0x117a   : > { %v2076_v54 = vmul.f32 0.032258064, %v2072_v13 }
0x117c   : > { %2588 = vrsqrt.f32 %v2076_v54  ;;  %vm2088_vm3 = vcmp.eq.f32.partialorder %v2076_v54, inf  ;;  %v2091_v15 = vand.u32 2147483648, %v2076_v54  ;;  %vm2090_vm4 = vcmp.eq.f32.partialorder %v2076_v54, 0.0 }
0x117d   : > { %v2075_v44 = vpop.xlane.xlu1 %2074 }
0x117e   : > { %v2077_v48 = vmul.f32 0.032258064, %v2075_v44 }
0x1180   : > { %2590 = vrsqrt.f32 %v2077_v48  ;;  %vm2095_vm5 = vcmp.eq.f32.partialorder %v2077_v48, inf  ;;  %v2098_v22 = vand.u32 2147483648, %v2077_v48  ;;  %vm2097_vm6 = vcmp.eq.f32.partialorder %v2077_v48, 0.0 }
0x1186   : > { %v2589_v49 = vpop.eup %2588 }
0x1187   : > { %v2087_v14 = vmul.f32 %v2589_v49, %v2076_v54 }
0x1189   : > { %v2089_v16 = vsel %vm2088_vm3, %v2076_v54, %v2087_v14 }
0x118a   : > { %v2591_v18 = vpop.eup %2590  ;;  %v2092_v19 = vsel %vm2090_vm4, %v2091_v15, %v2089_v16 }
0x118b   : > { %v2100_v20 = vadd.f32 1e-06, %v2092_v19  ;;  %v2094_v21 = vmul.f32 %v2591_v18, %v2077_v48 }
0x118d   : > { %2592 = vrcp.f32 %v2100_v20  ;;  %v2096_v62 = vsel %vm2095_vm5, %v2077_v48, %v2094_v21 }
0x118e   : > { %v2099_v51 = vsel %vm2097_vm6, %v2098_v22, %v2096_v62 }
0x118f   : > { %v2101_v23 = vadd.f32 1e-06, %v2099_v51 }
0x1191   : > { %2594 = vrcp.f32 %v2101_v23 }
0x1197   : > { %v2593_v26 = vpop.eup %2592 }
0x1198   : > { %v2103_v28 = vmul.f32 %v2593_v26, %v2084_v25 }
0x119a   : > { %v2112_v30 = vadd.f32 %v2306_v27, %v2103_v28 }
0x119b   : > { %v2595_v31 = vpop.eup %2594 }
0x119c   : > { %2114 = vst.msk [vmem:[%s3103_s16] sm:$0xff] %vm699_vm1, %v2112_v30  ;;  %v2105_v32 = vmul.f32 %v2595_v31, %v2085_v29 }
0x119e   : > { %v2113_v33 = vadd.f32 %v2306_v27, %v2105_v32 }
0x11a0   : > { %2115 = vst.msk [vmem:[%s3103_s16 + $0x8] sm:$0xff] %vm699_vm1, %v2113_v33 }
0x11a1 PF: > { %s3127_s1 = sld [smem:[#allocation2_spill]] }
0x11a7   : > { %s26_s21 = sadd.s32 1, %s3127_s1  }
0x11a8   : > { %p23_p7 = scmp.ge.s32.totalorder %s26_s21, 4  }
0x11aa   :  { %25 = sbr.rel (!%p23_p7) target bundleno = 7 (0x7), region = 155 }

// kernel: forward.4
= control target key start
LH: loop header
LB: loop body
LE: loop exit
PB: predicated region body
PF: predicated region fallthrough
CT: control target
= control target key end

     0   :  { %s5215_s0 = inlined_call_operand.vmem [shape: f32[2,8,32], index: 0, kind: input, shape index: {}]   ;;  %s5216_s1 = inlined_call_operand.vmem [shape: f32[2,8,32], index: 1, kind: input, shape index: {}]   ;;  %s5217_s2 = inlined_call_operand.vmem [shape: s32[2,1,8], index: 2, kind: input, shape index: {}]   ;;  %s5218_s3 = inlined_call_operand.vmem [shape: s32[2,8,8], index: 3, kind: input, shape index: {}]   ;;  %s5219_s4 = inlined_call_operand.vmem [shape: f32[2,1,32], index: 4, kind: input, shape index: {}]   ;;  %s5220_s5 = inlined_call_operand.vmem [shape: f32[2,1,32], index: 5, kind: input, shape index: {}]   ;;  %s5221_s6 = inlined_call_operand.vmem [shape: bf16[2,32,96], index: 6, kind: input, shape index: {}]   ;;  %s5222_s7 = inlined_call_operand.vmem [shape: f32[2,1,96], index: 7, kind: input, shape index: {}]   ;;  %s5223_s8 = inlined_call_operand.vmem [shape: bf16[2,32,32], index: 8, kind: input, shape index: {}]   ;;  %s5224_s9 = inlined_call_operand.vmem [shape: f32[2,1,32], index: 9, kind: input, shape index: {}]   ;;  %s5225_s10 = inlined_call_operand.vmem [shape: f32[2,1,32], index: 10, kind: input, shape index: {}]   ;;  %s5226_s11 = inlined_call_operand.vmem [shape: f32[2,1,32], index: 11, kind: input, shape index: {}]   ;;  %s5227_s12 = inlined_call_operand.vmem [shape: bf16[2,32,32], index: 12, kind: input, shape index: {}]   ;;  %s5228_s13 = inlined_call_operand.vmem [shape: f32[2,1,32], index: 13, kind: input, shape index: {}]   ;;  %s5229_s14 = inlined_call_operand.vmem [shape: bf16[2,32,64], index: 14, kind: input, shape index: {}]   ;;  %s5230_s15 = inlined_call_operand.vmem [shape: f32[2,1,64], index: 15, kind: input, shape index: {}]   ;;  %s5231_s16 = inlined_call_operand.vmem [shape: bf16[2,32,32], index: 16, kind: input, shape index: {}]   ;;  %s5232_s17 = inlined_call_operand.vmem [shape: f32[2,1,32], index: 17, kind: input, shape index: {}]   ;;  %s5233_s18 = inlined_call_operand.vmem [shape: f32[2,1,32], index: 18, kind: input, shape index: {}]   ;;  %s5234_s19 = inlined_call_operand.vmem [shape: f32[2,1,32], index: 19, kind: input, shape index: {}]   ;;  %s5235_s20 = inlined_call_operand.vmem [shape: bf16[2,32,64], index: 20, kind: input, shape index: {}]   ;;  %s5236_s21 = inlined_call_operand.vmem [shape: f32[2,1,64], index: 21, kind: input, shape index: {}]   ;;  %s5237_s22 = inlined_call_operand.vmem [shape: bf16[2,64,32], index: 22, kind: input, shape index: {}]   ;;  %s5238_s23 = inlined_call_operand.vmem [shape: f32[2,1,32], index: 23, kind: input, shape index: {}]   ;;  %s5239_s24 = inlined_call_operand.vmem [shape: f32[2,8,32], index: 24, kind: output, shape index: {}]  }
   0x1   :  { %5250 = sst [smem:[#allocation5_spill]] %s5215_s0 }
   0x2   :  { %5251 = sst [smem:[#allocation6_spill]] %s5216_s1 }
   0x3   :  { %5252 = sst [smem:[#allocation7_spill]] %s5217_s2 }
   0x4   :  { %5253 = sst [smem:[#allocation8_spill]] %s5218_s3 }
   0x5   :  { %5254 = sst [smem:[#allocation9_spill]] %s5219_s4 }
   0x6   :  { %5255 = sst [smem:[#allocation10_spill]] %s5220_s5  ;;  %s4539_s5 = smov 0  }
   0x7   :  { %5256 = sst [smem:[#allocation11_spill]] %s5221_s6 }
   0x8   :  { %5257 = sst [smem:[#allocation12_spill]] %s5222_s7 }
   0x9   :  { %5258 = sst [smem:[#allocation13_spill]] %s5223_s8 }
   0xa   :  { %5259 = sst [smem:[#allocation14_spill]] %s5227_s12 }
   0xb   :  { %5260 = sst [smem:[#allocation15_spill]] %s5228_s13 }
   0xc   :  { %5261 = sst [smem:[#allocation16_spill]] %s5229_s14 }
   0xd   :  { %5262 = sst [smem:[#allocation17_spill]] %s5231_s16 }
   0xe   :  { %5263 = sst [smem:[#allocation18_spill]] %s5232_s17 }
   0xf   :  { %5264 = sst [smem:[#allocation19_spill]] %s5237_s22 }
  0x10   :  { %5265 = sst [smem:[#allocation20_spill]] %s5238_s23 }
  0x11   :  { %5266 = sst [smem:[#allocation21_spill]] %s5239_s24 }
  0x12 LB: > { %5267 = sst [smem:[#allocation2_spill]] %s4396_s5  ;;  %s4545_s26 = sadd.s32 4294967295, %s4396_s5   ;;  %s4396_s5 = sphi %s4539_s5, %s34_s5  }
  0x13   : > { %5268 = sst [smem:[#allocation3_spill]] %s4545_s26  ;;  %p3800_p0 = scmp.ge.s32.totalorder %s4396_s5, 1 }
  0x14   : > { %p821_p1 = scmp.lt.s32.totalorder %s4396_s5, 3 }
  0x16   : > { %p822_p2 = pnand %p3800_p0, %p821_p1 }
  0x18   : > { %825 = sbr.rel (%p822_p2) target bundleno = 7451 (0x1d1b), region = 116 }
  0x1f   : > { %p951_p3 = scmp.lt.s32.totalorder %s4545_s26, 1  ;;  %s5272_s24 = sld [smem:[#allocation11_spill]] }
  0x20   : > { %s5274_s2 = sld [smem:[#allocation13_spill]]  ;;  %s5275_s12 = sld [smem:[#allocation14_spill]] }
  0x21   : > { %s4551_s27 = scalar_select %p951_p3, %s4545_s26, 1 }
  0x22   : > { %s5277_s14 = sld [smem:[#allocation16_spill]]  ;;  %s5278_s16 = sld [smem:[#allocation17_spill]] }
  0x23   : > { %s3886_s25 = sshll.u32 %s4551_s27, 4  ;;  %s5282_s7 = sld [smem:[#allocation3_spill]] }
  0x24   : > { %s4626_s8 = scalar_lea.vmem %s5235_s20, %s3886_s25 }
  0x25   : > { %s4569_s26 = scalar_lea.vmem %s5272_s24, %s3886_s25 }
  0x26   : > { %5273 = sst [smem:[#allocation4_spill]] %s4569_s26  ;;  %s4574_s29 = scalar_lea.vmem %s5274_s2, %s3886_s25 }
  0x27   : > { %s4591_s26 = scalar_lea.vmem %s5275_s12, %s3886_s25  ;;  %s5280_s12 = sld [smem:[#allocation19_spill]] }
  0x28   : > { %s4600_s30 = scalar_lea.vmem %s5277_s14, %s3886_s25  ;;  %s4609_s5 = scalar_lea.vmem %s5278_s16, %s3886_s25 }
  0x29   : > { %s3892_s16 = sshll.u32 %s4551_s27, 5  ;;  %p3815_p4 = scmp.ne.s32.totalorder %s5282_s7, 0 }
  0x2a   : > { %s5283_s3 = sld [smem:[#allocation5_spill]] (!%p3815_p4)  ;;  %vm1032_vm0 = vcmask (!%p3815_p4), 261120  }
  0x2b   : > { %1029 = sbr.rel (%p3815_p4) target bundleno = 52 (0x34), region = 120 }
  0x2d   : > { %s4636_s17 = scalar_lea.vmem %s5280_s12, %s3892_s16  ;;  %s5284_s12 = sld [smem:[#allocation21_spill]] (!%p3815_p4) }
  0x30   : > { %v1030_v0 = vld [vmem:[%s5283_s3] sm:$0xff] (!%p3815_p4)  ;;  %v1031_v1 = vld [vmem:[%s5283_s3 + $0x8] sm:$0xff] (!%p3815_p4) }
  0x33   : > { %1033 = vst.msk [vmem:[%s5284_s12] sm:$0xff] %vm1032_vm0, %v1030_v0  ;;  %1034 = vst.msk [vmem:[%s5284_s12 + $0x8] sm:$0xff] %vm1032_vm0, %v1031_v1 }
  0x34 PF: > { %s5285_s23 = sld [smem:[#allocation21_spill]]  ;;  %vm1053_vm1 = vcmask 261120   ;;  %s5286_s4 = sld [smem:[#allocation4_spill]]  ;;  %v4398_v17 = vmov 0.0   ;;  %vm4399_vm2 = vmmov 0   ;;  %vm1188_vm7 = vcmask 64512  }
  0x35   : > { %3980 = vmatprep.subr.bf16.mxu1 %v4398_v17  ;;  %3984 = vmatprep.mubr.msk.bf16.mxu1 %vm4399_vm2, %v4398_v17  ;;  %s5287_s1 = sld [smem:[#allocation9_spill]]  ;;  %s5289_s6 = sld [smem:[#allocation10_spill]]  ;;  %vm1313_vm10 = vcmask 1043456   ;;  %vm2093_vm11 = vcmask 130048   ;;  %vm2096_vm12 = vcmask 195584  }
  0x36   : > { %3994 = vmatprep.subr.bf16.mxu0 %v4398_v17  ;;  %3996 = vmatprep.mubr.msk.bf16.mxu0 %vm4399_vm2, %v4398_v17  ;;  %s5291_s13 = sld [smem:[#allocation12_spill]]  ;;  %s4400_s25 = smov 96  }
  0x37   : > { %s4403_s22 = smov 120   ;;  %s4404_s7 = smov 56  }
  0x38   : > { %s4407_s28 = smov 48   ;;  %s4409_s12 = smov 104  }
  0x39   : > { %s4410_s16 = smov 40   ;;  %s5294_s0 = scalar_lea.vmem %s5224_s9, %s4551_s27 }
  0x3a   : > { %v4658_v2 = vld [vmem:[%s5285_s23] sm:$0xff]  ;;  %v4663_v3 = vld [vmem:[%s5285_s23 + $0x8] sm:$0xff] }
  0x3b   : > { %v1054_v4 = vsel %vm1053_vm1, %v4658_v2, 0.0  ;;  %v1057_v5 = vsel %vm1053_vm1, %v4663_v3, 0.0  ;;  %v4286_v16 = vld [vmem:[%s5286_s4] sm:$0xff]   ;;  %v4287_v18 = vld [vmem:[%s5286_s4 + $0x8] sm:$0xff]   ;;  %s5288_s24 = scalar_lea.vmem %s5287_s1, %s4551_s27  ;;  %s5290_s2 = scalar_lea.vmem %s5289_s6, %s4551_s27 }
  0x3c   : > { %1055 = vadd.xlane.f32.xlu0 %v1054_v4  ;;  %3981 = vmatpush3.bf16.msra.mxu1 %v4286_v16  ;;  %v3816_v35 = vld [vmem:[%s5288_s24] ss:$0 sm:$0xff]  ;;  %s5292_s4 = scalar_lea.vmem %s5291_s13, %s4551_s27  ;;  %s5293_s24 = sld [smem:[#allocation8_spill]] }
  0x3d   : > { %3982 = vmatprep.subr.bf16.mxu1 %v4398_v17  ;;  %v3817_v41 = vld [vmem:[%s5290_s2] ss:$0 sm:$0xff]  ;;  %s4401_s6 = smov 64   ;;  %s4402_s2 = smov 88  }
  0x3e   : > { %v3818_v46 = vld [vmem:[%s5292_s4] ss:$0 sm:$0xff]  ;;  %s4405_s13 = smov 80   ;;  %s4406_s4 = smov 112  }
  0x3f   : > { %s4408_s1 = smov 72  }
  0x40   : > { %1058 = vadd.xlane.f32.xlu0 %v1057_v5  ;;  %3983 = vmatpush3.bf16.msra.mxu1 %v4287_v18 }
  0x41   : > { %3988 = vmatprep.subr.bf16.mxu1 %v4398_v17 }
  0x42   : > { %v1039_v63 = vld [vmem:[%s5293_s24] sm:$0xff]  ;;  %v1040_v0 = vld [vmem:[%s5293_s24 + $0x8] sm:$0xff] }
  0x43   : > { %vm1041_vm8 = vcmp.eq.s32.totalorder %v1039_v63, 0  ;;  %vm1042_vm9 = vcmp.eq.s32.totalorder %v1040_v0, 0 }
  0x44   : > { %v4732_v1 = vsel %vm1041_vm8, -1e+09, %v4398_v17  ;;  %v4735_v5 = vsel %vm1042_vm9, -1e+09, %v4398_v17  ;;  %vm3522_vm8 = vcmask 523264  }
  0xc9   : > { %v1056_v6 = vpop.xlane.xlu0 %1055 }
  0xca   : > { %v1061_v7 = vmul.f32 0.03125, %v1056_v6 }
  0xcc   : > { %v1063_v8 = vsub.f32 %v4658_v2, %v1061_v7 }
  0xcd   : > { %v1059_v9 = vpop.xlane.xlu0 %1058 }
  0xce   : > { %v1062_v10 = vmul.f32 0.03125, %v1059_v9  ;;  %v1065_v11 = vmul.f32 %v1063_v8, %v1063_v8  ;;  %v1081_v37 = vmul.f32 %v3816_v35, %v1063_v8 }
  0xd0   : > { %v1064_v12 = vsub.f32 %v4663_v3, %v1062_v10  ;;  %v1067_v13 = vsel %vm1053_vm1, %v1065_v11, 0.0 }
  0xd1   : > { %1068 = vadd.xlane.f32.xlu1 %v1067_v13 }
  0xd2   : > { %v1066_v14 = vmul.f32 %v1064_v12, %v1064_v12  ;;  %v1082_v38 = vmul.f32 %v3816_v35, %v1064_v12 }
  0xd4   : > { %v1070_v15 = vsel %vm1053_vm1, %v1066_v14, 0.0 }
  0xd5   : > { %1071 = vadd.xlane.f32.xlu1 %v1070_v15 }
 0x15e   : > { %v1069_v19 = vpop.xlane.xlu1 %1068 }
 0x15f   : > { %v1073_v20 = vmul.f32 0.032258064, %v1069_v19 }
 0x161   : > { %4302 = vrsqrt.f32 %v1073_v20  ;;  %vm1085_vm3 = vcmp.eq.f32.partialorder %v1073_v20, inf  ;;  %v1088_v25 = vand.u32 2147483648, %v1073_v20  ;;  %vm1087_vm4 = vcmp.eq.f32.partialorder %v1073_v20, 0.0 }
 0x162   : > { %v1072_v21 = vpop.xlane.xlu1 %1071 }
 0x163   : > { %v1074_v22 = vmul.f32 0.032258064, %v1072_v21 }
 0x165   : > { %4304 = vrsqrt.f32 %v1074_v22  ;;  %vm1092_vm5 = vcmp.eq.f32.partialorder %v1074_v22, inf  ;;  %v1095_v31 = vand.u32 2147483648, %v1074_v22  ;;  %vm1094_vm6 = vcmp.eq.f32.partialorder %v1074_v22, 0.0 }
 0x16b   : > { %v4303_v23 = vpop.eup %4302 }
 0x16c   : > { %v1084_v24 = vmul.f32 %v4303_v23, %v1073_v20 }
 0x16e   : > { %v1086_v26 = vsel %vm1085_vm3, %v1073_v20, %v1084_v24 }
 0x16f   : > { %v4305_v27 = vpop.eup %4304  ;;  %v1089_v28 = vsel %vm1087_vm4, %v1088_v25, %v1086_v26 }
 0x170   : > { %v1097_v29 = vadd.f32 1e-06, %v1089_v28  ;;  %v1091_v30 = vmul.f32 %v4305_v27, %v1074_v22 }
 0x172   : > { %4306 = vrcp.f32 %v1097_v29  ;;  %v1093_v32 = vsel %vm1092_vm5, %v1074_v22, %v1091_v30 }
 0x173   : > { %v1096_v33 = vsel %vm1094_vm6, %v1095_v31, %v1093_v32 }
 0x174   : > { %v1098_v34 = vadd.f32 1e-06, %v1096_v33 }
 0x176   : > { %4308 = vrcp.f32 %v1098_v34 }
 0x17c   : > { %v4307_v36 = vpop.eup %4306 }
 0x17d   : > { %v1100_v39 = vmul.f32 %v4307_v36, %v1081_v37 }
 0x17f   : > { %v1109_v43 = vadd.f32 %v3817_v41, %v1100_v39 }
 0x180   : > { %v4309_v40 = vpop.eup %4308 }
 0x181   : > { %v1102_v42 = vmul.f32 %v4309_v40, %v1082_v38 }
 0x183   : > { %v1110_v44 = vadd.f32 %v3817_v41, %v1102_v42 }
 0x185   : > { %v1111_v45 = vpack.c.bf16 %v1110_v44, %v1109_v43 }
 0x187   : > { %3985 = vmatmul.mubr.msk.bf16.vlgmr.msra.gmra.mrb[0].mxu1 %vm1053_vm1, %v1111_v45 }
 0x188   : > { %3990 = vmatprep.mubr.msk.bf16.mxu1 %vm4399_vm2, %v4398_v17 }
 0x25a   : > { %v1172_v47 = vpop.f32.mrb[0].mxu1 }
 0x25b   : > { %v1173_v48 = vadd.f32 %v3818_v46, %v1172_v47  ;;  %v3986_v49 = vpop.f32.mrb[1].mxu1 }
 0x25c   : > { %v1175_v50 = vpop.f32.mrb[2].mxu1 }
 0x25d   : > { %v4701_v51 = vpack.c.bf16 %v1173_v48, %v1173_v48  ;;  %v1176_v52 = vadd.f32 %v3818_v46, %v1175_v50  ;;  %v3987_v53 = vpop.f32.mrb[3].mxu1  ;;  %v1179_v58 = vmul.f32 0.35355338, %v1173_v48 }
 0x25f   : > { %v4703_v54 = vpack.c.bf16 %v1176_v52, %v1176_v52  ;;  %1186 = vrot.lane.b32.xlu0 %v4701_v51, %s4400_s25  ;;  %v1180_v60 = vmul.f32 0.35355338, %v1176_v52  ;;  %v4713_v61 = vpack.c.bf16 %v1179_v58, %v1179_v58 }
 0x261   : > { %1236 = vrot.lane.b32.xlu1 %v4703_v54, %s4400_s25  ;;  %v4715_v62 = vpack.c.bf16 %v1180_v60, %v1180_v60 }
 0x2d1   : > { %v1187_v55 = vpop.permute.xlu0 %1186 }
 0x2d2   : > { %v1193_v56 = vsel %vm1188_vm7, %v1187_v55, 0 }
 0x2d3   : > { %3989 = vmatpush3.bf16.xpose.msra.mxu1 %v1193_v56  ;;  %v1237_v57 = vpop.permute.xlu1 %1236 }
 0x2d4   : > { %v1242_v59 = vsel %vm1188_vm7, %v1237_v57, 0  ;;  %4000 = vmatprep.subr.bf16.mxu1 %v4398_v17 }
 0x2d5   : > { %3995 = vmatpush3.bf16.xpose.msra.mxu0 %v1242_v59 }
 0x2d6   : > { %4006 = vmatprep.subr.bf16.mxu0 %v4398_v17 }
 0x2da   : > { %3991 = vmatmul.mubr.msk.bf16.vlgmr.msra.gmra.mrb[4].mxu1 %vm1188_vm7, %v4713_v61 }
 0x2db   : > { %4002 = vmatprep.mubr.msk.bf16.mxu1 %vm4399_vm2, %v4398_v17 }
 0x2dc   : > { %3997 = vmatmul.mubr.msk.bf16.vlgmr.msra.gmra.mrb[0].mxu0 %vm1188_vm7, %v4715_v62 }
 0x2dd   : > { %4008 = vmatprep.mubr.msk.bf16.mxu0 %vm4399_vm2, %v4398_v17 }
 0x3ad   : > { %v1229_v4 = vpop.f32.mrb[4].mxu1 }
 0x3ae   : > { %v1230_v6 = vadd.f32 %v1229_v4, %v4732_v1  ;;  %v3992_v7 = vpop.f32.mrb[5].mxu1 }
 0x3af   : > { %v1232_v8 = vpop.f32.mrb[6].mxu1  ;;  %v1278_v9 = vpop.f32.mrb[0].mxu0 }
 0x3b0   : > { %v1279_v10 = vadd.f32 %v1278_v9, %v4735_v5  ;;  %v3993_v11 = vpop.f32.mrb[7].mxu1  ;;  %v3998_v12 = vpop.f32.mrb[1].mxu0  ;;  %v1284_v13 = vsel %vm1188_vm7, %v1230_v6, -inf }
 0x3b1   : > { %v1281_v14 = vpop.f32.mrb[2].mxu0  ;;  %1285 = vmax.xlane.f32.xlu1 %v1284_v13 }
 0x3b2   : > { %v3999_v15 = vpop.f32.mrb[3].mxu0  ;;  %v1287_v16 = vsel %vm1188_vm7, %v1279_v10, -inf }
 0x3b3   : > { %1288 = vmax.xlane.f32.xlu0 %v1287_v16 }
 0x3c2   : > { %1357 = vrot.lane.b32.xlu1 %v4703_v54, %s4401_s6 }
 0x3c6   : > { %1408 = vrot.lane.b32.xlu1 %v4701_v51, %s4402_s2 }
 0x43e   : > { %v1286_v18 = vpop.xlane.xlu1 %1285 }
 0x43f   : > { %v1290_v19 = vsub.f32 %v1230_v6, %v1286_v18 }
 0x440   : > { %v1289_v20 = vpop.xlane.xlu0 %1288 }
 0x441   : > { %v1292_v21 = vmul.f32 1.442695, %v1290_v19  ;;  %v1291_v22 = vsub.f32 %v1279_v10, %v1289_v20 }
 0x442   : > { %v1358_v23 = vpop.permute.xlu1 %1357 }
 0x443   : > { %4310 = vpow2.f32 %v1292_v21  ;;  %v1294_v24 = vmul.f32 1.442695, %v1291_v22  ;;  %v1363_v25 = vsel %vm1313_vm10, %v1358_v23, 0 }
 0x444   : > { %4007 = vmatpush3.bf16.msra.mxu0 %v1363_v25 }
 0x445   : > { %4312 = vpow2.f32 %v1294_v24  ;;  %4018 = vmatprep.subr.bf16.mxu0 %v4398_v17 }
 0x446   : > { %v1409_v30 = vpop.permute.xlu1 %1408 }
 0x447   : > { %v1414_v41 = vsel %vm1188_vm7, %v1409_v30, 0 }
 0x44d   : > { %v4311_v26 = vpop.eup %4310 }
 0x44e   : > { %v1296_v27 = vsel %vm1188_vm7, %v4311_v26, 0.0 }
 0x44f   : > { %v4313_v28 = vpop.eup %4312  ;;  %1297 = vadd.xlane.f32.xlu0 %v1296_v27 }
 0x450   : > { %v1299_v29 = vsel %vm1188_vm7, %v4313_v28, 0.0 }
 0x451   : > { %1300 = vadd.xlane.f32.xlu1 %v1299_v29 }
 0x462   : > { %1459 = vrot.lane.b32.xlu1 %v4703_v54, %s4402_s2 }
 0x465   : > { %1308 = vrot.lane.b32.xlu0 %v4701_v51, %s4401_s6  ;;  %s4411_s6 = smov 8  }
 0x466   : > { %1457 = vrot.lane.b32.xlu1 %v4715_v62, %s4403_s22 }
 0x469   : > { %1406 = vrot.lane.b32.xlu0 %v4713_v61, %s4403_s22 }
 0x4dc   : > { %v1298_v31 = vpop.xlane.xlu0 %1297 }
 0x4dd   : > { %4314 = vrcp.f32 %v1298_v31 }
 0x4de   : > { %v1301_v32 = vpop.xlane.xlu1 %1300 }
 0x4df   : > { %4316 = vrcp.f32 %v1301_v32 }
 0x4e0   : > { %v1309_v33 = vpop.permute.xlu0 %1308 }
 0x4e1   : > { %v1315_v34 = vsel %vm1313_vm10, %v1309_v33, 0 }
 0x4e2   : > { %4001 = vmatpush3.bf16.msra.mxu1 %v1315_v34  ;;  %v1460_v40 = vpop.permute.xlu1 %1459 }
 0x4e3   : > { %4012 = vmatprep.subr.bf16.mxu1 %v4398_v17  ;;  %v1465_v43 = vsel %vm1188_vm7, %v1460_v40, 0 }
 0x4e4   : > { %v1407_v44 = vpop.permute.xlu0 %1406 }
 0x4e6   : > { %v1458_v45 = vpop.permute.xlu1 %1457 }
 0x4e7   : > { %v4315_v35 = vpop.eup %4314 }
 0x4e8   : > { %v1304_v36 = vmul.f32 %v4315_v35, %v4311_v26 }
 0x4e9   : > { %v4317_v37 = vpop.eup %4316 }
 0x4ea   : > { %v1305_v38 = vmul.f32 %v4317_v37, %v4313_v28  ;;  %v1306_v39 = vpack.c.bf16 %v1304_v36, %v1304_v36 }
 0x4ec   : > { %4003 = vmatmul.mubr.msk.bf16.vlgmr.msra.gmra.mrb[8].mxu1 %vm1188_vm7, %v1306_v39  ;;  %v1307_v42 = vpack.c.bf16 %v1305_v38, %v1305_v38 }
 0x4ed   : > { %4013 = vmatpush3.bf16.xpose.msra.mxu1 %v1414_v41  ;;  %4014 = vmatprep.mubr.msk.bf16.mxu1 %vm4399_vm2, %v4398_v17 }
 0x4ee   : > { %4009 = vmatmul.mubr.msk.bf16.vlgmr.msra.gmra.mrb[4].mxu0 %vm1188_vm7, %v1307_v42  ;;  %4024 = vmatprep.subr.bf16.mxu1 %v4398_v17 }
 0x4ef   : > { %4019 = vmatpush3.bf16.xpose.msra.mxu0 %v1465_v43  ;;  %4020 = vmatprep.mubr.msk.bf16.mxu0 %vm4399_vm2, %v4398_v17 }
 0x4f0   : > { %4030 = vmatprep.subr.bf16.mxu0 %v4398_v17 }
 0x4f4   : > { %4015 = vmatmul.mubr.msk.bf16.vlgmr.msra.gmra.mrb[12].mxu1 %vm1188_vm7, %v1407_v44 }
 0x4f5   : > { %4026 = vmatprep.mubr.msk.bf16.mxu1 %vm4399_vm2, %v4398_v17 }
 0x4f6   : > { %4021 = vmatmul.mubr.msk.bf16.vlgmr.msra.gmra.mrb[8].mxu0 %vm1188_vm7, %v1458_v45 }
 0x4f7   : > { %4032 = vmatprep.mubr.msk.bf16.mxu0 %vm4399_vm2, %v4398_v17 }
 0x5bf   : > { %v4773_v46 = vpop.f32.mrb[8].mxu1 }
 0x5c0   : > { %v4004_v47 = vpop.f32.mrb[9].mxu1 }
 0x5c1   : > { %v1354_v48 = vpop.f32.mrb[10].mxu1  ;;  %v4775_v49 = vpop.f32.mrb[4].mxu0 }
 0x5c2   : > { %v4005_v50 = vpop.f32.mrb[11].mxu1  ;;  %v4010_v52 = vpop.f32.mrb[5].mxu0 }
 0x5c3   : > { %v1402_v53 = vpop.f32.mrb[6].mxu0 }
 0x5c4   : > { %v4011_v55 = vpop.f32.mrb[7].mxu0 }
 0x5c7   : > { %v1450_v56 = vpop.f32.mrb[12].mxu1 }
 0x5c8   : > { %v1451_v57 = vadd.f32 %v1450_v56, %v4732_v1  ;;  %v4016_v58 = vpop.f32.mrb[13].mxu1 }
 0x5c9   : > { %v1453_v59 = vpop.f32.mrb[14].mxu1  ;;  %v1501_v60 = vpop.f32.mrb[8].mxu0 }
 0x5ca   : > { %v1502_v63 = vadd.f32 %v1501_v60, %v4735_v5  ;;  %v4017_v0 = vpop.f32.mrb[15].mxu1  ;;  %v4022_v4 = vpop.f32.mrb[9].mxu0  ;;  %v1507_v6 = vsel %vm1188_vm7, %v1451_v57, -inf }
 0x5cb   : > { %v1504_v7 = vpop.f32.mrb[10].mxu0  ;;  %1508 = vmax.xlane.f32.xlu0 %v1507_v6 }
 0x5cc   : > { %v4023_v8 = vpop.f32.mrb[11].mxu0  ;;  %v1510_v9 = vsel %vm1188_vm7, %v1502_v63, -inf }
 0x5cd   : > { %1511 = vmax.xlane.f32.xlu1 %v1510_v9 }
 0x5de   : > { %1579 = vrot.lane.b32.xlu1 %v4703_v54, %s4404_s7 }
 0x5e2   : > { %1629 = vrot.lane.b32.xlu1 %v4701_v51, %s4405_s13 }
 0x5e6   : > { %1679 = vrot.lane.b32.xlu1 %v4703_v54, %s4405_s13 }
 0x5ea   : > { %1677 = vrot.lane.b32.xlu1 %v4715_v62, %s4406_s4 }
 0x658   : > { %v1509_v10 = vpop.xlane.xlu0 %1508 }
 0x659   : > { %v1513_v11 = vsub.f32 %v1451_v57, %v1509_v10 }
 0x65a   : > { %v1512_v12 = vpop.xlane.xlu1 %1511 }
 0x65b   : > { %v1515_v13 = vmul.f32 1.442695, %v1513_v11  ;;  %v1514_v14 = vsub.f32 %v1502_v63, %v1512_v12 }
 0x65d   : > { %4318 = vpow2.f32 %v1515_v13  ;;  %v1517_v15 = vmul.f32 1.442695, %v1514_v14 }
 0x65e   : > { %v1580_v16 = vpop.permute.xlu1 %1579 }
 0x65f   : > { %4320 = vpow2.f32 %v1517_v15  ;;  %v1585_v18 = vsel %vm1313_vm10, %v1580_v16, 0 }
 0x660   : > { %4031 = vmatpush3.bf16.msra.mxu0 %v1585_v18 }
 0x661   : > { %4042 = vmatprep.subr.bf16.mxu0 %v4398_v17 }
 0x662   : > { %v1630_v28 = vpop.permute.xlu1 %1629 }
 0x663   : > { %v1635_v34 = vsel %vm1188_vm7, %v1630_v28, 0 }
 0x666   : > { %v1680_v33 = vpop.permute.xlu1 %1679 }
 0x667   : > { %v4319_v19 = vpop.eup %4318  ;;  %v1685_v36 = vsel %vm1188_vm7, %v1680_v33, 0 }
 0x668   : > { %v1519_v20 = vsel %vm1188_vm7, %v4319_v19, 0.0 }
 0x669   : > { %v4321_v21 = vpop.eup %4320  ;;  %1520 = vadd.xlane.f32.xlu0 %v1519_v20 }
 0x66a   : > { %v1522_v22 = vsel %vm1188_vm7, %v4321_v21, 0.0  ;;  %v1678_v38 = vpop.permute.xlu1 %1677 }
 0x66d   : > { %1523 = vadd.xlane.f32.xlu0 %v1522_v22 }
 0x683   : > { %1531 = vrot.lane.b32.xlu0 %v4701_v51, %s4404_s7  ;;  %s4412_s7 = smov 16  }
 0x687   : > { %1627 = vrot.lane.b32.xlu0 %v4713_v61, %s4406_s4 }
 0x6f6   : > { %v1521_v23 = vpop.xlane.xlu0 %1520 }
 0x6f7   : > { %4322 = vrcp.f32 %v1521_v23 }
 0x6fa   : > { %v1524_v24 = vpop.xlane.xlu0 %1523 }
 0x6fb   : > { %4324 = vrcp.f32 %v1524_v24 }
 0x6fe   : > { %v1532_v25 = vpop.permute.xlu0 %1531 }
 0x6ff   : > { %v1537_v26 = vsel %vm1313_vm10, %v1532_v25, 0 }
 0x700   : > { %4025 = vmatpush3.bf16.msra.mxu1 %v1537_v26 }
 0x701   : > { %v4323_v27 = vpop.eup %4322  ;;  %4036 = vmatprep.subr.bf16.mxu1 %v4398_v17 }
 0x702   : > { %v1527_v29 = vmul.f32 %v4323_v27, %v4319_v19  ;;  %v1628_v37 = vpop.permute.xlu0 %1627 }
 0x704   : > { %v1529_v30 = vpack.c.bf16 %v1527_v29, %v1527_v29 }
 0x705   : > { %v4325_v31 = vpop.eup %4324 }
 0x706   : > { %v1528_v32 = vmul.f32 %v4325_v31, %v4321_v21  ;;  %4027 = vmatmul.mubr.msk.bf16.vlgmr.msra.gmra.mrb[16].mxu1 %vm1188_vm7, %v1529_v30 }
 0x707   : > { %4038 = vmatprep.mubr.msk.bf16.mxu1 %vm4399_vm2, %v4398_v17 }
 0x708   : > { %v1530_v35 = vpack.c.bf16 %v1528_v32, %v1528_v32 }
 0x709   : > { %4037 = vmatpush3.bf16.xpose.msra.mxu1 %v1635_v34 }
 0x70a   : > { %4033 = vmatmul.mubr.msk.bf16.vlgmr.msra.gmra.mrb[12].mxu0 %vm1188_vm7, %v1530_v35  ;;  %4048 = vmatprep.subr.bf16.mxu1 %v4398_v17 }
 0x70b   : > { %4043 = vmatpush3.bf16.xpose.msra.mxu0 %v1685_v36  ;;  %4044 = vmatprep.mubr.msk.bf16.mxu0 %vm4399_vm2, %v4398_v17 }
 0x70c   : > { %4054 = vmatprep.subr.bf16.mxu0 %v4398_v17 }
 0x710   : > { %4039 = vmatmul.mubr.msk.bf16.vlgmr.msra.gmra.mrb[20].mxu1 %vm1188_vm7, %v1628_v37 }
 0x711   : > { %4050 = vmatprep.mubr.msk.bf16.mxu1 %vm4399_vm2, %v4398_v17 }
 0x712   : > { %4045 = vmatmul.mubr.msk.bf16.vlgmr.msra.gmra.mrb[16].mxu0 %vm1188_vm7, %v1678_v38 }
 0x713   : > { %4056 = vmatprep.mubr.msk.bf16.mxu0 %vm4399_vm2, %v4398_v17 }
 0x7d9   : > { %v4813_v39 = vpop.f32.mrb[16].mxu1 }
 0x7da   : > { %v4028_v40 = vpop.f32.mrb[17].mxu1 }
 0x7db   : > { %v1576_v41 = vpop.f32.mrb[18].mxu1 }
 0x7dc   : > { %v4029_v42 = vpop.f32.mrb[19].mxu1 }
 0x7dd   : > { %v4815_v43 = vpop.f32.mrb[12].mxu0 }
 0x7de   : > { %v4256_v44 = vpack.i.bf16 %v4815_v43, %v4813_v39  ;;  %v4034_v45 = vpop.f32.mrb[13].mxu0 }
 0x7df   : > { %v1624_v47 = vpop.f32.mrb[14].mxu0 }
 0x7e0   : > { %v4035_v48 = vpop.f32.mrb[15].mxu0 }
 0x7e3   : > { %v1671_v50 = vpop.f32.mrb[20].mxu1 }
 0x7e4   : > { %v1672_v52 = vadd.f32 %v1671_v50, %v4732_v1  ;;  %v4040_v53 = vpop.f32.mrb[21].mxu1 }
 0x7e5   : > { %v1674_v55 = vpop.f32.mrb[22].mxu1  ;;  %v1721_v56 = vpop.f32.mrb[16].mxu0 }
 0x7e6   : > { %v1722_v57 = vadd.f32 %v1721_v56, %v4735_v5  ;;  %v4041_v58 = vpop.f32.mrb[23].mxu1  ;;  %v4046_v59 = vpop.f32.mrb[17].mxu0  ;;  %v1727_v60 = vsel %vm1188_vm7, %v1672_v52, -inf }
 0x7e7   : > { %v1724_v63 = vpop.f32.mrb[18].mxu0  ;;  %1728 = vmax.xlane.f32.xlu0 %v1727_v60 }
 0x7e8   : > { %v4047_v0 = vpop.f32.mrb[19].mxu0  ;;  %v1730_v4 = vsel %vm1188_vm7, %v1722_v57, -inf }
 0x7e9   : > { %1731 = vmax.xlane.f32.xlu1 %v1730_v4 }
 0x7fa   : > { %1799 = vrot.lane.b32.xlu1 %v4703_v54, %s4407_s28 }
 0x7fe   : > { %1849 = vrot.lane.b32.xlu1 %v4701_v51, %s4408_s1 }
 0x802   : > { %1899 = vrot.lane.b32.xlu1 %v4703_v54, %s4408_s1 }
 0x806   : > { %1897 = vrot.lane.b32.xlu1 %v4715_v62, %s4409_s12 }
 0x874   : > { %v1729_v6 = vpop.xlane.xlu0 %1728 }
 0x875   : > { %v1733_v7 = vsub.f32 %v1672_v52, %v1729_v6 }
 0x876   : > { %v1732_v8 = vpop.xlane.xlu1 %1731 }
 0x877   : > { %v1735_v9 = vmul.f32 1.442695, %v1733_v7  ;;  %v1734_v10 = vsub.f32 %v1722_v57, %v1732_v8 }
 0x879   : > { %4326 = vpow2.f32 %v1735_v9  ;;  %v1737_v11 = vmul.f32 1.442695, %v1734_v10 }
 0x87a   : > { %v1800_v12 = vpop.permute.xlu1 %1799 }
 0x87b   : > { %4328 = vpow2.f32 %v1737_v11  ;;  %v1805_v13 = vsel %vm1313_vm10, %v1800_v12, 0 }
 0x87c   : > { %4055 = vmatpush3.bf16.msra.mxu0 %v1805_v13 }
 0x87d   : > { %4066 = vmatprep.subr.bf16.mxu0 %v4398_v17 }
 0x87e   : > { %v1850_v23 = vpop.permute.xlu1 %1849 }
 0x882   : > { %v1900_v28 = vpop.permute.xlu1 %1899 }
 0x883   : > { %v4327_v14 = vpop.eup %4326  ;;  %v1905_v30 = vsel %vm1188_vm7, %v1900_v28, 0 }
 0x884   : > { %v1739_v15 = vsel %vm1188_vm7, %v4327_v14, 0.0 }
 0x885   : > { %v4329_v16 = vpop.eup %4328  ;;  %1740 = vadd.xlane.f32.xlu0 %v1739_v15 }
 0x886   : > { %v1742_v62 = vsel %vm1188_vm7, %v4329_v16, 0.0  ;;  %v1898_v32 = vpop.permute.xlu1 %1897 }
 0x889   : > { %1743 = vadd.xlane.f32.xlu0 %v1742_v62 }
 0x89f   : > { %1751 = vrot.lane.b32.xlu0 %v4701_v51, %s4407_s28  ;;  %s5249_s28 = smov 24  }
 0x8a3   : > { %1847 = vrot.lane.b32.xlu0 %v4713_v61, %s4409_s12  ;;  %v1855_v61 = vsel %vm1188_vm7, %v1850_v23, 0 }
 0x912   : > { %v1741_v18 = vpop.xlane.xlu0 %1740 }
 0x913   : > { %4330 = vrcp.f32 %v1741_v18  ;;  %v4288_v18 = vld [vmem:[%s4574_s29] sm:$0xff]  }
 0x916   : > { %v1744_v19 = vpop.xlane.xlu0 %1743 }
 0x917   : > { %4332 = vrcp.f32 %v1744_v19  ;;  %v4289_v19 = vld [vmem:[%s4574_s29 + $0x8] sm:$0xff]   ;;  %s5297_s29 = scalar_lea.vmem %s5226_s11, %s4551_s27 }
 0x91a   : > { %v1752_v20 = vpop.permute.xlu0 %1751 }
 0x91b   : > { %v1757_v21 = vsel %vm1313_vm10, %v1752_v20, 0 }
 0x91c   : > { %4049 = vmatpush3.bf16.msra.mxu1 %v1757_v21 }
 0x91d   : > { %v4331_v22 = vpop.eup %4330  ;;  %4060 = vmatprep.subr.bf16.mxu1 %v4398_v17 }
 0x91e   : > { %v1747_v24 = vmul.f32 %v4331_v22, %v4327_v14  ;;  %v1848_v31 = vpop.permute.xlu0 %1847 }
 0x920   : > { %v1749_v25 = vpack.c.bf16 %v1747_v24, %v1747_v24 }
 0x921   : > { %v4333_v26 = vpop.eup %4332 }
 0x922   : > { %v1748_v27 = vmul.f32 %v4333_v26, %v4329_v16  ;;  %4051 = vmatmul.mubr.msk.bf16.vlgmr.msra.gmra.mrb[24].mxu1 %vm1188_vm7, %v1749_v25 }
 0x923   : > { %4062 = vmatprep.mubr.msk.bf16.mxu1 %vm4399_vm2, %v4398_v17 }
 0x924   : > { %v1750_v29 = vpack.c.bf16 %v1748_v27, %v1748_v27 }
 0x925   : > { %4061 = vmatpush3.bf16.xpose.msra.mxu1 %v1855_v61 }
 0x926   : > { %4057 = vmatmul.mubr.msk.bf16.vlgmr.msra.gmra.mrb[20].mxu0 %vm1188_vm7, %v1750_v29  ;;  %4072 = vmatprep.subr.bf16.mxu1 %v4398_v17 }
 0x927   : > { %4067 = vmatpush3.bf16.xpose.msra.mxu0 %v1905_v30  ;;  %4068 = vmatprep.mubr.msk.bf16.mxu0 %vm4399_vm2, %v4398_v17 }
 0x928   : > { %4078 = vmatprep.subr.bf16.mxu0 %v4398_v17 }
 0x92c   : > { %4063 = vmatmul.mubr.msk.bf16.vlgmr.msra.gmra.mrb[28].mxu1 %vm1188_vm7, %v1848_v31 }
 0x92d   : > { %4074 = vmatprep.mubr.msk.bf16.mxu1 %vm4399_vm2, %v4398_v17 }
 0x92e   : > { %4069 = vmatmul.mubr.msk.bf16.vlgmr.msra.gmra.mrb[24].mxu0 %vm1188_vm7, %v1898_v32 }
 0x92f   : > { %4080 = vmatprep.mubr.msk.bf16.mxu0 %vm4399_vm2, %v4398_v17 }
 0x9f5   : > { %v1793_v33 = vpop.f32.mrb[24].mxu1 }
 0x9f6   : > { %v4052_v34 = vpop.f32.mrb[25].mxu1 }
 0x9f7   : > { %v1796_v35 = vpop.f32.mrb[26].mxu1 }
 0x9f8   : > { %v4053_v36 = vpop.f32.mrb[27].mxu1 }
 0x9f9   : > { %v1841_v37 = vpop.f32.mrb[20].mxu0 }
 0x9fa   : > { %v4261_v38 = vpack.i.bf16 %v1841_v37, %v1793_v33  ;;  %v4058_v40 = vpop.f32.mrb[21].mxu0 }
 0x9fb   : > { %v1844_v41 = vpop.f32.mrb[22].mxu0 }
 0x9fc   : > { %v4059_v42 = vpop.f32.mrb[23].mxu0 }
 0x9ff   : > { %v1891_v45 = vpop.f32.mrb[28].mxu1 }
 0xa00   : > { %v1892_v47 = vadd.f32 %v1891_v45, %v4732_v1  ;;  %v4064_v48 = vpop.f32.mrb[29].mxu1 }
 0xa01   : > { %v1894_v50 = vpop.f32.mrb[30].mxu1  ;;  %v1941_v52 = vpop.f32.mrb[24].mxu0 }
 0xa02   : > { %v1942_v53 = vadd.f32 %v1941_v52, %v4735_v5  ;;  %v4065_v55 = vpop.f32.mrb[31].mxu1  ;;  %v4070_v56 = vpop.f32.mrb[25].mxu0  ;;  %v1947_v57 = vsel %vm1188_vm7, %v1892_v47, -inf }
 0xa03   : > { %v1944_v58 = vpop.f32.mrb[26].mxu0  ;;  %1948 = vmax.xlane.f32.xlu0 %v1947_v57 }
 0xa04   : > { %v4071_v59 = vpop.f32.mrb[27].mxu0  ;;  %v1950_v60 = vsel %vm1188_vm7, %v1942_v53, -inf }
 0xa05   : > { %1951 = vmax.xlane.f32.xlu1 %v1950_v60 }
 0xa16   : > { %2019 = vrot.lane.b32.xlu1 %v4703_v54, %s4410_s16 }
 0xa1a   : > { %4257 = vrot.lane.b32.xlu1 %v4256_v44, %s4411_s6 }
 0xa1e   : > { %4262 = vrot.lane.b32.xlu1 %v4261_v38, %s4412_s7 }
 0xa90   : > { %v1949_v1 = vpop.xlane.xlu0 %1948 }
 0xa91   : > { %v1953_v5 = vsub.f32 %v1892_v47, %v1949_v1 }
 0xa92   : > { %v1952_v63 = vpop.xlane.xlu1 %1951 }
 0xa93   : > { %v1955_v0 = vmul.f32 1.442695, %v1953_v5  ;;  %v1954_v4 = vsub.f32 %v1942_v53, %v1952_v63 }
 0xa95   : > { %4334 = vpow2.f32 %v1955_v0  ;;  %v1957_v6 = vmul.f32 1.442695, %v1954_v4 }
 0xa96   : > { %v2020_v7 = vpop.permute.xlu1 %2019 }
 0xa97   : > { %4336 = vpow2.f32 %v1957_v6  ;;  %v2025_v54 = vsel %vm1313_vm10, %v2020_v7, 0 }
 0xa98   : > { %4079 = vmatpush3.bf16.msra.mxu0 %v2025_v54  ;;  %v4290_v54 = vld [vmem:[%s4600_s30] sm:$0xff]  }
 0xa99   : > { %4092 = vmatprep.subr.bf16.mxu0 %v4398_v17 }
 0xa9a   : > { %v4258_v61 = vpop.permute.xlu1 %4257 }
 0xa9b   : > { %v4260_v30 = vunpack.i.h.bf16 %v4258_v61  ;;  %v4259_v31 = vunpack.i.l.bf16 %v4258_v61 }
 0xa9d   : > { %v2092_v35 = vsel %vm1188_vm7, %v4775_v49, %v4260_v30  ;;  %v2091_v36 = vsel %vm1188_vm7, %v4773_v46, %v4259_v31  ;;  %v3841_v46 = vld [vmem:[%s5294_s0] ss:$0 sm:$0xff] }
 0xa9e   : > { %v4263_v29 = vpop.permute.xlu1 %4262  ;;  %v3843_v31 = vld [vmem:[%s5297_s29] ss:$0 sm:$0xff]  ;;  %s5299_s29 = sld [smem:[#allocation15_spill]] }
 0xa9f   : > { %v4335_v8 = vpop.eup %4334  ;;  %v4265_v32 = vunpack.i.h.bf16 %v4263_v29  ;;  %v4264_v33 = vunpack.i.l.bf16 %v4263_v29 }
 0xaa0   : > { %v1959_v39 = vsel %vm1188_vm7, %v4335_v8, 0.0 }
 0xaa1   : > { %v4337_v43 = vpop.eup %4336  ;;  %1960 = vadd.xlane.f32.xlu0 %v1959_v39  ;;  %v2095_v40 = vsel %vm2093_vm11, %v2092_v35, %v4265_v32  ;;  %v2094_v41 = vsel %vm2093_vm11, %v2091_v36, %v4264_v33  ;;  %v4291_v39 = vld [vmem:[%s4600_s30 + $0x8] sm:$0xff]   ;;  %s5296_s30 = scalar_lea.vmem %s5225_s10, %s4551_s27 }
 0xaa2   : > { %v1962_v44 = vsel %vm1188_vm7, %v4337_v43, 0.0 }
 0xaa4   : > { %s5300_s14 = scalar_lea.vmem %s5299_s29, %s4551_s27  ;;  %s5308_s29 = sld [smem:[#allocation20_spill]] }
 0xaa5   : > { %1963 = vadd.xlane.f32.xlu0 %v1962_v44 }
 0xabb   : > { %1971 = vrot.lane.b32.xlu0 %v4701_v51, %s4410_s16  ;;  %s5295_s16 = sld [smem:[#allocation6_spill]] }
 0xac1   : > { %v1038_v44 = vld [vmem:[%s5295_s16 + $0x8] sm:$0xff] }
 0xb2e   : > { %v1961_v9 = vpop.xlane.xlu0 %1960 }
 0xb2f   : > { %4338 = vrcp.f32 %v1961_v9  ;;  %v4293_v9 = vld [vmem:[%s4591_s26 + $0x8] sm:$0xff]  }
 0xb32   : > { %v1964_v10 = vpop.xlane.xlu0 %1963 }
 0xb33   : > { %4340 = vrcp.f32 %v1964_v10 }
 0xb36   : > { %v1972_v11 = vpop.permute.xlu0 %1971 }
 0xb37   : > { %v1977_v12 = vsel %vm1313_vm10, %v1972_v11, 0 }
 0xb38   : > { %4073 = vmatpush3.bf16.msra.mxu1 %v1977_v12 }
 0xb39   : > { %v4339_v13 = vpop.eup %4338  ;;  %4084 = vmatprep.subr.bf16.mxu1 %v4398_v17 }
 0xb3a   : > { %v1967_v14 = vmul.f32 %v4339_v13, %v4335_v8  ;;  %v4292_v8 = vld [vmem:[%s4591_s26] sm:$0xff]  }
 0xb3c   : > { %v1969_v15 = vpack.c.bf16 %v1967_v14, %v1967_v14 }
 0xb3d   : > { %v4341_v16 = vpop.eup %4340 }
 0xb3e   : > { %v1968_v62 = vmul.f32 %v4341_v16, %v4337_v43  ;;  %4075 = vmatmul.mubr.msk.bf16.vlgmr.msra.gmra.mrb[32].mxu1 %vm1188_vm7, %v1969_v15  ;;  %v1037_v43 = vld [vmem:[%s5295_s16] sm:$0xff] }
 0xb3f   : > { %4088 = vmatprep.mubr.msk.bf16.mxu1 %vm4399_vm2, %v4398_v17  ;;  %4085 = vmatpush3.bf16.msra.mxu1 %v4288_v18  ;;  %v2297_v10 = vpack.c.bf16 %v1038_v44, %v1037_v43 }
 0xb40   : > { %v1970_v51 = vpack.c.bf16 %v1968_v62, %v1968_v62  ;;  %4086 = vmatprep.subr.bf16.mxu1 %v4398_v17 }
 0xb42   : > { %4081 = vmatmul.mubr.msk.bf16.vlgmr.msra.gmra.mrb[28].mxu0 %vm1188_vm7, %v1970_v51 }
 0xb43   : > { %4096 = vmatprep.mubr.msk.bf16.mxu0 %vm4399_vm2, %v4398_v17  ;;  %4087 = vmatpush3.bf16.msra.mxu1 %v4289_v19 }
 0xb44   : > { %4100 = vmatprep.subr.bf16.mxu1 %v4398_v17  ;;  %4093 = vmatpush3.bf16.msra.mxu0 %v4292_v8 }
 0xb45   : > { %4094 = vmatprep.subr.bf16.mxu0 %v4398_v17 }
 0xb48   : > { %4095 = vmatpush3.bf16.msra.mxu0 %v4293_v9 }
 0xb49   : > { %4108 = vmatprep.subr.bf16.mxu0 %v4398_v17 }
 0xc11   : > { %v2013_v20 = vpop.f32.mrb[32].mxu1 }
 0xc12   : > { %v4076_v21 = vpop.f32.mrb[33].mxu1 }
 0xc13   : > { %v2016_v22 = vpop.f32.mrb[34].mxu1 }
 0xc14   : > { %v4077_v23 = vpop.f32.mrb[35].mxu1 }
 0xc15   : > { %v2061_v24 = vpop.f32.mrb[28].mxu0 }
 0xc16   : > { %v4266_v25 = vpack.i.bf16 %v2061_v24, %v2013_v20  ;;  %v4082_v26 = vpop.f32.mrb[29].mxu0 }
 0xc17   : > { %v2064_v27 = vpop.f32.mrb[30].mxu0  ;;  %v3842_v26 = vld [vmem:[%s5296_s30] ss:$0 sm:$0xff]  ;;  %s5298_s30 = scalar_lea.vmem %s5230_s15, %s4551_s27 }
 0xc18   : > { %v4083_v28 = vpop.f32.mrb[31].mxu0  ;;  %4267 = vrot.lane.b32.xlu0 %v4266_v25, %s5249_s28  ;;  %v3848_v36 = vld [vmem:[%s5298_s30] ss:$0 sm:$0xff]  ;;  %s5301_s28 = sld [smem:[#allocation7_spill]]  ;;  %s5307_s30 = scalar_lea.vmem %s5236_s21, %s4551_s27 }
 0xc8a   : > { %v4268_v34 = vpop.permute.xlu0 %4267 }
 0xc8b   : > { %v4270_v37 = vunpack.i.h.bf16 %v4268_v34  ;;  %v4269_v38 = vunpack.i.l.bf16 %v4268_v34 }
 0xc8d   : > { %v2098_v42 = vsel %vm2096_vm12, %v2095_v40, %v4270_v37  ;;  %v2097_v45 = vsel %vm2096_vm12, %v2094_v41, %v4269_v38 }
 0xc8e   : > { %v2099_v47 = vpack.c.bf16 %v2098_v42, %v2097_v45 }
 0xc90   : > { %4089 = vmatmul.mubr.msk.bf16.vlgmr.msra.gmra.mrb[36].mxu1 %vm1053_vm1, %v2099_v47 }
 0xc91   : > { %4104 = vmatprep.mubr.msk.bf16.mxu1 %vm4399_vm2, %v4398_v17  ;;  %4101 = vmatpush3.bf16.msra.mxu1 %v4290_v54 }
 0xc92   : > { %4102 = vmatprep.subr.bf16.mxu1 %v4398_v17 }
 0xc95   : > { %4103 = vmatpush3.bf16.msra.mxu1 %v4291_v39 }
 0xc96   : > { %4114 = vmatprep.subr.bf16.mxu1 %v4398_v17 }
 0xc98   : > { %4105 = vmatmul.mubr.msk.bf16.vlgmr.msra.gmra.mrb[40].mxu1 %vm1053_vm1, %v2297_v10 }
 0xc99   : > { %4116 = vmatprep.mubr.msk.bf16.mxu1 %vm4399_vm2, %v4398_v17 }
 0xd63   : > { %v2153_v49 = vpop.f32.mrb[36].mxu1 }
 0xd64   : > { %v2160_v48 = vadd.f32 %v2153_v49, %v4658_v2  ;;  %v4090_v50 = vpop.f32.mrb[37].mxu1 }
 0xd65   : > { %v2156_v52 = vpop.f32.mrb[38].mxu1  ;;  %v3844_v50 = vld [vmem:[%s5300_s14] ss:$0 sm:$0xff] }
 0xd66   : > { %v4900_v53 = vadd.f32 %v3841_v46, %v2160_v48  ;;  %v2161_v55 = vadd.f32 %v2156_v52, %v4663_v3  ;;  %v4091_v56 = vpop.f32.mrb[39].mxu1 }
 0xd68   : > { %v4903_v57 = vadd.f32 %v3841_v46, %v2161_v55  ;;  %v2173_v58 = vsel %vm1053_vm1, %v4900_v53, 0.0 }
 0xd69   : > { %2174 = vadd.xlane.f32.xlu1 %v2173_v58 }
 0xd6a   : > { %v2176_v59 = vsel %vm1053_vm1, %v4903_v57, 0.0 }
 0xd6b   : > { %2177 = vadd.xlane.f32.xlu0 %v2176_v59  ;;  %v2358_v37 = vpop.f32.mrb[40].mxu1 }
 0xd6c   : > { %v2359_v38 = vadd.f32 %v3848_v36, %v2358_v37  ;;  %v4106_v40 = vpop.f32.mrb[41].mxu1 }
 0xd6d   : > { %v2361_v41 = vpop.f32.mrb[42].mxu1 }
 0xd6e   : > { %v2362_v42 = vadd.f32 %v3848_v36, %v2361_v41  ;;  %v4107_v45 = vpop.f32.mrb[43].mxu1  ;;  %v4948_v47 = vpack.c.bf16 %v2359_v38, %v2359_v38 }
 0xd70   : > { %v4950_v49 = vpack.c.bf16 %v2362_v42, %v2362_v42  ;;  %v2387_v46 = vsel %vm1188_vm7, %v4948_v47, 0 }
 0xd72   : > { %v2433_v48 = vsel %vm1188_vm7, %v4950_v49, 0 }
 0xd73   : > { %4115 = vmatpush3.bf16.xpose.msra.mxu1 %v2433_v48 }
 0xd74   : > { %4126 = vmatprep.subr.bf16.mxu1 %v4398_v17 }
 0xdf6   : > { %v2175_v2 = vpop.xlane.xlu1 %2174 }
 0xdf7   : > { %v2179_v60 = vmul.f32 0.03125, %v2175_v2 }
 0xdf8   : > { %v2178_v1 = vpop.xlane.xlu0 %2177 }
 0xdf9   : > { %v2181_v5 = vsub.f32 %v4900_v53, %v2179_v60  ;;  %v2180_v3 = vmul.f32 0.03125, %v2178_v1 }
 0xdfb   : > { %v2182_v63 = vsub.f32 %v4903_v57, %v2180_v3  ;;  %v2183_v0 = vmul.f32 %v2181_v5, %v2181_v5  ;;  %v2199_v28 = vmul.f32 %v3842_v26, %v2181_v5 }
 0xdfd   : > { %v2185_v4 = vsel %vm1053_vm1, %v2183_v0, 0.0  ;;  %v2184_v6 = vmul.f32 %v2182_v63, %v2182_v63  ;;  %v2200_v61 = vmul.f32 %v3842_v26, %v2182_v63  ;;  %v2369_v63 = vlaneseq  ;;  %v1045_v0 = vld [vmem:[%s5301_s28] sm:$0x1] }
 0xdfe   : > { %2186 = vadd.xlane.f32.xlu0 %v2185_v4  ;;  %vm1047_vm3 = vcmp.eq.s32.totalorder %v1045_v0, 0 }
 0xdff   : > { %v2188_v7 = vsel %vm1053_vm1, %v2184_v6, 0.0  ;;  %v2370_v4 = vshrl.u32 %v2369_v63, 7  ;;  %v1046_v6 = vld [vmem:[%s5301_s28 + $0x1] sm:$0x1]  ;;  %v1049_v54 = vsel %vm1047_vm3, -1e+09, %v4398_v17 }
 0xe00   : > { %vm1048_vm4 = vcmp.eq.s32.totalorder %v1046_v6, 0 }
 0xe01   : > { %v1050_v8 = vsel %vm1048_vm4, -1e+09, %v4398_v17 }
 0xe02   : > { %2189 = vadd.xlane.f32.xlu0 %v2188_v7  ;;  %v2371_v7 = vsub.s32 0, %v2370_v4 }
 0xe04   : > { %v4983_v39 = vrot.slane %v1049_v54, %v2371_v7  ;;  %v4985_v43 = vrot.slane %v1050_v8, %v2371_v7 }
 0xe8b   : > { %v2187_v11 = vpop.xlane.xlu0 %2186 }
 0xe8c   : > { %v2191_v12 = vmul.f32 0.032258064, %v2187_v11 }
 0xe8e   : > { %4342 = vrsqrt.f32 %v2191_v12  ;;  %vm2203_vm13 = vcmp.eq.f32.partialorder %v2191_v12, inf  ;;  %v2206_v62 = vand.u32 2147483648, %v2191_v12  ;;  %vm2205_vm14 = vcmp.eq.f32.partialorder %v2191_v12, 0.0 }
 0xe8f   : > { %v2190_v13 = vpop.xlane.xlu0 %2189 }
 0xe90   : > { %v2192_v14 = vmul.f32 0.032258064, %v2190_v13 }
 0xe92   : > { %4344 = vrsqrt.f32 %v2192_v14  ;;  %vm2210_vm15 = vcmp.eq.f32.partialorder %v2192_v14, inf  ;;  %v2213_v22 = vand.u32 2147483648, %v2192_v14  ;;  %vm2212_vm0 = vcmp.eq.f32.partialorder %v2192_v14, 0.0 }
 0xe98   : > { %v4343_v15 = vpop.eup %4342 }
 0xe99   : > { %v2202_v16 = vmul.f32 %v4343_v15, %v2191_v12 }
 0xe9b   : > { %v2204_v51 = vsel %vm2203_vm13, %v2191_v12, %v2202_v16 }
 0xe9c   : > { %v4345_v18 = vpop.eup %4344  ;;  %v2207_v19 = vsel %vm2205_vm14, %v2206_v62, %v2204_v51 }
 0xe9d   : > { %v2215_v20 = vadd.f32 1e-06, %v2207_v19  ;;  %v2209_v21 = vmul.f32 %v4345_v18, %v2192_v14 }
 0xe9f   : > { %4346 = vrcp.f32 %v2215_v20  ;;  %v2211_v23 = vsel %vm2210_vm15, %v2192_v14, %v2209_v21 }
 0xea0   : > { %v2214_v24 = vsel %vm2212_vm0, %v2213_v22, %v2211_v23 }
 0xea1   : > { %v2216_v25 = vadd.f32 1e-06, %v2214_v24 }
 0xea3   : > { %4348 = vrcp.f32 %v2216_v25 }
 0xea9   : > { %v4347_v27 = vpop.eup %4346 }
 0xeaa   : > { %v2218_v29 = vmul.f32 %v4347_v27, %v2199_v28 }
 0xeac   : > { %v2227_v33 = vadd.f32 %v3843_v31, %v2218_v29 }
 0xead   : > { %v4349_v30 = vpop.eup %4348 }
 0xeae   : > { %v2220_v32 = vmul.f32 %v4349_v30, %v2200_v61 }
 0xeb0   : > { %v2228_v34 = vadd.f32 %v3843_v31, %v2220_v32 }
 0xeb2   : > { %v2229_v35 = vpack.c.bf16 %v2228_v34, %v2227_v33 }
 0xeb4   : > { %4097 = vmatmul.mubr.msk.bf16.vlgmr.msra.gmra.mrb[32].mxu0 %vm1053_vm1, %v2229_v35 }
 0xeb5   : > { %4110 = vmatprep.mubr.msk.bf16.mxu0 %vm4399_vm2, %v4398_v17  ;;  %4109 = vmatpush3.bf16.xpose.msra.mxu0 %v2387_v46 }
 0xeb6   : > { %4120 = vmatprep.subr.bf16.mxu0 %v4398_v17 }
 0xf87   : > { %v2290_v52 = vpop.f32.mrb[32].mxu0 }
 0xf88   : > { %v2291_v55 = vadd.f32 %v3844_v50, %v2290_v52  ;;  %v4098_v56 = vpop.f32.mrb[33].mxu0 }
 0xf89   : > { %v2293_v58 = vpop.f32.mrb[34].mxu0 }
 0xf8a   : > { %v2365_v59 = vmul.f32 0.35355338, %v2291_v55  ;;  %v2294_v2 = vadd.f32 %v3844_v50, %v2293_v58  ;;  %v4099_v60 = vpop.f32.mrb[35].mxu0 }
 0xf8c   : > { %v4963_v1 = vpack.c.bf16 %v2365_v59, %v2365_v59  ;;  %v2366_v5 = vmul.f32 0.35355338, %v2294_v2 }
 0xf8e   : > { %v4965_v3 = vpack.c.bf16 %v2366_v5, %v2366_v5  ;;  %4111 = vmatmul.mubr.msk.bf16.vlgmr.msra.gmra.mrb[36].mxu0 %vm1188_vm7, %v4963_v1 }
 0xf8f   : > { %4122 = vmatprep.mubr.msk.bf16.mxu0 %vm4399_vm2, %v4398_v17 }
 0xf90   : > { %4117 = vmatmul.mubr.msk.bf16.vlgmr.msra.gmra.mrb[44].mxu1 %vm1188_vm7, %v4965_v3 }
 0xf91   : > { %4128 = vmatprep.mubr.msk.bf16.mxu1 %vm4399_vm2, %v4398_v17 }
0x1061   : > { %v2423_v44 = vpop.f32.mrb[36].mxu0 }
0x1062   : > { %v2424_v9 = vadd.f32 %v2423_v44, %v4983_v39  ;;  %v4112_v10 = vpop.f32.mrb[37].mxu0 }
0x1063   : > { %v2426_v11 = vpop.f32.mrb[38].mxu0  ;;  %v2469_v12 = vpop.f32.mrb[44].mxu1 }
0x1064   : > { %v2470_v13 = vadd.f32 %v2469_v12, %v4985_v43  ;;  %v4113_v14 = vpop.f32.mrb[39].mxu0  ;;  %v4118_v15 = vpop.f32.mrb[45].mxu1  ;;  %v2475_v16 = vsel %vm1188_vm7, %v2424_v9, -inf }
0x1065   : > { %2476 = vmax.xlane.f32.xlu1 %v2475_v16  ;;  %v2472_v62 = vpop.f32.mrb[46].mxu1 }
0x1066   : > { %v4119_v51 = vpop.f32.mrb[47].mxu1  ;;  %v2478_v18 = vsel %vm1188_vm7, %v2470_v13, -inf }
0x1067   : > { %2479 = vmax.xlane.f32.xlu0 %v2478_v18 }
0x1076   : > { %2500 = vrot.lane.b32.xlu1 %v4948_v47, %s4400_s25 }
0x10f2   : > { %v2477_v19 = vpop.xlane.xlu1 %2476 }
0x10f3   : > { %v2481_v20 = vsub.f32 %v2424_v9, %v2477_v19 }
0x10f4   : > { %v2480_v21 = vpop.xlane.xlu0 %2479 }
0x10f5   : > { %v2483_v22 = vmul.f32 1.442695, %v2481_v20  ;;  %v2482_v23 = vsub.f32 %v2470_v13, %v2480_v21 }
0x10f6   : > { %v2501_v24 = vpop.permute.xlu1 %2500 }
0x10f7   : > { %4350 = vpow2.f32 %v2483_v22  ;;  %v2485_v25 = vmul.f32 1.442695, %v2482_v23  ;;  %v2506_v26 = vsel %vm1313_vm10, %v2501_v24, 0 }
0x10f8   : > { %4121 = vmatpush3.bf16.msra.mxu0 %v2506_v26 }
0x10f9   : > { %4352 = vpow2.f32 %v2485_v25  ;;  %4132 = vmatprep.subr.bf16.mxu0 %v4398_v17 }
0x1101   : > { %v4351_v27 = vpop.eup %4350 }
0x1102   : > { %v2487_v28 = vsel %vm1188_vm7, %v4351_v27, 0.0 }
0x1103   : > { %v4353_v61 = vpop.eup %4352  ;;  %2488 = vadd.xlane.f32.xlu1 %v2487_v28 }
0x1104   : > { %v2490_v29 = vsel %vm1188_vm7, %v4353_v61, 0.0 }
0x1105   : > { %2491 = vadd.xlane.f32.xlu0 %v2490_v29 }
0x1114   : > { %2600 = vrot.lane.b32.xlu1 %v4948_v47, %s4403_s22 }
0x1118   : > { %2651 = vrot.lane.b32.xlu1 %v4950_v49, %s4403_s22 }
0x111b   : > { %2549 = vrot.lane.b32.xlu0 %v4950_v49, %s4400_s25  ;;  %s5302_s25 = smov 24  }
0x111c   : > { %2598 = vrot.lane.b32.xlu1 %v4963_v1, %s4403_s22 }
0x111f   : > { %2649 = vrot.lane.b32.xlu0 %v4965_v3, %s4403_s22  ;;  %s5303_s22 = sld [smem:[#allocation18_spill]] }
0x1190   : > { %v2489_v30 = vpop.xlane.xlu1 %2488 }
0x1191   : > { %4354 = vrcp.f32 %v2489_v30 }
0x1192   : > { %v2492_v31 = vpop.xlane.xlu0 %2491 }
0x1193   : > { %4356 = vrcp.f32 %v2492_v31 }
0x1194   : > { %v2601_v34 = vpop.permute.xlu1 %2600 }
0x1195   : > { %v2606_v42 = vsel %vm1188_vm7, %v2601_v34, 0 }
0x1196   : > { %v2550_v32 = vpop.permute.xlu0 %2549 }
0x1197   : > { %v2555_v33 = vsel %vm1313_vm10, %v2550_v32, 0 }
0x1198   : > { %4127 = vmatpush3.bf16.msra.mxu1 %v2555_v33  ;;  %v2652_v41 = vpop.permute.xlu1 %2651 }
0x1199   : > { %4138 = vmatprep.subr.bf16.mxu1 %v4398_v17  ;;  %v2657_v46 = vsel %vm1188_vm7, %v2652_v41, 0 }
0x119a   : > { %v2650_v50 = vpop.permute.xlu0 %2649 }
0x119b   : > { %v4355_v35 = vpop.eup %4354 }
0x119c   : > { %v2495_v36 = vmul.f32 %v4355_v35, %v4351_v27  ;;  %v2599_v48 = vpop.permute.xlu1 %2598 }
0x119d   : > { %v4357_v37 = vpop.eup %4356 }
0x119e   : > { %v2496_v38 = vmul.f32 %v4357_v37, %v4353_v61  ;;  %v2497_v40 = vpack.c.bf16 %v2495_v36, %v2495_v36 }
0x11a0   : > { %4123 = vmatmul.mubr.msk.bf16.vlgmr.msra.gmra.mrb[40].mxu0 %vm1188_vm7, %v2497_v40  ;;  %v2498_v45 = vpack.c.bf16 %v2496_v38, %v2496_v38 }
0x11a1   : > { %4133 = vmatpush3.bf16.xpose.msra.mxu0 %v2606_v42  ;;  %4134 = vmatprep.mubr.msk.bf16.mxu0 %vm4399_vm2, %v4398_v17 }
0x11a2   : > { %4129 = vmatmul.mubr.msk.bf16.vlgmr.msra.gmra.mrb[48].mxu1 %vm1188_vm7, %v2498_v45  ;;  %4144 = vmatprep.subr.bf16.mxu0 %v4398_v17 }
0x11a3   : > { %4139 = vmatpush3.bf16.xpose.msra.mxu1 %v2657_v46  ;;  %4140 = vmatprep.mubr.msk.bf16.mxu1 %vm4399_vm2, %v4398_v17 }
0x11a4   : > { %4150 = vmatprep.subr.bf16.mxu1 %v4398_v17 }
0x11a8   : > { %4135 = vmatmul.mubr.msk.bf16.vlgmr.msra.gmra.mrb[44].mxu0 %vm1188_vm7, %v2599_v48 }
0x11a9   : > { %4146 = vmatprep.mubr.msk.bf16.mxu0 %vm4399_vm2, %v4398_v17 }
0x11aa   : > { %4141 = vmatmul.mubr.msk.bf16.vlgmr.msra.gmra.mrb[52].mxu1 %vm1188_vm7, %v2650_v50 }
0x11ab   : > { %4152 = vmatprep.mubr.msk.bf16.mxu1 %vm4399_vm2, %v4398_v17 }
0x1273   : > { %v5025_v52 = vpop.f32.mrb[40].mxu0 }
0x1274   : > { %v4124_v55 = vpop.f32.mrb[41].mxu0 }
0x1275   : > { %v2545_v56 = vpop.f32.mrb[42].mxu0  ;;  %v5027_v58 = vpop.f32.mrb[48].mxu1 }
0x1276   : > { %v4125_v59 = vpop.f32.mrb[43].mxu0  ;;  %v4130_v2 = vpop.f32.mrb[49].mxu1 }
0x1277   : > { %v2594_v60 = vpop.f32.mrb[50].mxu1 }
0x1278   : > { %v4131_v5 = vpop.f32.mrb[51].mxu1 }
0x127b   : > { %v2642_v63 = vpop.f32.mrb[44].mxu0 }
0x127c   : > { %v2643_v0 = vadd.f32 %v2642_v63, %v4983_v39  ;;  %v4136_v4 = vpop.f32.mrb[45].mxu0 }
0x127d   : > { %v2645_v6 = vpop.f32.mrb[46].mxu0  ;;  %v2693_v7 = vpop.f32.mrb[52].mxu1 }
0x127e   : > { %v2694_v54 = vadd.f32 %v2693_v7, %v4985_v43  ;;  %v4137_v8 = vpop.f32.mrb[47].mxu0  ;;  %v4142_v44 = vpop.f32.mrb[53].mxu1  ;;  %v2699_v9 = vsel %vm1188_vm7, %v2643_v0, -inf }
0x127f   : > { %2700 = vmax.xlane.f32.xlu1 %v2699_v9  ;;  %v2696_v10 = vpop.f32.mrb[54].mxu1 }
0x1280   : > { %v4143_v11 = vpop.f32.mrb[55].mxu1  ;;  %v2702_v12 = vsel %vm1188_vm7, %v2694_v54, -inf }
0x1281   : > { %2703 = vmax.xlane.f32.xlu0 %v2702_v12 }
0x1290   : > { %2723 = vrot.lane.b32.xlu1 %v4948_v47, %s4402_s2 }
0x1294   : > { %2821 = vrot.lane.b32.xlu1 %v4948_v47, %s4406_s4 }
0x1298   : > { %2871 = vrot.lane.b32.xlu1 %v4950_v49, %s4406_s4 }
0x129c   : > { %2819 = vrot.lane.b32.xlu1 %v4963_v1, %s4406_s4 }
0x130c   : > { %v2701_v13 = vpop.xlane.xlu1 %2700 }
0x130d   : > { %v2705_v14 = vsub.f32 %v2643_v0, %v2701_v13 }
0x130e   : > { %v2704_v15 = vpop.xlane.xlu0 %2703 }
0x130f   : > { %v2707_v16 = vmul.f32 1.442695, %v2705_v14  ;;  %v2706_v62 = vsub.f32 %v2694_v54, %v2704_v15 }
0x1310   : > { %v2724_v51 = vpop.permute.xlu1 %2723 }
0x1311   : > { %4358 = vpow2.f32 %v2707_v16  ;;  %v2709_v18 = vmul.f32 1.442695, %v2706_v62  ;;  %v2729_v19 = vsel %vm1313_vm10, %v2724_v51, 0 }
0x1312   : > { %4145 = vmatpush3.bf16.msra.mxu0 %v2729_v19 }
0x1313   : > { %4360 = vpow2.f32 %v2709_v18  ;;  %4156 = vmatprep.subr.bf16.mxu0 %v4398_v17 }
0x1314   : > { %v2822_v61 = vpop.permute.xlu1 %2821 }
0x1315   : > { %v2827_v32 = vsel %vm1188_vm7, %v2822_v61, 0 }
0x1318   : > { %v2872_v34 = vpop.permute.xlu1 %2871 }
0x1319   : > { %v2877_v36 = vsel %vm1188_vm7, %v2872_v34, 0 }
0x131b   : > { %v4359_v20 = vpop.eup %4358 }
0x131c   : > { %v2711_v21 = vsel %vm1188_vm7, %v4359_v20, 0.0  ;;  %v2820_v37 = vpop.permute.xlu1 %2819 }
0x131d   : > { %v4361_v22 = vpop.eup %4360  ;;  %2712 = vadd.xlane.f32.xlu0 %v2711_v21 }
0x131e   : > { %v2714_v23 = vsel %vm1188_vm7, %v4361_v22, 0.0 }
0x1321   : > { %2715 = vadd.xlane.f32.xlu0 %v2714_v23 }
0x1337   : > { %2771 = vrot.lane.b32.xlu0 %v4950_v49, %s4402_s2 }
0x133b   : > { %2869 = vrot.lane.b32.xlu0 %v4965_v3, %s4406_s4 }
0x13aa   : > { %v2713_v24 = vpop.xlane.xlu0 %2712 }
0x13ab   : > { %4362 = vrcp.f32 %v2713_v24 }
0x13ae   : > { %v2716_v25 = vpop.xlane.xlu0 %2715 }
0x13af   : > { %4364 = vrcp.f32 %v2716_v25 }
0x13b2   : > { %v2772_v26 = vpop.permute.xlu0 %2771 }
0x13b3   : > { %v2777_v27 = vsel %vm1313_vm10, %v2772_v26, 0 }
0x13b4   : > { %4151 = vmatpush3.bf16.msra.mxu1 %v2777_v27 }
0x13b5   : > { %v4363_v28 = vpop.eup %4362  ;;  %4162 = vmatprep.subr.bf16.mxu1 %v4398_v17 }
0x13b6   : > { %v2719_v29 = vmul.f32 %v4363_v28, %v4359_v20  ;;  %v2870_v38 = vpop.permute.xlu0 %2869 }
0x13b8   : > { %v2721_v30 = vpack.c.bf16 %v2719_v29, %v2719_v29 }
0x13b9   : > { %v4365_v31 = vpop.eup %4364 }
0x13ba   : > { %v2720_v33 = vmul.f32 %v4365_v31, %v4361_v22  ;;  %4147 = vmatmul.mubr.msk.bf16.vlgmr.msra.gmra.mrb[48].mxu0 %vm1188_vm7, %v2721_v30 }
0x13bb   : > { %4157 = vmatpush3.bf16.xpose.msra.mxu0 %v2827_v32  ;;  %4158 = vmatprep.mubr.msk.bf16.mxu0 %vm4399_vm2, %v4398_v17 }
0x13bc   : > { %v2722_v35 = vpack.c.bf16 %v2720_v33, %v2720_v33  ;;  %4168 = vmatprep.subr.bf16.mxu0 %v4398_v17 }
0x13be   : > { %4153 = vmatmul.mubr.msk.bf16.vlgmr.msra.gmra.mrb[56].mxu1 %vm1188_vm7, %v2722_v35 }
0x13bf   : > { %4163 = vmatpush3.bf16.xpose.msra.mxu1 %v2877_v36  ;;  %4164 = vmatprep.mubr.msk.bf16.mxu1 %vm4399_vm2, %v4398_v17 }
0x13c0   : > { %4174 = vmatprep.subr.bf16.mxu1 %v4398_v17 }
0x13c2   : > { %4159 = vmatmul.mubr.msk.bf16.vlgmr.msra.gmra.mrb[52].mxu0 %vm1188_vm7, %v2820_v37 }
0x13c3   : > { %4170 = vmatprep.mubr.msk.bf16.mxu0 %vm4399_vm2, %v4398_v17 }
0x13c6   : > { %4165 = vmatmul.mubr.msk.bf16.vlgmr.msra.gmra.mrb[60].mxu1 %vm1188_vm7, %v2870_v38 }
0x13c7   : > { %4176 = vmatprep.mubr.msk.bf16.mxu1 %vm4399_vm2, %v4398_v17 }
0x148d   : > { %v5067_v40 = vpop.f32.mrb[48].mxu0 }
0x148e   : > { %v4148_v41 = vpop.f32.mrb[49].mxu0 }
0x148f   : > { %v2768_v42 = vpop.f32.mrb[50].mxu0 }
0x1490   : > { %v4149_v45 = vpop.f32.mrb[51].mxu0 }
0x1491   : > { %v5069_v46 = vpop.f32.mrb[56].mxu1 }
0x1492   : > { %v4271_v48 = vpack.i.bf16 %v5069_v46, %v5067_v40  ;;  %v4154_v50 = vpop.f32.mrb[57].mxu1 }
0x1493   : > { %v2816_v55 = vpop.f32.mrb[58].mxu1 }
0x1494   : > { %v4155_v56 = vpop.f32.mrb[59].mxu1 }
0x1495   : > { %v2863_v59 = vpop.f32.mrb[52].mxu0 }
0x1496   : > { %v2864_v2 = vadd.f32 %v2863_v59, %v4983_v39  ;;  %v4160_v60 = vpop.f32.mrb[53].mxu0 }
0x1497   : > { %v2866_v5 = vpop.f32.mrb[54].mxu0 }
0x1498   : > { %v4161_v63 = vpop.f32.mrb[55].mxu0  ;;  %v2919_v0 = vsel %vm1188_vm7, %v2864_v2, -inf }
0x1499   : > { %2920 = vmax.xlane.f32.xlu1 %v2919_v0  ;;  %v2913_v4 = vpop.f32.mrb[60].mxu1 }
0x149a   : > { %v2914_v6 = vadd.f32 %v2913_v4, %v4985_v43  ;;  %v4166_v7 = vpop.f32.mrb[61].mxu1 }
0x149b   : > { %v2916_v54 = vpop.f32.mrb[62].mxu1 }
0x149c   : > { %v4167_v8 = vpop.f32.mrb[63].mxu1  ;;  %v2922_v44 = vsel %vm1188_vm7, %v2914_v6, -inf }
0x149d   : > { %2923 = vmax.xlane.f32.xlu0 %v2922_v44 }
0x14aa   : > { %2943 = vrot.lane.b32.xlu1 %v4948_v47, %s4405_s13 }
0x14ae   : > { %3041 = vrot.lane.b32.xlu1 %v4948_v47, %s4409_s12 }
0x14b2   : > { %3091 = vrot.lane.b32.xlu1 %v4950_v49, %s4409_s12 }
0x14b6   : > { %3039 = vrot.lane.b32.xlu1 %v4963_v1, %s4409_s12 }
0x1526   : > { %v2921_v9 = vpop.xlane.xlu1 %2920 }
0x1527   : > { %v2925_v10 = vsub.f32 %v2864_v2, %v2921_v9 }
0x1529   : > { %v2927_v11 = vmul.f32 1.442695, %v2925_v10 }
0x152a   : > { %v2944_v12 = vpop.permute.xlu1 %2943  ;;  %v2924_v13 = vpop.xlane.xlu0 %2923 }
0x152b   : > { %4366 = vpow2.f32 %v2927_v11  ;;  %v2949_v14 = vsel %vm1313_vm10, %v2944_v12, 0  ;;  %v2926_v15 = vsub.f32 %v2914_v6, %v2924_v13 }
0x152c   : > { %4169 = vmatpush3.bf16.msra.mxu0 %v2949_v14 }
0x152d   : > { %v2929_v16 = vmul.f32 1.442695, %v2926_v15  ;;  %4180 = vmatprep.subr.bf16.mxu0 %v4398_v17 }
0x152e   : > { %v3042_v24 = vpop.permute.xlu1 %3041 }
0x152f   : > { %4368 = vpow2.f32 %v2929_v16  ;;  %v3047_v28 = vsel %vm1188_vm7, %v3042_v24, 0 }
0x1535   : > { %v4367_v62 = vpop.eup %4366 }
0x1536   : > { %v2931_v51 = vsel %vm1188_vm7, %v4367_v62, 0.0 }
0x1537   : > { %2932 = vadd.xlane.f32.xlu0 %v2931_v51 }
0x1539   : > { %v4369_v18 = vpop.eup %4368 }
0x153a   : > { %v2934_v1 = vsel %vm1188_vm7, %v4369_v18, 0.0 }
0x153b   : > { %2935 = vadd.xlane.f32.xlu0 %v2934_v1 }
0x1551   : > { %2991 = vrot.lane.b32.xlu0 %v4950_v49, %s4405_s13  ;;  %s5304_s13 = scalar_lea.vmem %s5303_s22, %s4551_s27 }
0x1555   : > { %3089 = vrot.lane.b32.xlu0 %v4965_v3, %s4409_s12  ;;  %v3092_v3 = vpop.permute.xlu1 %3091 }
0x1556   : > { %v3097_v30 = vsel %vm1188_vm7, %v3092_v3, 0 }
0x1559   : > { %v3040_v31 = vpop.permute.xlu1 %3039 }
0x15c4   : > { %v2933_v19 = vpop.xlane.xlu0 %2932 }
0x15c5   : > { %4370 = vrcp.f32 %v2933_v19  ;;  %v4294_v19 = vld [vmem:[%s4609_s5] sm:$0xff]  }
0x15c8   : > { %v2936_v20 = vpop.xlane.xlu0 %2935 }
0x15c9   : > { %4372 = vrcp.f32 %v2936_v20  ;;  %v4295_v20 = vld [vmem:[%s4609_s5 + $0x8] sm:$0xff]  }
0x15cc   : > { %v2992_v21 = vpop.permute.xlu0 %2991 }
0x15cd   : > { %v2997_v22 = vsel %vm1313_vm10, %v2992_v21, 0 }
0x15ce   : > { %4175 = vmatpush3.bf16.msra.mxu1 %v2997_v22 }
0x15cf   : > { %v4371_v23 = vpop.eup %4370  ;;  %4186 = vmatprep.subr.bf16.mxu1 %v4398_v17 }
0x15d0   : > { %v2939_v25 = vmul.f32 %v4371_v23, %v4367_v62  ;;  %v3090_v32 = vpop.permute.xlu0 %3089 }
0x15d2   : > { %v2941_v26 = vpack.c.bf16 %v2939_v25, %v2939_v25 }
0x15d3   : > { %v4373_v27 = vpop.eup %4372 }
0x15d4   : > { %v2940_v61 = vmul.f32 %v4373_v27, %v4369_v18  ;;  %4171 = vmatmul.mubr.msk.bf16.vlgmr.msra.gmra.mrb[56].mxu0 %vm1188_vm7, %v2941_v26 }
0x15d5   : > { %4181 = vmatpush3.bf16.xpose.msra.mxu0 %v3047_v28  ;;  %4182 = vmatprep.mubr.msk.bf16.mxu0 %vm4399_vm2, %v4398_v17 }
0x15d6   : > { %v2942_v29 = vpack.c.bf16 %v2940_v61, %v2940_v61  ;;  %4192 = vmatprep.subr.bf16.mxu0 %v4398_v17 }
0x15d8   : > { %4177 = vmatmul.mubr.msk.bf16.vlgmr.msra.gmra.mrb[64].mxu1 %vm1188_vm7, %v2942_v29 }
0x15d9   : > { %4187 = vmatpush3.bf16.xpose.msra.mxu1 %v3097_v30  ;;  %4188 = vmatprep.mubr.msk.bf16.mxu1 %vm4399_vm2, %v4398_v17 }
0x15da   : > { %4198 = vmatprep.subr.bf16.mxu1 %v4398_v17 }
0x15dc   : > { %4183 = vmatmul.mubr.msk.bf16.vlgmr.msra.gmra.mrb[60].mxu0 %vm1188_vm7, %v3040_v31 }
0x15dd   : > { %4194 = vmatprep.mubr.msk.bf16.mxu0 %vm4399_vm2, %v4398_v17 }
0x15e0   : > { %4189 = vmatmul.mubr.msk.bf16.vlgmr.msra.gmra.mrb[68].mxu1 %vm1188_vm7, %v3090_v32 }
0x15e1   : > { %4200 = vmatprep.mubr.msk.bf16.mxu1 %vm4399_vm2, %v4398_v17 }
0x16a7   : > { %v2985_v33 = vpop.f32.mrb[56].mxu0 }
0x16a8   : > { %v4172_v34 = vpop.f32.mrb[57].mxu0 }
0x16a9   : > { %v2988_v35 = vpop.f32.mrb[58].mxu0 }
0x16aa   : > { %v4173_v36 = vpop.f32.mrb[59].mxu0 }
0x16ab   : > { %v3033_v37 = vpop.f32.mrb[64].mxu1 }
0x16ac   : > { %v4276_v38 = vpack.i.bf16 %v3033_v37, %v2985_v33  ;;  %v4178_v41 = vpop.f32.mrb[65].mxu1 }
0x16ad   : > { %v3036_v42 = vpop.f32.mrb[66].mxu1 }
0x16ae   : > { %v4179_v45 = vpop.f32.mrb[67].mxu1 }
0x16af   : > { %v3083_v50 = vpop.f32.mrb[60].mxu0 }
0x16b0   : > { %v3084_v55 = vadd.f32 %v3083_v50, %v4983_v39  ;;  %v4184_v56 = vpop.f32.mrb[61].mxu0 }
0x16b1   : > { %v3086_v59 = vpop.f32.mrb[62].mxu0 }
0x16b2   : > { %v4185_v2 = vpop.f32.mrb[63].mxu0  ;;  %v3139_v60 = vsel %vm1188_vm7, %v3084_v55, -inf }
0x16b3   : > { %3140 = vmax.xlane.f32.xlu1 %v3139_v60  ;;  %v3133_v5 = vpop.f32.mrb[68].mxu1 }
0x16b4   : > { %v3134_v63 = vadd.f32 %v3133_v5, %v4985_v43  ;;  %v4190_v0 = vpop.f32.mrb[69].mxu1 }
0x16b5   : > { %v3136_v4 = vpop.f32.mrb[70].mxu1 }
0x16b6   : > { %v4191_v6 = vpop.f32.mrb[71].mxu1  ;;  %v3142_v7 = vsel %vm1188_vm7, %v3134_v63, -inf }
0x16b7   : > { %3143 = vmax.xlane.f32.xlu0 %v3142_v7 }
0x16c4   : > { %3163 = vrot.lane.b32.xlu1 %v4948_v47, %s4408_s1 }
0x16c8   : > { %4272 = vrot.lane.b32.xlu1 %v4271_v48, %s4411_s6 }
0x16cc   : > { %4277 = vrot.lane.b32.xlu1 %v4276_v38, %s4412_s7  ;;  %s5306_s7 = scalar_lea.vmem %s5234_s19, %s4551_s27 }
0x1740   : > { %v3141_v39 = vpop.xlane.xlu1 %3140 }
0x1741   : > { %v3145_v54 = vsub.f32 %v3084_v55, %v3141_v39 }
0x1743   : > { %v3147_v8 = vmul.f32 1.442695, %v3145_v54 }
0x1744   : > { %v3164_v43 = vpop.permute.xlu1 %3163  ;;  %v3144_v44 = vpop.xlane.xlu0 %3143 }
0x1745   : > { %4374 = vpow2.f32 %v3147_v8  ;;  %v3169_v9 = vsel %vm1313_vm10, %v3164_v43, 0  ;;  %v3146_v10 = vsub.f32 %v3134_v63, %v3144_v44 }
0x1746   : > { %4193 = vmatpush3.bf16.msra.mxu0 %v3169_v9 }
0x1747   : > { %v3149_v11 = vmul.f32 1.442695, %v3146_v10  ;;  %4204 = vmatprep.subr.bf16.mxu0 %v4398_v17 }
0x1748   : > { %v4273_v3 = vpop.permute.xlu1 %4272 }
0x1749   : > { %4376 = vpow2.f32 %v3149_v11  ;;  %v4275_v30 = vunpack.i.h.bf16 %v4273_v3  ;;  %v4274_v31 = vunpack.i.l.bf16 %v4273_v3  ;;  %v4296_v11 = vld [vmem:[%s4626_s8] sm:$0xff]  }
0x174a   : > { %v3873_v3 = vld [vmem:[%s5306_s7] ss:$0 sm:$0xff] }
0x174b   : > { %v3284_v35 = vsel %vm1188_vm7, %v5027_v58, %v4275_v30  ;;  %v3283_v36 = vsel %vm1188_vm7, %v5025_v52, %v4274_v31  ;;  %v3871_v52 = vld [vmem:[%s5304_s13] ss:$0 sm:$0xff] }
0x174c   : > { %v4278_v29 = vpop.permute.xlu1 %4277 }
0x174d   : > { %v4280_v32 = vunpack.i.h.bf16 %v4278_v29  ;;  %v4279_v33 = vunpack.i.l.bf16 %v4278_v29 }
0x174f   : > { %v4375_v47 = vpop.eup %4374  ;;  %v3286_v41 = vsel %vm2093_vm11, %v3284_v35, %v4280_v32  ;;  %v3285_v42 = vsel %vm2093_vm11, %v3283_v36, %v4279_v33  ;;  %v4300_v33 = vld [vmem:[%s4636_s17 + $0x10] sm:$0xff]   ;;  %v3874_v35 = vld [vmem:[%s5307_s30] ss:$0 sm:$0xff] }
0x1750   : > { %v3151_v40 = vsel %vm1188_vm7, %v4375_v47, 0.0 }
0x1751   : > { %3152 = vadd.xlane.f32.xlu0 %v3151_v40  ;;  %v4298_v40 = vld [vmem:[%s4636_s17] sm:$0xff]  }
0x1753   : > { %v4377_v46 = vpop.eup %4376 }
0x1754   : > { %v3154_v48 = vsel %vm1188_vm7, %v4377_v46, 0.0 }
0x1755   : > { %3155 = vadd.xlane.f32.xlu0 %v3154_v48 }
0x176b   : > { %3211 = vrot.lane.b32.xlu0 %v4950_v49, %s4408_s1  ;;  %s5305_s1 = scalar_lea.vmem %s5233_s18, %s4551_s27 }
0x17de   : > { %v3153_v12 = vpop.xlane.xlu0 %3152 }
0x17df   : > { %4378 = vrcp.f32 %v3153_v12 }
0x17e2   : > { %v3156_v13 = vpop.xlane.xlu0 %3155 }
0x17e3   : > { %4380 = vrcp.f32 %v3156_v13 }
0x17e6   : > { %v3212_v14 = vpop.permute.xlu0 %3211 }
0x17e7   : > { %v3217_v15 = vsel %vm1313_vm10, %v3212_v14, 0 }
0x17e8   : > { %4199 = vmatpush3.bf16.msra.mxu1 %v3217_v15 }
0x17e9   : > { %v4379_v16 = vpop.eup %4378  ;;  %4212 = vmatprep.subr.bf16.mxu1 %v4398_v17 }
0x17ea   : > { %v3159_v62 = vmul.f32 %v4379_v16, %v4375_v47  ;;  %v4297_v47 = vld [vmem:[%s4626_s8 + $0x8] sm:$0xff]  }
0x17ec   : > { %v3161_v51 = vpack.c.bf16 %v3159_v62, %v3159_v62 }
0x17ed   : > { %v4381_v18 = vpop.eup %4380 }
0x17ee   : > { %v3160_v1 = vmul.f32 %v4381_v18, %v4377_v46  ;;  %4195 = vmatmul.mubr.msk.bf16.vlgmr.msra.gmra.mrb[64].mxu0 %vm1188_vm7, %v3161_v51  ;;  %v4299_v46 = vld [vmem:[%s4636_s17 + $0x8] sm:$0xff]  }
0x17ef   : > { %4208 = vmatprep.mubr.msk.bf16.mxu0 %vm4399_vm2, %v4398_v17  ;;  %4205 = vmatpush3.bf16.msra.mxu0 %v4294_v19 }
0x17f0   : > { %v3162_v49 = vpack.c.bf16 %v3160_v1, %v3160_v1  ;;  %4206 = vmatprep.subr.bf16.mxu0 %v4398_v17 }
0x17f2   : > { %4201 = vmatmul.mubr.msk.bf16.vlgmr.msra.gmra.mrb[72].mxu1 %vm1188_vm7, %v3162_v49 }
0x17f3   : > { %4216 = vmatprep.mubr.msk.bf16.mxu1 %vm4399_vm2, %v4398_v17  ;;  %4207 = vmatpush3.bf16.msra.mxu0 %v4295_v20 }
0x17f4   : > { %4220 = vmatprep.subr.bf16.mxu0 %v4398_v17  ;;  %4213 = vmatpush3.bf16.msra.mxu1 %v4296_v11 }
0x17f5   : > { %4214 = vmatprep.subr.bf16.mxu1 %v4398_v17 }
0x17f8   : > { %4215 = vmatpush3.bf16.msra.mxu1 %v4297_v47 }
0x18c1   : > { %v3205_v21 = vpop.f32.mrb[64].mxu0 }
0x18c2   : > { %v4196_v22 = vpop.f32.mrb[65].mxu0 }
0x18c3   : > { %v3208_v23 = vpop.f32.mrb[66].mxu0 }
0x18c4   : > { %v4197_v24 = vpop.f32.mrb[67].mxu0 }
0x18c5   : > { %v3253_v25 = vpop.f32.mrb[72].mxu1  ;;  %v3872_v24 = vld [vmem:[%s5305_s1] ss:$0 sm:$0xff] }
0x18c6   : > { %v4281_v26 = vpack.i.bf16 %v3253_v25, %v3205_v21  ;;  %v4202_v27 = vpop.f32.mrb[73].mxu1 }
0x18c7   : > { %v3256_v28 = vpop.f32.mrb[74].mxu1 }
0x18c8   : > { %4282 = vrot.lane.b32.xlu1 %v4281_v26, %s5302_s25  ;;  %v4203_v61 = vpop.f32.mrb[75].mxu1  ;;  %s5309_s25 = scalar_lea.vmem %s5308_s29, %s4551_s27 }
0x193a   : > { %v4283_v34 = vpop.permute.xlu1 %4282 }
0x193b   : > { %v4285_v37 = vunpack.i.h.bf16 %v4283_v34  ;;  %v4284_v38 = vunpack.i.l.bf16 %v4283_v34  ;;  %v4301_v34 = vld [vmem:[%s4636_s17 + $0x18] sm:$0xff]  }
0x193d   : > { %v3288_v45 = vsel %vm2096_vm12, %v3286_v41, %v4285_v37  ;;  %v3287_v50 = vsel %vm2096_vm12, %v3285_v42, %v4284_v38 }
0x193e   : > { %v3289_v55 = vpack.c.bf16 %v3288_v45, %v3287_v50 }
0x1940   : > { %4209 = vmatmul.mubr.msk.bf16.vlgmr.msra.gmra.mrb[68].mxu0 %vm1053_vm1, %v3289_v55 }
0x1941   : > { %4228 = vmatprep.mubr.msk.bf16.mxu0 %vm4399_vm2, %v4398_v17  ;;  %4221 = vmatpush3.bf16.msra.mxu0 %v4298_v40 }
0x1942   : > { %4222 = vmatprep.subr.bf16.mxu0 %v4398_v17 }
0x1945   : > { %4223 = vmatpush3.bf16.msra.mxu0 %v4299_v46 }
0x1946   : > { %4224 = vmatprep.subr.bf16.mxu0 %v4398_v17 }
0x1949   : > { %4225 = vmatpush3.bf16.msra.mxu0 %v4300_v33 }
0x194a   : > { %4226 = vmatprep.subr.bf16.mxu0 %v4398_v17 }
0x194d   : > { %4227 = vmatpush3.bf16.msra.mxu0 %v4301_v34 }
0x1a13   : > { %v3343_v58 = vpop.f32.mrb[68].mxu0 }
0x1a14   : > { %v3350_v56 = vadd.f32 %v3343_v58, %v4900_v53  ;;  %v4210_v59 = vpop.f32.mrb[69].mxu0 }
0x1a15   : > { %v3346_v2 = vpop.f32.mrb[70].mxu0 }
0x1a16   : > { %v5158_v60 = vadd.f32 %v3871_v52, %v3350_v56  ;;  %v3351_v5 = vadd.f32 %v3346_v2, %v4903_v57  ;;  %v4211_v63 = vpop.f32.mrb[71].mxu0 }
0x1a18   : > { %v5161_v0 = vadd.f32 %v3871_v52, %v3351_v5  ;;  %v3363_v4 = vsel %vm1053_vm1, %v5158_v60, 0.0  ;;  %v3883_v52 = vld [vmem:[%s5309_s25] ss:$0 sm:$0xff] }
0x1a19   : > { %3364 = vadd.xlane.f32.xlu0 %v3363_v4 }
0x1a1a   : > { %v3366_v6 = vsel %vm1053_vm1, %v5161_v0, 0.0 }
0x1a1b   : > { %3367 = vadd.xlane.f32.xlu1 %v3366_v6 }
0x1aa6   : > { %v3365_v53 = vpop.xlane.xlu0 %3364 }
0x1aa7   : > { %v3369_v7 = vmul.f32 0.03125, %v3365_v53 }
0x1aa8   : > { %v3368_v39 = vpop.xlane.xlu1 %3367 }
0x1aa9   : > { %v3371_v54 = vsub.f32 %v5158_v60, %v3369_v7  ;;  %v3370_v57 = vmul.f32 0.03125, %v3368_v39 }
0x1aab   : > { %v3372_v8 = vsub.f32 %v5161_v0, %v3370_v57  ;;  %v3373_v43 = vmul.f32 %v3371_v54, %v3371_v54  ;;  %v3389_v26 = vmul.f32 %v3872_v24, %v3371_v54 }
0x1aad   : > { %v3375_v44 = vsel %vm1053_vm1, %v3373_v43, 0.0  ;;  %v3374_v9 = vmul.f32 %v3372_v8, %v3372_v8  ;;  %v3390_v27 = vmul.f32 %v3872_v24, %v3372_v8 }
0x1aae   : > { %3376 = vadd.xlane.f32.xlu0 %v3375_v44 }
0x1aaf   : > { %v3378_v10 = vsel %vm1053_vm1, %v3374_v9, 0.0 }
0x1ab2   : > { %3379 = vadd.xlane.f32.xlu0 %v3378_v10 }
0x1b3b   : > { %v3377_v48 = vpop.xlane.xlu0 %3376 }
0x1b3c   : > { %v3381_v12 = vmul.f32 0.032258064, %v3377_v48 }
0x1b3e   : > { %4382 = vrsqrt.f32 %v3381_v12  ;;  %vm3393_vm2 = vcmp.eq.f32.partialorder %v3381_v12, inf  ;;  %v3396_v62 = vand.u32 2147483648, %v3381_v12  ;;  %vm3395_vm5 = vcmp.eq.f32.partialorder %v3381_v12, 0.0 }
0x1b3f   : > { %v3380_v13 = vpop.xlane.xlu0 %3379 }
0x1b40   : > { %v3382_v14 = vmul.f32 0.032258064, %v3380_v13 }
0x1b42   : > { %4384 = vrsqrt.f32 %v3382_v14  ;;  %vm3400_vm6 = vcmp.eq.f32.partialorder %v3382_v14, inf  ;;  %v3403_v20 = vand.u32 2147483648, %v3382_v14  ;;  %vm3402_vm7 = vcmp.eq.f32.partialorder %v3382_v14, 0.0 }
0x1b48   : > { %v4383_v15 = vpop.eup %4382 }
0x1b49   : > { %v3392_v16 = vmul.f32 %v4383_v15, %v3381_v12 }
0x1b4b   : > { %v3394_v51 = vsel %vm3393_vm2, %v3381_v12, %v3392_v16 }
0x1b4c   : > { %v4385_v18 = vpop.eup %4384  ;;  %v3397_v1 = vsel %vm3395_vm5, %v3396_v62, %v3394_v51 }
0x1b4d   : > { %v3405_v49 = vadd.f32 1e-06, %v3397_v1  ;;  %v3399_v19 = vmul.f32 %v4385_v18, %v3382_v14 }
0x1b4f   : > { %4386 = vrcp.f32 %v3405_v49  ;;  %v3401_v21 = vsel %vm3400_vm6, %v3382_v14, %v3399_v19 }
0x1b50   : > { %v3404_v22 = vsel %vm3402_vm7, %v3403_v20, %v3401_v21 }
0x1b51   : > { %v3406_v23 = vadd.f32 1e-06, %v3404_v22 }
0x1b53   : > { %4388 = vrcp.f32 %v3406_v23 }
0x1b59   : > { %v4387_v25 = vpop.eup %4386 }
0x1b5a   : > { %v3408_v28 = vmul.f32 %v4387_v25, %v3389_v26 }
0x1b5c   : > { %v3417_v30 = vadd.f32 %v3873_v3, %v3408_v28 }
0x1b5d   : > { %v4389_v61 = vpop.eup %4388 }
0x1b5e   : > { %v3410_v29 = vmul.f32 %v4389_v61, %v3390_v27 }
0x1b60   : > { %v3418_v31 = vadd.f32 %v3873_v3, %v3410_v29 }
0x1b62   : > { %v3419_v32 = vpack.c.bf16 %v3418_v31, %v3417_v30 }
0x1b64   : > { %4217 = vmatmul.mubr.msk.bf16.vlgmr.msra.gmra.mrb[76].mxu1 %vm1053_vm1, %v3419_v32 }
0x1c37   : > { %v3480_v36 = vpop.f32.mrb[76].mxu1 }
0x1c38   : > { %v3481_v37 = vadd.f32 %v3874_v35, %v3480_v36  ;;  %v4218_v38 = vpop.f32.mrb[77].mxu1 }
0x1c39   : > { %v3483_v41 = vpop.f32.mrb[78].mxu1 }
0x1c3a   : > { %v3484_v42 = vadd.f32 %v3874_v35, %v3483_v41  ;;  %v4219_v45 = vpop.f32.mrb[79].mxu1  ;;  %v3487_v50 = vmax.f32 %v3481_v37, 0.0 }
0x1c3c   : > { %v3488_v55 = vmax.f32 %v3484_v42, 0.0 }
0x1c3e   : > { %v3489_v58 = vpack.c.bf16 %v3488_v55, %v3487_v50 }
0x1c40   : > { %4229 = vmatmul.mubr.msk.bf16.vlgmr.msra.gmra.mrb[72].mxu0 %vm3522_vm8, %v3489_v58 }
0x1d13   : > { %v3560_v17 = vpop.f32.mrb[72].mxu0 }
0x1d14   : > { %v3567_v56 = vadd.f32 %v3560_v17, %v5158_v60  ;;  %v4230_v59 = vpop.f32.mrb[73].mxu0 }
0x1d15   : > { %v3563_v2 = vpop.f32.mrb[74].mxu0 }
0x1d16   : > { %v3576_v5 = vadd.f32 %v3883_v52, %v3567_v56  ;;  %v3568_v63 = vadd.f32 %v3563_v2, %v5161_v0  ;;  %v4231_v4 = vpop.f32.mrb[75].mxu0 }
0x1d18   : > { %3578 = vst.msk [vmem:[%s5285_s23] sm:$0xff] %vm1053_vm1, %v3576_v5  ;;  %v3577_v6 = vadd.f32 %v3883_v52, %v3568_v63 }
0x1d1a   : > { %3579 = vst.msk [vmem:[%s5285_s23 + $0x8] sm:$0xff] %vm1053_vm1, %v3577_v6 }
0x1d1b PF: > { %s5310_s27 = sld [smem:[#allocation2_spill]] }
0x1d21   : > { %s34_s5 = sadd.s32 1, %s5310_s27  }
0x1d22   : > { %p31_p5 = scmp.ge.s32.totalorder %s34_s5, 4  }
0x1d24   :  { %33 = sbr.rel (!%p31_p5) target bundleno = 18 (0x12), region = 203 }

</bundles_post_ra>
